<compile_context>
chip_gen: v6e
topology: v6e:2x2x1
jax: 0.10.0
libtpu: 0.0.40
codegen_flags: <defaults>
</compile_context>

<pallas_src>
import math

import jax
import jax.numpy as jnp
from jax.experimental import pallas as pl
from jax.experimental.pallas import tpu as pltpu


def _round_up(x, m):
    return ((x + m - 1) // m) * m


def _pick_tile(dim, candidates):
    for c in candidates:
        if c <= dim and dim % c == 0:
            return c
    return dim


# ---------------------------------------------------------------------------
# Fused path: matmul + batch stats + BN + sin in one kernel (z never leaves VMEM)
# ---------------------------------------------------------------------------
def _make_fused_kernel(omega_0, eps):
    def kernel(x_ref, w_ref, b_ref, g_ref, be_ref, o_ref):
        # (M, K) @ (K, bn) on the MXU; f32 accumulation.
        z = jnp.dot(x_ref[...], w_ref[...], preferred_element_type=jnp.float32)
        z = omega_0 * (z + b_ref[...])                              # (M, bn) f32
        inv_n = 1.0 / jnp.float32(z.shape[0])
        mean = jnp.sum(z, axis=0, keepdims=True) * inv_n            # (1, bn)
        var = jnp.maximum(
            jnp.sum(z * z, axis=0, keepdims=True) * inv_n - mean * mean, 0.0)
        scale = g_ref[...] * jax.lax.rsqrt(var + eps)
        shift = be_ref[...] - mean * scale
        o_ref[...] = jnp.sin(z * scale + shift)
    return kernel


def _fused_forward(x_c, w_c, b_p, g_p, be_p, omega, eps, M, K, N_pad, bn):
    nj = N_pad // bn
    return pl.pallas_call(
        _make_fused_kernel(omega, eps),
        out_shape=jax.ShapeDtypeStruct((M, N_pad), jnp.float32),
        grid=(nj,),
        in_specs=[
            pl.BlockSpec((M, K), lambda j: (0, 0)),      # x, full extent (no pad)
            pl.BlockSpec((K, bn), lambda j: (0, j)),     # W^T column strip
            pl.BlockSpec((1, bn), lambda j: (0, j)),     # bias
            pl.BlockSpec((1, bn), lambda j: (0, j)),     # gamma
            pl.BlockSpec((1, bn), lambda j: (0, j)),     # beta
        ],
        out_specs=pl.BlockSpec((M, bn), lambda j: (0, j)),
        compiler_params=pltpu.CompilerParams(
            dimension_semantics=("parallel",)),
        cost_estimate=pl.CostEstimate(
            flops=2 * M * K * N_pad + 6 * M * N_pad,
            transcendentals=M * N_pad + N_pad,
            bytes_accessed=(int(x_c.size) * x_c.dtype.itemsize
                            + int(w_c.size) * w_c.dtype.itemsize
                            + 4 * M * N_pad)),
    )(x_c, w_c, b_p, g_p, be_p)


# ---------------------------------------------------------------------------
# Two-pass fallback (large M): matmul + partial stats, then elementwise BN+sin
# ---------------------------------------------------------------------------
def _make_matmul_stats_kernel(omega_0):
    def kernel(x_ref, w_ref, b_ref, z_ref, stats_ref, acc_ref):
        k = pl.program_id(2)
        nk = pl.num_programs(2)

        @pl.when(k == 0)
        def _():
            acc_ref[...] = jnp.zeros_like(acc_ref)

        acc_ref[...] += jnp.dot(x_ref[...], w_ref[...],
                                preferred_element_type=jnp.float32)

        @pl.when(k == nk - 1)
        def _():
            z = omega_0 * (acc_ref[...] + b_ref[...])               # (bm, bn) f32
            z_ref[...] = z.astype(z_ref.dtype)
            s = jnp.sum(z, axis=0, keepdims=True)                   # (1, bn)
            ss = jnp.sum(z * z, axis=0, keepdims=True)
            cols = z.shape[1]
            # One full-tile unmasked store: rows 0..3 = sum, rows 4..7 = sumsq.
            row = jax.lax.broadcasted_iota(jnp.int32, (8, cols), 0)
            stats_ref[...] = jnp.where(row < 4,
                                       jnp.broadcast_to(s, (8, cols)),
                                       jnp.broadcast_to(ss, (8, cols)))
    return kernel


def _sin_bn_kernel(z_ref, scale_ref, shift_ref, o_ref):
    z = z_ref[...].astype(jnp.float32)
    o_ref[...] = jnp.sin(z * scale_ref[...] + shift_ref[...])


def _two_pass_forward(x_c, w_c, b_p, g_p, be_p, omega, eps, M, N, N_pad,
                      z_dtype, bm, bn, bk):
    K = x_c.shape[1]
    bm_eff = min(bm, _round_up(M, 8))
    M_pad = _round_up(M, bm_eff)
    bn_eff = _pick_tile(N_pad, (bn, 512, 256, 128))
    bk_eff = _pick_tile(K, (bk, 1024, 512, 256, 128)) if K % 128 == 0 else K
    ni, nj, nk = M_pad // bm_eff, N_pad // bn_eff, K // bk_eff

    # Only the M axis of x is ever padded (K stays a full-extent block when
    # it is not a multiple of 128), so the extra HBM traffic is negligible.
    x_p = jnp.pad(x_c, ((0, M_pad - M), (0, 0))) if M_pad != M else x_c

    z_pad, stats = pl.pallas_call(
        _make_matmul_stats_kernel(omega),
        out_shape=(jax.ShapeDtypeStruct((M_pad, N_pad), z_dtype),
                   jax.ShapeDtypeStruct((ni * 8, N_pad), jnp.float32)),
        grid=(ni, nj, nk),
        in_specs=[
            pl.BlockSpec((bm_eff, bk_eff), lambda i, j, k: (i, k)),   # x
            pl.BlockSpec((bk_eff, bn_eff), lambda i, j, k: (k, j)),   # W^T
            pl.BlockSpec((1, bn_eff), lambda i, j, k: (0, j)),        # bias
        ],
        out_specs=[
            pl.BlockSpec((bm_eff, bn_eff), lambda i, j, k: (i, j)),   # z
            pl.BlockSpec((8, bn_eff), lambda i, j, k: (i, j)),        # partial stats
        ],
        scratch_shapes=[pltpu.VMEM((bm_eff, bn_eff), jnp.float32)],
        compiler_params=pltpu.CompilerParams(
            dimension_semantics=("parallel", "parallel", "arbitrary")),
        cost_estimate=pl.CostEstimate(
            flops=2 * M_pad * N_pad * K,
            transcendentals=0,
            bytes_accessed=(int(x_p.size) * x_p.dtype.itemsize
                            + int(w_c.size) * w_c.dtype.itemsize
                            + M_pad * N_pad * jnp.dtype(z_dtype).itemsize)),
    )(x_p, w_c, b_p)

    # Tiny host-side reduction of per-row-tile partial statistics.
    # Padded x rows contribute exactly omega*bias per column; subtract them.
    stats3 = stats.reshape(ni, 8, N_pad)
    zb = omega * b_p[0]
    n_pad_rows = jnp.float32(M_pad - M)
    col_sum = jnp.sum(stats3[:, 0, :], axis=0) - n_pad_rows * zb
    col_sumsq = jnp.sum(stats3[:, 4, :], axis=0) - n_pad_rows * zb * zb
    count = jnp.float32(M)
    mean = col_sum / count
    var = jnp.maximum(col_sumsq / count - mean * mean, 0.0)
    scale = (g_p[0] * jax.lax.rsqrt(var + eps)).reshape(1, N_pad)
    shift = (be_p[0] - mean * scale[0]).reshape(1, N_pad)

    # Lane-dense elementwise pass; tiles sized to fit v5e's 16 MiB scoped VMEM.
    bm2 = _pick_tile(M_pad, (512, 256, 128, 64, 32, 16, 8))
    bn2 = _pick_tile(N_pad, (1024, 512, 256, 128))

    out_pad = pl.pallas_call(
        _sin_bn_kernel,
        out_shape=jax.ShapeDtypeStruct((M_pad, N_pad), jnp.float32),
        grid=(M_pad // bm2, N_pad // bn2),
        in_specs=[
            pl.BlockSpec((bm2, bn2), lambda i, j: (i, j)),
            pl.BlockSpec((1, bn2), lambda i, j: (0, j)),
            pl.BlockSpec((1, bn2), lambda i, j: (0, j)),
        ],
        out_specs=pl.BlockSpec((bm2, bn2), lambda i, j: (i, j)),
        compiler_params=pltpu.CompilerParams(
            dimension_semantics=("parallel", "parallel")),
    )(z_pad, scale, shift)

    return out_pad[:M, :N]


# ---------------------------------------------------------------------------
# Public wrapper
# ---------------------------------------------------------------------------
def sine_layer_bn_forward(x, weight, bias, gamma, beta, *,
                          omega_0=30.0, eps=1e-5,
                          compute_dtype=jnp.bfloat16,
                          bm=512, bn=512, bk=1024,
                          max_fused_vmem_bytes=20 * 1024 * 1024):
    """Pallas TPU forward of SineLayer_bn (training-mode BatchNorm1d semantics).

    x:      (M, K) input points
    weight: (N, K) linear weight (PyTorch layout)
    bias:   (N,) or None
    gamma, beta: (N,) BatchNorm1d affine parameters
    returns: (M, N) = sin(batchnorm(omega_0 * (x @ weight.T + bias)))
    """
    M, K = x.shape
    N = weight.shape[0]
    omega = float(omega_0)
    eps = float(eps)
    N_pad = _round_up(N, 128)

    # MXU operands in compute_dtype (bf16 by default); accumulation stays f32.
    x_c = x.astype(compute_dtype)
    w_c = jnp.pad(weight.T.astype(compute_dtype), ((0, 0), (0, N_pad - N)))
    b = bias if bias is not None else jnp.zeros((N,), jnp.float32)
    b_p = jnp.pad(b.astype(jnp.float32), (0, N_pad - N)).reshape(1, N_pad)
    g_p = jnp.pad(gamma.astype(jnp.float32), (0, N_pad - N),
                  constant_values=1.0).reshape(1, N_pad)
    be_p = jnp.pad(beta.astype(jnp.float32), (0, N_pad - N)).reshape(1, N_pad)

    itemsize = jnp.dtype(compute_dtype).itemsize
    bn_fused = _pick_tile(N_pad, (512, 256, 128))
    fused_bytes = (2 * (M * K * itemsize + K * bn_fused * itemsize
                        + 3 * bn_fused * 4)
                   + 2 * M * bn_fused * 4)
    if fused_bytes <= max_fused_vmem_bytes:
        out_pad = _fused_forward(x_c, w_c, b_p, g_p, be_p, omega, eps,
                                 M, K, N_pad, bn_fused)
        return out_pad[:, :N]

    # Large-M fallback: z round-trips HBM in compute_dtype (bf16 halves traffic).
    return _two_pass_forward(x_c, w_c, b_p, g_p, be_p, omega, eps,
                             M, N, N_pad, compute_dtype, bm, bn, bk)


def _reference(x, weight, bias, gamma, beta, omega_0, eps=1e-5):
    """Pure-JAX mirror of SineLayer_bn.forward (training-mode BatchNorm)."""
    z = omega_0 * (x @ weight.T + (bias if bias is not None else 0.0))
    mean = jnp.mean(z, axis=0)
    var = jnp.mean((z - mean) ** 2, axis=0)     # biased variance, as BN uses
    zn = (z - mean) * jax.lax.rsqrt(var + eps) * gamma + beta
    return jnp.sin(zn)


if __name__ == "__main__":
    key = jax.random.PRNGKey(0)
    k1, k2, k3, k4, k5 = jax.random.split(key, 5)

    # SIREN-first-layer-ish shapes: 250 points, 63 in-features, 100 out-features.
    M, K, N = 250, 63, 100
    omega_0 = 30.0
    is_first = True

    x = jax.random.uniform(k1, (M, K), jnp.float32, -1.0, 1.0)
    w_bound = (1.0 / K) if is_first else (math.sqrt(6.0 / K) / omega_0)
    weight = jax.random.uniform(k2, (N, K), jnp.float32, -w_bound, w_bound)
    b_bound = 1.0 / math.sqrt(K)
    bias = jax.random.uniform(k3, (N,), jnp.float32, -b_bound, b_bound)
    gamma = 1.0 + 0.1 * jax.random.normal(k4, (N,), jnp.float32)
    beta = 0.1 * jax.random.normal(k5, (N,), jnp.float32)

    ref = _reference(x, weight, bias, gamma, beta, omega_0)

    # f32 operands: tight structural check of both the fused and two-pass paths.
    out_f32 = jax.block_until_ready(sine_layer_bn_forward(
        x, weight, bias, gamma, beta, omega_0=omega_0,
        compute_dtype=jnp.float32))
    out_f32_2p = jax.block_until_ready(sine_layer_bn_forward(
        x, weight, bias, gamma, beta, omega_0=omega_0,
        compute_dtype=jnp.float32, max_fused_vmem_bytes=0))

    # bf16 MXU operands (default fast path): looser tolerance for bf16 rounding.
    out_bf16 = jax.block_until_ready(sine_layer_bn_forward(
        x, weight, bias, gamma, beta, omega_0=omega_0))
    out_bf16_2p = jax.block_until_ready(sine_layer_bn_forward(
        x, weight, bias, gamma, beta, omega_0=omega_0,
        max_fused_vmem_bytes=0))

    for out, tol in ((out_f32, 2e-3), (out_f32_2p, 2e-3),
                     (out_bf16, 3e-2), (out_bf16_2p, 3e-2)):
        assert out.shape == (M, N), out.shape
        err = float(jnp.max(jnp.abs(out - ref)))
        assert err < tol, (err, tol)

    print("KERNEL_OK")
</pallas_src>

<mosaic_0001>
module attributes {stable_mosaic.version = 11 : i64} {
  func.func @kernel(%arg0: i32, %arg1: memref<250x63xf32, #tpu.memory_space<vmem>>, %arg2: memref<63x128xf32, #tpu.memory_space<vmem>>, %arg3: memref<1x128xf32, #tpu.memory_space<vmem>>, %arg4: memref<1x128xf32, #tpu.memory_space<vmem>>, %arg5: memref<1x128xf32, #tpu.memory_space<vmem>>, %arg6: memref<250x128xf32, #tpu.memory_space<vmem>>) attributes {dimension_semantics = [#tpu.dimension_semantics<parallel>], iteration_bounds = array<i64: 1>, scalar_prefetch = 0 : i64, scratch_operands = 0 : i64, tpu.core_type = #tpu.core_type<tc>, window_params = [{pipeline_mode = #tpu.pipeline_mode<synchronous>, transform_indices = @transform_0, window_bounds = array<i64: 250, 63>}, {transform_indices = @transform_1, window_bounds = array<i64: 63, 128>}, {transform_indices = @transform_2, window_bounds = array<i64: 1, 128>}, {transform_indices = @transform_3, window_bounds = array<i64: 1, 128>}, {transform_indices = @transform_4, window_bounds = array<i64: 1, 128>}, {transform_indices = @transform_5, window_bounds = array<i64: 250, 128>}]} {
    %c0 = arith.constant 0 : index
    %c0_0 = arith.constant 0 : index
    %0 = vector.load %arg1[%c0, %c0_0] : memref<250x63xf32, #tpu.memory_space<vmem>>, vector<250x63xf32>
    %c0_1 = arith.constant 0 : index
    %c0_2 = arith.constant 0 : index
    %1 = vector.load %arg2[%c0_1, %c0_2] : memref<63x128xf32, #tpu.memory_space<vmem>>, vector<63x128xf32>
    %cst = arith.constant dense<0.000000e+00> : vector<250x128xf32>
    %2 = tpu.matmul %0, %1, %cst {dimension_numbers = #tpu.dot_dimension_numbers<[1], [0], [0], [1], [0, 0, 1, 1], [], []>} : vector<250x63xf32>, vector<63x128xf32>, vector<250x128xf32> -> vector<250x128xf32>
    %c0_3 = arith.constant 0 : index
    %c0_4 = arith.constant 0 : index
    %3 = vector.load %arg3[%c0_3, %c0_4] : memref<1x128xf32, #tpu.memory_space<vmem>>, vector<1x128xf32>
    %4 = vector.broadcast %3 : vector<1x128xf32> to vector<250x128xf32>
    %5 = arith.addf %2, %4 : vector<250x128xf32>
    %cst_5 = arith.constant 3.000000e+01 : f32
    %6 = vector.broadcast %cst_5 : f32 to vector<250x128xf32>
    %7 = arith.mulf %6, %5 : vector<250x128xf32>
    %cst_6 = arith.constant 1.000000e+00 : f32
    %cst_7 = arith.constant 2.500000e+02 : f32
    %8 = arith.divf %cst_6, %cst_7 : f32
    %cst_8 = arith.constant dense<0.000000e+00> : vector<128xf32>
    %9 = vector.multi_reduction <add>, %7, %cst_8 [0] : vector<250x128xf32> to vector<128xf32>
    %10 = vector.shape_cast %9 : vector<128xf32> to vector<1x128xf32>
    %11 = vector.broadcast %8 : f32 to vector<1x128xf32>
    %12 = arith.mulf %10, %11 : vector<1x128xf32>
    %13 = arith.mulf %7, %7 : vector<250x128xf32>
    %cst_9 = arith.constant dense<0.000000e+00> : vector<128xf32>
    %14 = vector.multi_reduction <add>, %13, %cst_9 [0] : vector<250x128xf32> to vector<128xf32>
    %15 = vector.shape_cast %14 : vector<128xf32> to vector<1x128xf32>
    %16 = vector.broadcast %8 : f32 to vector<1x128xf32>
    %17 = arith.mulf %15, %16 : vector<1x128xf32>
    %18 = arith.mulf %12, %12 : vector<1x128xf32>
    %19 = arith.subf %17, %18 : vector<1x128xf32>
    %cst_10 = arith.constant 0.000000e+00 : f32
    %20 = vector.broadcast %cst_10 : f32 to vector<1x128xf32>
    %21 = arith.maximumf %19, %20 : vector<1x128xf32>
    %c0_11 = arith.constant 0 : index
    %c0_12 = arith.constant 0 : index
    %22 = vector.load %arg4[%c0_11, %c0_12] : memref<1x128xf32, #tpu.memory_space<vmem>>, vector<1x128xf32>
    %cst_13 = arith.constant 9.99999974E-6 : f32
    %23 = vector.broadcast %cst_13 : f32 to vector<1x128xf32>
    %24 = arith.addf %21, %23 : vector<1x128xf32>
    %25 = math.rsqrt %24 : vector<1x128xf32>
    %26 = arith.mulf %22, %25 : vector<1x128xf32>
    %c0_14 = arith.constant 0 : index
    %c0_15 = arith.constant 0 : index
    %27 = vector.load %arg5[%c0_14, %c0_15] : memref<1x128xf32, #tpu.memory_space<vmem>>, vector<1x128xf32>
    %28 = arith.mulf %12, %26 : vector<1x128xf32>
    %29 = arith.subf %27, %28 : vector<1x128xf32>
    %30 = vector.broadcast %26 : vector<1x128xf32> to vector<250x128xf32>
    %31 = arith.mulf %7, %30 : vector<250x128xf32>
    %32 = vector.broadcast %29 : vector<1x128xf32> to vector<250x128xf32>
    %33 = arith.addf %31, %32 : vector<250x128xf32>
    %34 = math.sin %33 : vector<250x128xf32>
    %c0_16 = arith.constant 0 : index
    %c0_17 = arith.constant 0 : index
    %35 = vector.load %arg6[%c0_16, %c0_17] : memref<250x128xf32, #tpu.memory_space<vmem>>, vector<250x128xf32>
    tpu.vector_store %arg6[%c0_16, %c0_17], %34 {strides = array<i32>} : memref<250x128xf32, #tpu.memory_space<vmem>>, vector<250x128xf32>,
    return
  }
  func.func @transform_0(%arg0: i32) -> (i32, i32) {
    %c0_i32 = arith.constant 0 : i32
    %c0_i32_0 = arith.constant 0 : i32
    %c0_i32_1 = arith.constant 0 : i32
    return %c0_i32, %c0_i32_0 : i32, i32
  }
  func.func @transform_1(%arg0: i32) -> (i32, i32) {
    %c0_i32 = arith.constant 0 : i32
    %c0_i32_0 = arith.constant 0 : i32
    return %c0_i32, %arg0 : i32, i32
  }
  func.func @transform_2(%arg0: i32) -> (i32, i32) {
    %c0_i32 = arith.constant 0 : i32
    %c0_i32_0 = arith.constant 0 : i32
    return %c0_i32, %arg0 : i32, i32
  }
  func.func @transform_3(%arg0: i32) -> (i32, i32) {
    %c0_i32 = arith.constant 0 : i32
    %c0_i32_0 = arith.constant 0 : i32
    return %c0_i32, %arg0 : i32, i32
  }
  func.func @transform_4(%arg0: i32) -> (i32, i32) {
    %c0_i32 = arith.constant 0 : i32
    %c0_i32_0 = arith.constant 0 : i32
    return %c0_i32, %arg0 : i32, i32
  }
  func.func @transform_5(%arg0: i32) -> (i32, i32) {
    %c0_i32 = arith.constant 0 : i32
    %c0_i32_0 = arith.constant 0 : i32
    return %c0_i32, %arg0 : i32, i32
  }
}

</mosaic_0001>

<bundles_post_ra>
// kernel: tpu_custom_call.1
= control target key start
LH: loop header
LB: loop body
LE: loop exit
PB: predicated region body
PF: predicated region fallthrough
CT: control target
= control target key end

     0   :  { %vm165_vm0 = vcmask 1046528   ;;  %vm68_vm1 = vcmask 515072   ;;  %s7303_s0 = inlined_call_operand.vmem [shape: f32[250,63], index: 0, kind: input, shape index: {}]   ;;  %s7304_s1 = inlined_call_operand.vmem [shape: f32[63,128], index: 1, kind: input, shape index: {}]   ;;  %s7305_s2 = inlined_call_operand.vmem [shape: f32[1,128], index: 2, kind: input, shape index: {}]   ;;  %s7306_s3 = inlined_call_operand.vmem [shape: f32[1,128], index: 3, kind: input, shape index: {}]   ;;  %s7307_s4 = inlined_call_operand.vmem [shape: f32[1,128], index: 4, kind: input, shape index: {}]   ;;  %s7308_s5 = inlined_call_operand.hbm [shape: f32[250,128], index: 5, kind: output, shape index: {}]  }
   0x1   :  { %v60_v0 = vld [vmem:[%s7304_s1 + $0x38] sm:$0x7f]  ;;  %v59_v1 = vld [vmem:[%s7304_s1 + $0x30] sm:$0xff]  ;;  %v58_v2 = vld [vmem:[%s7304_s1 + $0x28] sm:$0xff] }
   0x2   :  { %4201 = vmatprep.subr.msk.mxu0 %vm165_vm0, %v60_v0  ;;  %4265 = vmatprep.subr.msk.mxu1 %vm165_vm0, %v60_v0  ;;  %v21_v3 = vld [vmem:[%s7303_s0] sm:$0xff]  ;;  %v56_v5 = vld [vmem:[%s7304_s1 + $0x18] sm:$0xff]  ;;  %v55_v6 = vld [vmem:[%s7304_s1 + $0x10] sm:$0xff] }
   0x3   :  { %4202 = vmatpush3.msk.msra.mxu0 %vm165_vm0, %v60_v0  ;;  %4273 = vmatpush3.msk.msra.mxu1 %vm165_vm0, %v60_v0  ;;  %v57_v4 = vld [vmem:[%s7304_s1 + $0x20] sm:$0xff]  ;;  %v54_v7 = vld [vmem:[%s7304_s1 + $0x8] sm:$0xff] }
   0x4   :  { %4203 = vmatprep.subr.mxu0 %v59_v1  ;;  %4217 = vmatprep.mubr.msk.f32.mxu0 %vm68_vm1, %v21_v3  ;;  %v53_v8 = vld [vmem:[%s7304_s1] sm:$0xff] }
   0x5   :  { %4204 = vmatpush3.msra.mxu0 %v59_v1  ;;  %4266 = vmatprep.subr.mxu1 %v59_v1 }
   0x6   :  { %4205 = vmatprep.subr.mxu0 %v58_v2  ;;  %4274 = vmatpush3.msra.mxu1 %v59_v1 }
   0x7   :  { %4206 = vmatpush3.msra.mxu0 %v58_v2  ;;  %4267 = vmatprep.subr.mxu1 %v58_v2 }
   0x8   :  { %4207 = vmatprep.subr.mxu0 %v57_v4  ;;  %4275 = vmatpush3.msra.mxu1 %v58_v2 }
   0x9   :  { %4208 = vmatpush3.msra.mxu0 %v57_v4  ;;  %4268 = vmatprep.subr.mxu1 %v57_v4 }
   0xa   :  { %4209 = vmatprep.subr.mxu0 %v56_v5  ;;  %4276 = vmatpush3.msra.mxu1 %v57_v4 }
   0xb   :  { %4210 = vmatpush3.msra.mxu0 %v56_v5  ;;  %4269 = vmatprep.subr.mxu1 %v56_v5 }
   0xc   :  { %4211 = vmatprep.subr.mxu0 %v55_v6  ;;  %4277 = vmatpush3.msra.mxu1 %v56_v5 }
   0xd   :  { %4212 = vmatpush3.msra.mxu0 %v55_v6  ;;  %4270 = vmatprep.subr.mxu1 %v55_v6 }
   0xe   :  { %4213 = vmatprep.subr.mxu0 %v54_v7  ;;  %4278 = vmatpush3.msra.mxu1 %v55_v6 }
   0xf   :  { %10 = vsyncpa [#allocation3], 0  ;;  %4214 = vmatpush3.msra.mxu0 %v54_v7  ;;  %v22_v9 = vld [vmem:[%s7303_s0 + $0x8] sm:$0xff]  ;;  %4271 = vmatprep.subr.mxu1 %v54_v7  ;;  %v23_v10 = vld [vmem:[%s7303_s0 + $0x10] sm:$0xff]  ;;  %vm456_vm2 = vcmask 1041408  }
  0x10   :  { %4215 = vmatprep.subr.mxu0 %v53_v8  ;;  %4279 = vmatpush3.msra.mxu1 %v54_v7  ;;  %v37_v11 = vld [vmem:[%s7303_s0 + $0x80] sm:$0xff]  ;;  %v38_v12 = vld [vmem:[%s7303_s0 + $0x88] sm:$0xff]  ;;  %v39_v13 = vld [vmem:[%s7303_s0 + $0x90] sm:$0xff] }
  0x11   :  { %4216 = vmatpush3.msra.mxu0 %v53_v8  ;;  %4272 = vmatprep.subr.mxu1 %v53_v8  ;;  %v24_v14 = vld [vmem:[%s7303_s0 + $0x18] sm:$0xff]  ;;  %v25_v15 = vld [vmem:[%s7303_s0 + $0x20] sm:$0xff]  ;;  %v26_v18 = vld [vmem:[%s7303_s0 + $0x28] sm:$0xff] }
  0x12   :  { %4218 = vmatmul.mubr.msk.f32.vlgmr.msra.gmra.mxu0 %vm68_vm1, %v22_v9  ;;  %4280 = vmatpush3.msra.mxu1 %v53_v8  ;;  %v40_v16 = vld [vmem:[%s7303_s0 + $0x98] sm:$0xff]  ;;  %v41_v17 = vld [vmem:[%s7303_s0 + $0xa0] sm:$0xff]  ;;  %v27_v19 = vld [vmem:[%s7303_s0 + $0x30] sm:$0xff] }
  0x13   :  { %4220 = vmatprep.mubr.msk.f32.mxu0 %vm68_vm1, %v23_v10  ;;  %4241 = vmatprep.mubr.msk.f32.mxu1 %vm68_vm1, %v37_v11  ;;  %v42_v20 = vld [vmem:[%s7303_s0 + $0xa8] sm:$0xff]  ;;  %v43_v21 = vld [vmem:[%s7303_s0 + $0xb0] sm:$0xff]  ;;  %v28_v22 = vld [vmem:[%s7303_s0 + $0x38] sm:$0xff] }
  0x14   :  { %4242 = vmatmul.mubr.msk.f32.vlgmr.msra.gmra.mxu1 %vm68_vm1, %v38_v12  ;;  %v29_v23 = vld [vmem:[%s7303_s0 + $0x40] sm:$0xff]  ;;  %v44_v24 = vld [vmem:[%s7303_s0 + $0xb8] sm:$0xff]  ;;  %v30_v26 = vld [vmem:[%s7303_s0 + $0x48] sm:$0xff] }
  0x15   :  { %4244 = vmatprep.mubr.msk.f32.mxu1 %vm68_vm1, %v39_v13  ;;  %v45_v25 = vld [vmem:[%s7303_s0 + $0xc0] sm:$0xff]  ;;  %v31_v27 = vld [vmem:[%s7303_s0 + $0x50] sm:$0xff]  ;;  %v46_v28 = vld [vmem:[%s7303_s0 + $0xc8] sm:$0xff] }
  0x16   :  { %4221 = vmatmul.mubr.msk.f32.gmra.mxu0 %vm68_vm1, %v24_v14  ;;  %v47_v29 = vld [vmem:[%s7303_s0 + $0xd0] sm:$0xff]  ;;  %v32_v30 = vld [vmem:[%s7303_s0 + $0x58] sm:$0xff]  ;;  %v33_v31 = vld [vmem:[%s7303_s0 + $0x60] sm:$0xff] }
  0x17   :  { %4223 = vmatprep.mubr.msk.f32.mxu0 %vm68_vm1, %v25_v15  ;;  %v48_v32 = vld [vmem:[%s7303_s0 + $0xd8] sm:$0xff]  ;;  %v49_v33 = vld [vmem:[%s7303_s0 + $0xe0] sm:$0xff]  ;;  %v34_v34 = vld [vmem:[%s7303_s0 + $0x68] sm:$0xff] }
  0x18   :  { %4245 = vmatmul.mubr.msk.f32.gmra.mxu1 %vm68_vm1, %v40_v16  ;;  %v35_v35 = vld [vmem:[%s7303_s0 + $0x70] sm:$0xff]  ;;  %v50_v36 = vld [vmem:[%s7303_s0 + $0xe8] sm:$0xff]  ;;  %v36_v38 = vld [vmem:[%s7303_s0 + $0x78] sm:$0xff] }
  0x19   :  { %4247 = vmatprep.mubr.msk.f32.mxu1 %vm68_vm1, %v41_v17  ;;  %v51_v37 = vld [vmem:[%s7303_s0 + $0xf0] sm:$0xff]  ;;  %v52_v39 = vld [vmem:[%s7303_s0 + $0xf8] sm:$0x3]  ;;  %v4764_v40 = vld [vmem:[%s7305_s2] ss:$0 sm:$0xff] }
  0x1a   :  { %4224 = vmatmul.mubr.msk.f32.gmra.mxu0 %vm68_vm1, %v26_v18 }
  0x1b   :  { %4226 = vmatprep.mubr.msk.f32.mxu0 %vm68_vm1, %v27_v19 }
  0x1c   :  { %4248 = vmatmul.mubr.msk.f32.gmra.mxu1 %vm68_vm1, %v42_v20 }
  0x1d   :  { %4250 = vmatprep.mubr.msk.f32.mxu1 %vm68_vm1, %v43_v21 }
  0x1e   :  { %4227 = vmatmul.mubr.msk.f32.gmra.mxu0 %vm68_vm1, %v28_v22 }
  0x1f   :  { %4229 = vmatprep.mubr.msk.f32.mxu0 %vm68_vm1, %v29_v23 }
  0x20   :  { %4251 = vmatmul.mubr.msk.f32.gmra.mxu1 %vm68_vm1, %v44_v24 }
  0x21   :  { %4253 = vmatprep.mubr.msk.f32.mxu1 %vm68_vm1, %v45_v25 }
  0x22   :  { %4230 = vmatmul.mubr.msk.f32.gmra.mxu0 %vm68_vm1, %v30_v26 }
  0x23   :  { %4232 = vmatprep.mubr.msk.f32.mxu0 %vm68_vm1, %v31_v27 }
  0x24   :  { %4254 = vmatmul.mubr.msk.f32.gmra.mxu1 %vm68_vm1, %v46_v28 }
  0x25   :  { %4256 = vmatprep.mubr.msk.f32.mxu1 %vm68_vm1, %v47_v29 }
  0x26   :  { %4233 = vmatmul.mubr.msk.f32.gmra.mxu0 %vm68_vm1, %v32_v30 }
  0x27   :  { %4235 = vmatprep.mubr.msk.f32.mxu0 %vm68_vm1, %v33_v31 }
  0x28   :  { %4257 = vmatmul.mubr.msk.f32.gmra.mxu1 %vm68_vm1, %v48_v32 }
  0x29   :  { %4259 = vmatprep.mubr.msk.f32.mxu1 %vm68_vm1, %v49_v33 }
  0x2a   :  { %4236 = vmatmul.mubr.msk.f32.gmra.mxu0 %vm68_vm1, %v34_v34 }
  0x2b   :  { %4238 = vmatprep.mubr.msk.f32.mxu0 %vm68_vm1, %v35_v35 }
  0x2c   :  { %4260 = vmatmul.mubr.msk.f32.gmra.mxu1 %vm68_vm1, %v50_v36 }
  0x2d   :  { %4262 = vmatprep.mubr.msk.f32.mxu1 %vm68_vm1, %v51_v37 }
  0x2e   :  { %4239 = vmatmul.mubr.msk.f32.gmra.mxu0 %vm68_vm1, %v36_v38 }
  0x30   :  { %4263 = vmatmul.mubr.msk.f32.gmra.mxu1 %vm68_vm1, %v52_v39 }
  0xd2   :  { %v4219_v41 = vpop.f32.mrf.mxu0 }
  0xd3   :  { %v241_v42 = vadd.f32 %v4219_v41, %v4764_v40 }
  0xd4   :  { %v235_v43 = vpop.f32.mrf.mxu0  ;;  %v4767_v44 = vpop.f32.mrf.mxu1 }
  0xd5   :  { %v236_v45 = vadd.f32 %v4764_v40, %v235_v43  ;;  %v4770_v46 = vmul.f32 30.0, %v241_v42 }
  0xd6   :  { %v4222_v47 = vpop.f32.mrf.mxu0  ;;  %v4772_v48 = vpop.f32.mrf.mxu1 }
  0xd7   :  { %v4774_v49 = vmul.f32 30.0, %v236_v45  ;;  %v251_v50 = vadd.f32 %v4222_v47, %v4764_v40  ;;  %v467_v55 = vmul.f32 %v4770_v46, %v4770_v46 }
  0xd8   :  { %v245_v51 = vpop.f32.mrf.mxu0  ;;  %v4777_v52 = vpop.f32.mrf.mxu1 }
  0xd9   :  { %v466_v53 = vmul.f32 %v4774_v49, %v4774_v49  ;;  %v246_v54 = vadd.f32 %v4764_v40, %v245_v51  ;;  %v426_v57 = vadd.f32 %v4770_v46, %v4774_v49  ;;  %v4786_v58 = vmul.f32 30.0, %v251_v50 }
  0xda   :  { %v4225_v56 = vpop.f32.mrf.mxu0  ;;  %v4791_v61 = vpop.f32.mrf.mxu1 }
  0xdb   :  { %v4788_v59 = vmul.f32 30.0, %v246_v54  ;;  %v261_v60 = vadd.f32 %v4225_v56, %v4764_v40  ;;  %v498_v63 = vadd.f32 %v467_v55, %v466_v53  ;;  %v469_v5 = vmul.f32 %v4786_v58, %v4786_v58 }
  0xdc   :  { %v255_v62 = vpop.f32.mrf.mxu0  ;;  %v4804_v9 = vpop.f32.mrf.mxu1 }
  0xdd   :  { %v427_v0 = vadd.f32 %v426_v57, %v4788_v59  ;;  %v468_v1 = vmul.f32 %v4788_v59, %v4788_v59  ;;  %v256_v2 = vadd.f32 %v4764_v40, %v255_v62  ;;  %v4797_v3 = vmul.f32 30.0, %v261_v60 }
  0xde   :  { %v4228_v4 = vpop.f32.mrf.mxu0  ;;  %v4818_v22 = vpop.f32.mrf.mxu1 }
  0xdf   :  { %v499_v6 = vadd.f32 %v498_v63, %v468_v1  ;;  %v4801_v7 = vmul.f32 30.0, %v256_v2  ;;  %v428_v8 = vadd.f32 %v427_v0, %v4786_v58  ;;  %v271_v10 = vadd.f32 %v4228_v4, %v4764_v40 }
  0xe0   :  { %v265_v11 = vpop.f32.mrf.mxu0  ;;  %v471_v16 = vmul.f32 %v4797_v3, %v4797_v3  ;;  %v4829_v34 = vpop.f32.mrf.mxu1 }
  0xe1   :  { %v429_v12 = vadd.f32 %v428_v8, %v4801_v7  ;;  %v470_v13 = vmul.f32 %v4801_v7, %v4801_v7  ;;  %v500_v14 = vadd.f32 %v499_v6, %v469_v5  ;;  %v266_v15 = vadd.f32 %v4764_v40, %v265_v11 }
  0xe2   :  { %v4231_v17 = vpop.f32.mrf.mxu0  ;;  %v4813_v19 = vmul.f32 30.0, %v271_v10  ;;  %v345_v50 = vpop.f32.mrf.mxu1 }
  0xe3   :  { %v501_v18 = vadd.f32 %v500_v14, %v470_v13  ;;  %v4815_v20 = vmul.f32 30.0, %v266_v15  ;;  %v430_v21 = vadd.f32 %v429_v12, %v4797_v3  ;;  %v281_v23 = vadd.f32 %v4231_v17, %v4764_v40 }
  0xe4   :  { %v275_v24 = vpop.f32.mrf.mxu0  ;;  %v473_v30 = vmul.f32 %v4813_v19, %v4813_v19  ;;  %v4255_v4 = vpop.f32.mrf.mxu1 }
  0xe5   :  { %v431_v25 = vadd.f32 %v430_v21, %v4815_v20  ;;  %v472_v26 = vmul.f32 %v4815_v20, %v4815_v20  ;;  %v502_v27 = vadd.f32 %v501_v18, %v471_v16  ;;  %v276_v28 = vadd.f32 %v4764_v40, %v275_v24 }
  0xe6   :  { %v4234_v29 = vpop.f32.mrf.mxu0  ;;  %v4831_v35 = vmul.f32 30.0, %v281_v23  ;;  %v316_v16 = vadd.f32 %v4764_v40, %v4772_v48  ;;  %v321_v18 = vadd.f32 %v4767_v44, %v4764_v40  ;;  %v355_v21 = vpop.f32.mrf.mxu1  ;;  %v326_v44 = vadd.f32 %v4764_v40, %v4791_v61 }
  0xe7   :  { %v503_v31 = vadd.f32 %v502_v27, %v472_v26  ;;  %v432_v32 = vadd.f32 %v431_v25, %v4813_v19  ;;  %v291_v33 = vadd.f32 %v4234_v29, %v4764_v40  ;;  %v4833_v36 = vmul.f32 30.0, %v276_v28 }
  0xe8   :  { %v285_v37 = vpop.f32.mrf.mxu0  ;;  %v475_v51 = vmul.f32 %v4831_v35, %v4831_v35  ;;  %v4877_v29 = vmul.f32 30.0, %v316_v16 }
  0xe9   :  { %v504_v38 = vadd.f32 %v503_v31, %v473_v30  ;;  %v286_v39 = vadd.f32 %v4764_v40, %v285_v37  ;;  %v433_v41 = vadd.f32 %v432_v32, %v4833_v36  ;;  %v474_v42 = vmul.f32 %v4833_v36, %v4833_v36  ;;  %v4258_v31 = vpop.f32.mrf.mxu1 }
  0xea   :  { %v4237_v43 = vpop.f32.mrf.mxu0  ;;  %v4839_v45 = vmul.f32 30.0, %v291_v33  ;;  %v331_v30 = vadd.f32 %v4777_v52, %v4764_v40  ;;  %v4885_v37 = vmul.f32 30.0, %v321_v18  ;;  %v482_v61 = vmul.f32 %v4877_v29, %v4877_v29 }
  0xeb   :  { %v4841_v47 = vmul.f32 30.0, %v286_v39  ;;  %v505_v53 = vadd.f32 %v504_v38, %v474_v42  ;;  %v434_v54 = vadd.f32 %v433_v41, %v4831_v35  ;;  %v301_v55 = vadd.f32 %v4237_v43, %v4764_v40 }
  0xec   :  { %v295_v56 = vpop.f32.mrf.mxu0  ;;  %v477_v1 = vmul.f32 %v4839_v45, %v4839_v45  ;;  %v336_v39 = vadd.f32 %v4764_v40, %v4818_v22  ;;  %v4893_v43 = vmul.f32 30.0, %v326_v44  ;;  %v4895_v52 = vmul.f32 30.0, %v331_v30 }
  0xed   :  { %v476_v57 = vmul.f32 %v4841_v47, %v4841_v47  ;;  %v296_v60 = vadd.f32 %v4764_v40, %v295_v56  ;;  %v435_v62 = vadd.f32 %v434_v54, %v4841_v47  ;;  %v506_v63 = vadd.f32 %v505_v53, %v475_v51  ;;  %v365_v51 = vpop.f32.mrf.mxu1 }
  0xee   :  { %v4240_v0 = vpop.f32.mrf.mxu0  ;;  %v4855_v6 = vmul.f32 30.0, %v301_v55  ;;  %v483_v53 = vmul.f32 %v4885_v37, %v4885_v37  ;;  %v341_v22 = vadd.f32 %v4804_v9, %v4764_v40  ;;  %v4902_v56 = vmul.f32 30.0, %v336_v39 }
  0xef   :  { %v4853_v2 = vmul.f32 30.0, %v296_v60  ;;  %v507_v5 = vadd.f32 %v506_v63, %v476_v57  ;;  %v436_v8 = vadd.f32 %v435_v62, %v4839_v45  ;;  %v311_v10 = vadd.f32 %v4240_v0, %v4764_v40 }
  0xf0   :  { %v305_v11 = vpop.f32.mrf.mxu0  ;;  %v479_v23 = vmul.f32 %v4855_v6, %v4855_v6  ;;  %v484_v60 = vmul.f32 %v4893_v43, %v4893_v43  ;;  %v346_v63 = vadd.f32 %v4764_v40, %v345_v50  ;;  %v485_v0 = vmul.f32 %v4895_v52, %v4895_v52 }
  0xf1   :  { %v478_v12 = vmul.f32 %v4853_v2, %v4853_v2  ;;  %v306_v13 = vadd.f32 %v4764_v40, %v305_v11  ;;  %v437_v14 = vadd.f32 %v436_v8, %v4853_v2  ;;  %v508_v15 = vadd.f32 %v507_v5, %v477_v1  ;;  %v4261_v1 = vpop.f32.mrf.mxu1 }
  0xf2   :  { %v4871_v25 = vmul.f32 30.0, %v311_v10  ;;  %v4910_v8 = vmul.f32 30.0, %v341_v22  ;;  %v351_v9 = vadd.f32 %v4829_v34, %v4764_v40  ;;  %v486_v11 = vmul.f32 %v4902_v56, %v4902_v56 }
  0xf3   :  { %v4865_v17 = vmul.f32 30.0, %v306_v13  ;;  %v509_v24 = vadd.f32 %v508_v15, %v478_v12  ;;  %v438_v26 = vadd.f32 %v437_v14, %v4855_v6  ;;  %v4918_v14 = vmul.f32 30.0, %v346_v63  ;;  %v375_v16 = vpop.f32.mrf.mxu1 }
  0xf4   :  { %v481_v32 = vmul.f32 %v4871_v25, %v4871_v25  ;;  %v356_v50 = vadd.f32 %v4764_v40, %v355_v21  ;;  %v361_v15 = vadd.f32 %v4255_v4, %v4764_v40  ;;  %v487_v18 = vmul.f32 %v4910_v8, %v4910_v8 }
  0xf5   :  { %v480_v27 = vmul.f32 %v4865_v17, %v4865_v17  ;;  %v439_v28 = vadd.f32 %v438_v26, %v4865_v17  ;;  %v510_v48 = vadd.f32 %v509_v24, %v479_v23  ;;  %v4924_v24 = vmul.f32 30.0, %v351_v9  ;;  %v4264_v44 = vpop.f32.mrf.mxu1 }
  0xf6   :  { %v366_v26 = vadd.f32 %v4764_v40, %v365_v51  ;;  %v4931_v21 = vmul.f32 30.0, %v356_v50  ;;  %v4933_v4 = vmul.f32 30.0, %v361_v15  ;;  %v376_v51 = vadd.f32 %v4764_v40, %v375_v16 }
  0xf7   :  { %v511_v33 = vadd.f32 %v510_v48, %v480_v27  ;;  %v440_v38 = vadd.f32 %v439_v28, %v4871_v25  ;;  %v488_v28 = vmul.f32 %v4918_v14, %v4918_v14  ;;  %v489_v30 = vmul.f32 %v4924_v24, %v4924_v24 }
  0xf8   :  { %v4939_v39 = vmul.f32 30.0, %v366_v26 }
  0xf9   :  { %v441_v41 = vadd.f32 %v440_v38, %v4877_v29  ;;  %v512_v42 = vadd.f32 %v511_v33, %v481_v32  ;;  %v371_v38 = vadd.f32 %v4258_v31, %v4764_v40  ;;  %v381_v31 = vadd.f32 %v4261_v1, %v4764_v40 }
  0xfb   :  { %v513_v54 = vadd.f32 %v512_v42, %v482_v61  ;;  %v442_v55 = vadd.f32 %v441_v41, %v4885_v37  ;;  %v490_v61 = vmul.f32 %v4931_v21, %v4931_v21  ;;  %v4947_v22 = vmul.f32 30.0, %v371_v38 }
  0xfd   :  { %v443_v57 = vadd.f32 %v442_v55, %v4893_v43  ;;  %v514_v62 = vadd.f32 %v513_v54, %v483_v53  ;;  %v491_v53 = vmul.f32 %v4933_v4, %v4933_v4  ;;  %v385_v54 = vpop.f32.mrf.mxu1  ;;  %v493_v9 = vmul.f32 %v4947_v22, %v4947_v22 }
  0xff   :  { %v515_v5 = vadd.f32 %v514_v62, %v484_v60  ;;  %v444_v10 = vadd.f32 %v443_v57, %v4895_v52  ;;  %v492_v60 = vmul.f32 %v4939_v39, %v4939_v39  ;;  %v391_v62 = vadd.f32 %v4264_v44, %v4764_v40 }
 0x101   :  { %v445_v12 = vadd.f32 %v444_v10, %v4902_v56  ;;  %v516_v13 = vadd.f32 %v515_v5, %v485_v0  ;;  %v4955_v5 = vmul.f32 30.0, %v376_v51  ;;  %v386_v10 = vadd.f32 %v4764_v40, %v385_v54 }
 0x103   :  { %v517_v23 = vadd.f32 %v516_v13, %v486_v11  ;;  %v446_v34 = vadd.f32 %v445_v12, %v4910_v8  ;;  %v4960_v12 = vmul.f32 30.0, %v381_v31  ;;  %v4963_v13 = vmul.f32 30.0, %v391_v62 }
 0x104   :  { %v494_v15 = vmul.f32 %v4955_v5, %v4955_v5 }
 0x105   :  { %v447_v27 = vadd.f32 %v446_v34, %v4918_v14  ;;  %v518_v48 = vadd.f32 %v517_v23, %v487_v18  ;;  %v424_v18 = vmul.f32 30.0, %v386_v10  ;;  %v495_v40 = vmul.f32 %v4960_v12, %v4960_v12 }
 0x106   :  { %v497_v26 = vmul.f32 %v4963_v13, %v4963_v13  ;;  %v457_v44 = vsel %vm456_vm2, %v4963_v13, 0.0 }
 0x107   :  { %v519_v32 = vadd.f32 %v518_v48, %v488_v28  ;;  %v448_v33 = vadd.f32 %v447_v27, %v4924_v24  ;;  %v496_v28 = vmul.f32 %v424_v18, %v424_v18 }
 0x109   :  { %v449_v41 = vadd.f32 %v448_v33, %v4931_v21  ;;  %v520_v42 = vadd.f32 %v519_v32, %v489_v30  ;;  %v528_v33 = vsel %vm456_vm2, %v497_v26, 0.0 }
 0x10b   :  { %v521_v55 = vadd.f32 %v520_v42, %v490_v61  ;;  %v450_v57 = vadd.f32 %v449_v41, %v4933_v4 }
 0x10d   :  { %v451_v63 = vadd.f32 %v450_v57, %v4939_v39  ;;  %v522_v0 = vadd.f32 %v521_v55, %v491_v53 }
 0x10f   :  { %v523_v11 = vadd.f32 %v522_v0, %v492_v60  ;;  %v452_v1 = vadd.f32 %v451_v63, %v4947_v22 }
 0x111   :  { %v453_v50 = vadd.f32 %v452_v1, %v4955_v5  ;;  %v524_v16 = vadd.f32 %v523_v11, %v493_v9 }
 0x113   :  { %v525_v23 = vadd.f32 %v524_v16, %v494_v15  ;;  %v454_v34 = vadd.f32 %v453_v50, %v4960_v12  ;;  %v548_v15 = vlaneseq }
 0x115   :  { %v455_v27 = vadd.f32 %v454_v34, %v424_v18  ;;  %v526_v48 = vadd.f32 %v525_v23, %v495_v40  ;;  %v549_v16 = vshrl.u32 %v548_v15, 7  ;;  %v540_v40 = vld [vmem:[%s7306_s3] sm:$0x1]  ;;  %s4576_s3 = smov [#allocation2]  }
 0x117   :  { %v458_v30 = vadd.f32 %v457_v44, %v455_v27  ;;  %v527_v32 = vadd.f32 %v526_v48, %v496_v28  ;;  %v550_v23 = vsub.s32 0, %v549_v16  ;;  %v544_v27 = vld [vmem:[%s7307_s4] sm:$0x1]  ;;  %s3988_s4 = sshll.u32 %s4576_s3, 4  ;;  %s3989_s4 = int_to_ptr.vmem [resolvable:$true] %s3988_s4 }
 0x118   :  { %s4548_s24 = scalar_lea.vmem %s3989_s4, 4096  ;;  %p4553_p1 = scmp.lt.s32.totalorder %s3989_s4, %s3989_s4 }
 0x119   :  { %v459_v38 = vrot.slane %v458_v30, 4  ;;  %v529_v41 = vadd.f32 %v528_v33, %v527_v32  ;;  %p4549_p0 = scmp.ne.s32.totalorder %s3989_s4, %s4548_s24  ;;  %p4554_p2 = scmp.lt.s32.totalorder %s4548_s24, %s4548_s24 }
 0x11b   :  { %v460_v61 = vadd.f32 %v459_v38, %v458_v30  ;;  %v530_v42 = vrot.slane %v529_v41, 4  ;;  %p4555_p3 = por %p4554_p2, %p4553_p1 }
 0x11d   :  { %v461_v51 = vrot.slane %v460_v61, 2  ;;  %v531_v53 = vadd.f32 %v530_v42, %v529_v41  ;;  %p4556_p4 = pnand %p4555_p3, %p4549_p0 }
 0x11f   :  { %v462_v54 = vadd.f32 %v461_v51, %v460_v61  ;;  %v532_v55 = vrot.slane %v531_v53, 2 }
 0x121   :  { %v463_v57 = vrot.slane %v462_v54, 1  ;;  %v533_v31 = vadd.f32 %v532_v55, %v531_v53 }
 0x123   :  { %v464_v60 = vadd.f32 %v463_v57, %v462_v54  ;;  %v534_v62 = vrot.slane %v533_v31, 1 }
 0x125   :  { %v465_v63 = vmul.f32 0.004, %v464_v60  ;;  %v535_v0 = vadd.f32 %v534_v62, %v533_v31 }
 0x127   :  { %v536_v10 = vmul.f32 0.004, %v535_v0  ;;  %v537_v9 = vmul.f32 %v465_v63, %v465_v63 }
 0x129   :  { %v538_v11 = vsub.f32 %v536_v10, %v537_v9 }
 0x12b   :  { %v539_v1 = vmax.f32 %v538_v11, 0.0 }
 0x12d   :  { %v541_v50 = vadd.f32 1e-05, %v539_v1 }
 0x12f   :  { %4418 = vrsqrt.f32 %v541_v50 }
 0x13c   :  { %v4419_v34 = vpop.eup %4418 }
 0x13d   :  { %v543_v26 = vmul.f32 %v4419_v34, %v540_v40 }
 0x13f   :  { %v545_v28 = vmul.f32 %v543_v26, %v465_v63  ;;  %v551_v48 = vrot.slane %v543_v26, %v550_v23 }
 0x141   :  { %v546_v44 = vsub.f32 %v544_v27, %v545_v28  ;;  %v583_v30 = vmul.f32 %v551_v48, %v424_v18  ;;  %v553_v32 = vmul.f32 %v551_v48, %v4774_v49  ;;  %v4984_v38 = vmul.f32 %v551_v48, %v4770_v46 }
 0x142   :  { %v555_v41 = vmul.f32 %v551_v48, %v4788_v59  ;;  %v556_v61 = vmul.f32 %v551_v48, %v4786_v58  ;;  %v557_v42 = vmul.f32 %v551_v48, %v4801_v7  ;;  %v558_v51 = vmul.f32 %v551_v48, %v4797_v3 }
 0x143   :  { %v4981_v33 = vrot.slane %v546_v44, %v550_v23  ;;  %v559_v53 = vmul.f32 %v551_v48, %v4815_v20  ;;  %v560_v54 = vmul.f32 %v551_v48, %v4813_v19  ;;  %v561_v49 = vmul.f32 %v551_v48, %v4833_v36 }
 0x144   :  { %v562_v46 = vmul.f32 %v551_v48, %v4831_v35  ;;  %v563_v55 = vmul.f32 %v551_v48, %v4841_v47  ;;  %v564_v59 = vmul.f32 %v551_v48, %v4839_v45  ;;  %v565_v58 = vmul.f32 %v551_v48, %v4853_v2 }
 0x145   :  { %v4993_v18 = vadd.f32 %v4981_v33, %v583_v30  ;;  %v566_v7 = vmul.f32 %v551_v48, %v4855_v6  ;;  %v567_v3 = vmul.f32 %v551_v48, %v4865_v17  ;;  %v568_v57 = vmul.f32 %v551_v48, %v4871_v25 }
 0x146   :  { %v569_v36 = vmul.f32 %v551_v48, %v4877_v29  ;;  %v570_v35 = vmul.f32 %v551_v48, %v4885_v37  ;;  %v571_v47 = vmul.f32 %v551_v48, %v4893_v43  ;;  %v572_v45 = vmul.f32 %v551_v48, %v4895_v52 }
 0x147   :  { %v3743_v20 = vand.u32 2147483647, %v4993_v18  ;;  %v3746_v19 = vand.u32 2139095040, %v4993_v18  ;;  %v573_v2 = vmul.f32 %v551_v48, %v4902_v56  ;;  %v574_v17 = vmul.f32 %v551_v48, %v4910_v8 }
 0x148   :  { %v575_v60 = vmul.f32 %v551_v48, %v4918_v14  ;;  %v5015_v25 = vmul.f32 %v551_v48, %v4924_v24  ;;  %v5018_v29 = vmul.f32 %v551_v48, %v4931_v21  ;;  %v5021_v37 = vmul.f32 %v551_v48, %v4933_v4 }
 0x149   :  { %v3747_v31 = vshrl.u32 %v3746_v19, 23  ;;  %v3750_v6 = vand.u32 8388607, %v3743_v20  ;;  %v5024_v43 = vmul.f32 %v551_v48, %v4939_v39  ;;  %v5027_v62 = vmul.f32 %v551_v48, %v4947_v22 }
 0x14a   :  { %v5030_v8 = vmul.f32 %v551_v48, %v4955_v5  ;;  %v5033_v14 = vmul.f32 %v551_v48, %v4960_v12  ;;  %v5036_v24 = vmul.f32 %v551_v48, %v4963_v13  ;;  %v5039_v21 = vadd.f32 %v4981_v33, %v555_v41 }
 0x14b   :  { %v4153_v52 = vadd.s32 4294967169, %v3747_v31  ;;  %v3751_v56 = vor.u32 8388608, %v3750_v6  ;;  %v5042_v4 = vadd.f32 %v4981_v33, %v556_v61  ;;  %v5045_v63 = vadd.f32 %v4981_v33, %v553_v32 }
 0x14c   :  { %v5048_v22 = vadd.f32 %v4981_v33, %v557_v42  ;;  %v5051_v5 = vadd.f32 %v4981_v33, %v558_v51  ;;  %v5054_v12 = vadd.f32 %v4981_v33, %v559_v53  ;;  %v5057_v13 = vadd.f32 %v4981_v33, %v560_v54 }
 0x14d   :  { %v3753_v39 = vadd.s32 1, %v4153_v52  ;;  %v5060_v0 = vadd.f32 %v4981_v33, %v561_v49  ;;  %v5063_v10 = vadd.f32 %v4981_v33, %v562_v46  ;;  %v5066_v9 = vadd.f32 %v4981_v33, %v563_v55 }
 0x14e   :  { %v5069_v11 = vadd.f32 %v4981_v33, %v564_v59  ;;  %v5072_v1 = vadd.f32 %v4981_v33, %v565_v58  ;;  %v5075_v15 = vadd.f32 %v4981_v33, %v566_v7  ;;  %v5078_v16 = vadd.f32 %v4981_v33, %v567_v3 }
 0x14f   :  { %vm3754_vm3 = vcmp.gt.s32.totalorder %v3753_v39, 0  ;;  %v5081_v40 = vadd.f32 %v4981_v33, %v568_v57  ;;  %v5084_v26 = vadd.f32 %v4981_v33, %v569_v36  ;;  %v5087_v27 = vadd.f32 %v4981_v33, %v570_v35 }
 0x150   :  { %v3755_v50 = vsel %vm3754_vm3, %v3753_v39, 0  ;;  %v5090_v28 = vadd.f32 %v4981_v33, %v571_v47  ;;  %v5093_v48 = vadd.f32 %v4981_v33, %v572_v45  ;;  %v5096_v44 = vadd.f32 %v4981_v33, %v573_v2 }
 0x151   :  { %v3756_v23 = vshrl.u32 %v3755_v50, 5  ;;  %v3757_v34 = vand.u32 31, %v3755_v50  ;;  %v5099_v30 = vadd.f32 %v4981_v33, %v574_v17  ;;  %v7316_v41 = vmov 683565275  }
 0x152   :  { %7333 = vst [vmem:[#allocation5_spill] sm:$0xff] %v5096_v44  ;;  %v5102_v42 = vshll.u32 %v3751_v56, 8  ;;  %v5106_v51 = vadd.f32 %v4981_v33, %v4984_v38  ;;  %v7314_v53 = vmov 2475754826   ;;  %v7312_v49 = vmov 2131351028  }
 0x153   :  { %7334 = vst [vmem:[#allocation6_spill] sm:$0xff] %v5099_v30  ;;  %v3758_v32 = vsub.s32 32, %v3757_v34  ;;  %v3760_v61 = vshll.u32 %v7316_v41, %v3757_v34  ;;  %v3763_v54 = vshll.u32 %v7314_v53, %v3757_v34  ;;  %v3766_v46 = vshll.u32 %v7312_v49, %v3757_v34 }
 0x154   :  { %v7320_v55 = vmov 2102212464   ;;  %v4574_v58 = vmov 920167782   ;;  %vm3775_vm4 = vcmp.lt.s32.totalorder %v3756_v23, 1  ;;  %vm3776_vm5 = vcmp.lt.s32.totalorder %v3756_v23, 2 }
 0x155   :  { %v3769_v59 = vshll.u32 %v7320_v55, %v3757_v34  ;;  %v3772_v7 = vshll.u32 %v4574_v58, %v3757_v34  ;;  %v3761_v3 = vshrl.u32 %v7314_v53, %v3758_v32  ;;  %v3764_v19 = vshrl.u32 %v7312_v49, %v3758_v32 }
 0x156   :  { %v3767_v57 = vshrl.u32 %v7320_v55, %v3758_v32  ;;  %v3770_v38 = vshrl.u32 %v4574_v58, %v3758_v32  ;;  %v7326_v36 = vmov 1326507024   ;;  %vm3778_vm6 = vcmp.lt.s32.totalorder %v3756_v23, 4 }
 0x157   :  { %v3773_v35 = vshrl.u32 %v7326_v36, %v3758_v32  ;;  %v3762_v47 = vor.u32 %v3761_v3, %v3760_v61  ;;  %v3765_v45 = vor.u32 %v3764_v19, %v3763_v54  ;;  %v5118_v31 = vadd.f32 %v4981_v33, %v575_v60 }
 0x158   :  { %v3768_v2 = vor.u32 %v3767_v57, %v3766_v46  ;;  %v3771_v6 = vor.u32 %v3770_v38, %v3769_v59  ;;  %v5122_v52 = vadd.f32 %v4981_v33, %v5015_v25  ;;  %v5126_v56 = vadd.f32 %v4981_v33, %v5018_v29 }
 0x159   :  { %7335 = vst [vmem:[#allocation7_spill] sm:$0xff] %v5118_v31  ;;  %v3774_v17 = vor.u32 %v3773_v35, %v3772_v7  ;;  %v3759_v39 = vshrl.u32 %v7316_v41, %v3758_v32  ;;  %v3783_v34 = vsel %vm3775_vm4, %v3762_v47, %v3765_v45  ;;  %vm3777_vm7 = vcmp.lt.s32.totalorder %v3756_v23, 3 }
 0x15a   :  { %7336 = vst [vmem:[#allocation8_spill] sm:$0xff] %v5122_v52  ;;  %7337 = vst [vmem:[#allocation9_spill] sm:$0xff] %v5126_v56  ;;  %v3780_v50 = vsel %vm3778_vm6, %v3768_v2, 2102212464  ;;  %v3787_v61 = vsel %vm3775_vm4, %v3765_v45, %v3768_v2  ;;  %v3784_v60 = vsel %vm3778_vm6, %v3771_v6, 920167782  ;;  %v5133_v46 = vadd.f32 %v4981_v33, %v5021_v37 }
 0x15b   :  { %v3788_v54 = vsel %vm3778_vm6, %v3774_v17, 1326507024  ;;  %v3779_v25 = vsel %vm3775_vm4, %v3759_v39, %v3762_v47  ;;  %v3785_v59 = vsel %vm3777_vm7, %v3768_v2, %v3784_v60  ;;  %v5138_v29 = vadd.f32 %v4981_v33, %v5024_v43 }
 0x15c   :  { %7338 = vst [vmem:[#allocation10_spill] sm:$0xff] %v5133_v46  ;;  %v3789_v7 = vsel %vm3777_vm7, %v3771_v6, %v3788_v54  ;;  %v3781_v32 = vsel %vm3777_vm7, %v3765_v45, %v3780_v50  ;;  %v3786_v3 = vsel %vm3776_vm5, %v3783_v34, %v3785_v59  ;;  %v5144_v57 = vadd.f32 %v4981_v33, %v5027_v62 }
 0x15d   :  { %7339 = vst [vmem:[#allocation11_spill] sm:$0xff] %v5138_v29  ;;  %v3790_v19 = vsel %vm3776_vm5, %v3787_v61, %v3789_v7  ;;  %v5151_v35 = vmul.u32.u64.low %v5102_v42, %v3786_v3  ;;  %v5152_v47 = vmul.u32.u64.high %v5102_v42, %v3786_v3, %v5151_v35  ;;  %v5156_v43 = vadd.f32 %v4981_v33, %v5030_v8 }
 0x15e   :  { %7340 = vst [vmem:[#allocation12_spill] sm:$0xff] %v5144_v57  ;;  %v5147_v37 = vmul.u32.u64.low %v5102_v42, %v3790_v19  ;;  %v5148_v38 = vmul.u32.u64.high %v5102_v42, %v3790_v19, %v5147_v37  ;;  %v5160_v45 = vadd.f32 %v4981_v33, %v5033_v14  ;;  %v5164_v62 = vadd.f32 %v4981_v33, %v5036_v24 }
 0x15f   :  { %7341 = vst [vmem:[#allocation13_spill] sm:$0xff] %v5156_v43  ;;  %v7311_v2 = vand.u32 2147483647, %v5045_v63  ;;  %v3782_v6 = vsel %vm3776_vm5, %v3779_v25, %v3781_v32  ;;  %v626_v17 = vand.u32 2139095040, %v5045_v63  ;;  %v7310_v39 = vand.u32 2147483647, %v5106_v51 }
 0x160   :  { %7342 = vst [vmem:[#allocation14_spill] sm:$0xff] %v5160_v45  ;;  %7343 = vst [vmem:[#allocation15_spill] sm:$0xff] %v5164_v62  ;;  %v730_v50 = vand.u32 2139095040, %v5106_v51  ;;  %vm3800_vm8 = vc.u32 %v5148_v38, %v5151_v35  ;;  %v3801_v8 = vadd.s32 1, %v5152_v47  ;;  %v3798_v34 = vmul.u32 %v5102_v42, %v3782_v6 }
 0x161   :  { %v627_v14 = vshrl.u32 %v626_v17, 23  ;;  %v630_v33 = vand.u32 8388607, %v7311_v2  ;;  %v734_v60 = vand.u32 8388607, %v7310_v39  ;;  %vm3745_vm10 = vcmp.lt.s32.totalorder %v4993_v18, 0 }
 0x162   :  { %v731_v24 = vshrl.u32 %v730_v50, 23  ;;  %v3802_v23 = vsel %vm3800_vm8, %v3801_v8, %v5152_v47  ;;  %v7309_v42 = vand.u32 2147483647, %v5039_v21  ;;  %v5182_v47 = vadd.s32 %v5151_v35, %v5148_v38 }
 0x163   :  { %v4033_v61 = vadd.s32 4294967169, %v627_v14  ;;  %v3803_v54 = vadd.s32 %v3802_v23, %v3798_v34  ;;  %v631_v32 = vor.u32 8388608, %v630_v33  ;;  %v735_v19 = vor.u32 8388608, %v734_v60 }
 0x164   :  { %v4037_v25 = vadd.s32 4294967169, %v731_v24  ;;  %v834_v14 = vand.u32 2139095040, %v5039_v21  ;;  %v5191_v23 = vand.u32 8388607, %v7309_v42  ;;  %vm5206_vm12 = vcmp.le.f32.partialorder %v3743_v20, 0.7853982 }
 0x165   :  { %v633_v59 = vadd.s32 1, %v4033_v61  ;;  %v3804_v7 = vadd.s32 536870912, %v3803_v54  ;;  %v5184_v8 = vshll.u32 %v631_v32, 8  ;;  %v5187_v24 = vshll.u32 %v735_v19, 8 }
 0x166   :  { %v737_v3 = vadd.s32 1, %v4037_v25  ;;  %v835_v45 = vshrl.u32 %v834_v14, 23  ;;  %v7346_v43 = vmov 683565275   ;;  %vm625_vm8 = vcmp.lt.s32.totalorder %v5045_v63, 0 }
 0x167   :  { %vm634_vm9 = vcmp.gt.s32.totalorder %v633_v59, 0  ;;  %v3805_v37 = vshrl.u32 %v3804_v7, 30 }
 0x168   :  { %v635_v6 = vsel %vm634_vm9, %v633_v59, 0  ;;  %vm738_vm11 = vcmp.gt.s32.totalorder %v737_v3, 0 }
 0x169   :  { %v637_v17 = vand.u32 31, %v635_v6  ;;  %v3806_v50 = vshll.u32 %v3805_v37, 30  ;;  %v636_v34 = vshrl.u32 %v635_v6, 5  ;;  %v3829_v60 = vsub.s32 4, %v3805_v37 }
 0x16a   :  { %v739_v38 = vsel %vm738_vm11, %v737_v3, 0 }
 0x16b   :  { %v638_v33 = vsub.s32 32, %v637_v17  ;;  %v5193_v61 = vsub.s32 %v3803_v54, %v3806_v50  ;;  %v640_v25 = vshll.u32 %v7316_v41, %v637_v17  ;;  %v643_v59 = vshll.u32 %v7314_v53, %v637_v17 }
 0x16c   :  { %v646_v32 = vshll.u32 %v7312_v49, %v637_v17  ;;  %v649_v42 = vshll.u32 %v7320_v55, %v637_v17  ;;  %v652_v2 = vshll.u32 %v4574_v58, %v637_v17  ;;  %v741_v29 = vand.u32 31, %v739_v38 }
 0x16d   :  { %v641_v35 = vshrl.u32 %v7314_v53, %v638_v33  ;;  %v644_v7 = vshrl.u32 %v7312_v49, %v638_v33  ;;  %v3809_v19 = vsub.s32 0, %v5193_v61  ;;  %v647_v6 = vshrl.u32 %v7320_v55, %v638_v33 }
 0x16e   :  { %v650_v54 = vshrl.u32 %v4574_v58, %v638_v33  ;;  %v653_v49 = vshrl.u32 %v7326_v36, %v638_v33  ;;  %v3830_v55 = vsel %vm3745_vm10, %v3829_v60, %v3805_v37  ;;  %v639_v57 = vshrl.u32 %v7346_v43, %v638_v33 }
 0x16f   :  { %v642_v50 = vor.u32 %v641_v35, %v640_v25  ;;  %v645_v39 = vor.u32 %v644_v7, %v643_v59  ;;  %v4154_v53 = vmin.u32 %v3809_v19, %v5193_v61  ;;  %v648_v41 = vor.u32 %v647_v6, %v646_v32 }
 0x170   :  { %v651_v62 = vor.u32 %v650_v54, %v649_v42  ;;  %v654_v20 = vor.u32 %v653_v49, %v652_v2  ;;  %vm655_vm13 = vcmp.lt.s32.totalorder %v636_v34, 1  ;;  %vm656_vm14 = vcmp.lt.s32.totalorder %v636_v34, 2 }
 0x171   :  { %v3811_v46 = vclz %v4154_v53  ;;  %vm658_vm15 = vcmp.lt.s32.totalorder %v636_v34, 4  ;;  %vm657_vm0 = vcmp.lt.s32.totalorder %v636_v34, 3  ;;  %v663_v25 = vsel %vm655_vm13, %v642_v50, %v645_v39 }
 0x172   :  { %v660_v17 = vsel %vm658_vm15, %v648_v41, 2102212464  ;;  %v664_v35 = vsel %vm658_vm15, %v651_v62, 920167782  ;;  %v659_v7 = vsel %vm655_vm13, %v639_v57, %v642_v50  ;;  %v667_v42 = vsel %vm655_vm13, %v645_v39, %v648_v41 }
 0x173   :  { %v4155_v59 = vadd.s32 4294967294, %v3811_v46  ;;  %v665_v32 = vsel %vm657_vm0, %v648_v41, %v664_v35  ;;  %v661_v14 = vsel %vm657_vm0, %v645_v39, %v660_v17  ;;  %v668_v37 = vsel %vm658_vm15, %v654_v20, 1326507024 }
 0x174   :  { %v666_v19 = vsel %vm656_vm14, %v663_v25, %v665_v32  ;;  %v742_v60 = vsub.s32 32, %v741_v29  ;;  %v669_v49 = vsel %vm657_vm0, %v651_v62, %v668_v37  ;;  %v5223_v54 = vshrl.u32 %v739_v38, 5 }
 0x175   :  { %vm4156_vm1 = vcmp.lt.s32.totalorder %v4155_v59, 0  ;;  %v5218_v53 = vmul.u32.u64.low %v5184_v8, %v666_v19  ;;  %v5219_v2 = vmul.u32.u64.high %v5184_v8, %v666_v19, %v5218_v53  ;;  %v670_v6 = vsel %vm656_vm14, %v667_v42, %v669_v49 }
 0x176   :  { %v3814_v33 = vsel %vm4156_vm1, 0, %v4155_v59  ;;  %v4041_v46 = vadd.s32 4294967169, %v835_v45  ;;  %v3832_v39 = vsel %vm5206_vm12, 0, %v3830_v55  ;;  %v662_v50 = vsel %vm656_vm14, %v659_v7, %v661_v14 }
 0x177   :  { %v3815_v57 = vsub.s32 32, %v3814_v33  ;;  %v3819_v41 = vsub.s32 4294967266, %v3814_v33  ;;  %v3816_v62 = vshll.u32 %v5193_v61, %v3814_v33  ;;  %v7347_v25 = vmov 2475754826  }
 0x178   :  { %v5230_v20 = vmul.u32.u64.low %v5184_v8, %v670_v6  ;;  %v5231_v17 = vmul.u32.u64.high %v5184_v8, %v670_v6, %v5230_v20  ;;  %v745_v35 = vshrl.u32 %v7347_v25, %v742_v60  ;;  %v681_v45 = vadd.s32 1, %v5219_v2 }
 0x179   :  { %v3817_v59 = vshrl.u32 %v5182_v47, %v3815_v57  ;;  %v3820_v38 = vadd.s32 127, %v3819_v41  ;;  %v7348_v32 = vmov 2131351028   ;;  %v744_v19 = vshll.u32 %v7346_v43, %v741_v29 }
 0x17a   :  { %v748_v42 = vshrl.u32 %v7348_v32, %v742_v60  ;;  %v747_v55 = vshll.u32 %v7347_v25, %v741_v29  ;;  %v750_v34 = vshll.u32 %v7348_v32, %v741_v29  ;;  %v7349_v61 = vmov 2102212464  }
 0x17b   :  { %v751_v7 = vshrl.u32 %v7349_v61, %v742_v60  ;;  %v3818_v14 = vor.u32 %v3817_v59, %v3816_v62  ;;  %v3821_v37 = vshll.u32 %v3820_v38, 23  ;;  %v753_v49 = vshll.u32 %v7349_v61, %v741_v29 }
 0x17c   :  { %v754_v33 = vshrl.u32 %v4574_v58, %v742_v60  ;;  %v678_v47 = vmul.u32 %v5184_v8, %v662_v50  ;;  %vm680_vm2 = vc.u32 %v5231_v17, %v5218_v53  ;;  %v746_v6 = vor.u32 %v745_v35, %v744_v19 }
 0x17d   :  { %v749_v57 = vor.u32 %v748_v42, %v747_v55  ;;  %v3822_v41 = vor.u32 4788187, %v3821_v37  ;;  %v682_v20 = vsel %vm680_vm2, %v681_v45, %v5219_v2  ;;  %v752_v36 = vor.u32 %v751_v7, %v750_v34 }
 0x17e   :  { %v755_v56 = vor.u32 %v754_v33, %v753_v49  ;;  %v3836_v52 = vadd.s32 3, %v3832_v39  ;;  %v683_v31 = vadd.s32 %v682_v20, %v678_v47  ;;  %v756_v62 = vshll.u32 %v4574_v58, %v741_v29 }
 0x17f   :  { %v7350_v59 = vmov 1326507024   ;;  %v3823_v30 = vand.u32 2147483647, %v3822_v41  ;;  %v3825_v44 = vcvt.s32.f32 %v3818_v14  ;;  %v743_v8 = vshrl.u32 %v7346_v43, %v742_v60 }
 0x180   :  { %v757_v38 = vshrl.u32 %v7350_v59, %v742_v60  ;;  %vm759_vm3 = vcmp.lt.s32.totalorder %v5223_v54, 1  ;;  %v684_v50 = vadd.s32 536870912, %v683_v31  ;;  %vm761_vm4 = vcmp.lt.s32.totalorder %v5223_v54, 3 }
 0x181   :  { %vm762_vm5 = vcmp.lt.s32.totalorder %v5223_v54, 4  ;;  %v3826_v2 = vmul.f32 %v3825_v44, %v3823_v30  ;;  %v767_v45 = vsel %vm759_vm3, %v746_v6, %v749_v57  ;;  %v771_v42 = vsel %vm759_vm3, %v749_v57, %v752_v36 }
 0x182   :  { %v758_v35 = vor.u32 %v757_v38, %v756_v62  ;;  %v768_v39 = vsel %vm762_vm5, %v755_v56, 920167782  ;;  %v685_v19 = vshrl.u32 %v684_v50, 30  ;;  %v764_v29 = vsel %vm762_vm5, %v752_v36, 2102212464 }
 0x183   :  { %v769_v55 = vsel %vm761_vm4, %v752_v36, %v768_v39  ;;  %v3827_v7 = vxor.u32 2147483648, %v3826_v2  ;;  %vm760_vm6 = vcmp.lt.s32.totalorder %v5223_v54, 2  ;;  %v763_v60 = vsel %vm759_vm3, %v743_v8, %v746_v6 }
 0x184   :  { %v772_v34 = vsel %vm762_vm5, %v758_v35, 1326507024  ;;  %v686_v37 = vshll.u32 %v685_v19, 30  ;;  %v770_v44 = vsel %vm760_vm6, %v767_v45, %v769_v55  ;;  %v841_v49 = vadd.s32 1, %v4041_v46 }
 0x185   :  { %v773_v14 = vsel %vm761_vm4, %v755_v56, %v772_v34  ;;  %v3828_v33 = vsel %vm3745_vm10, %v3827_v7, %v3826_v2  ;;  %v765_v36 = vsel %vm761_vm4, %v749_v57, %v764_v29  ;;  %v709_v20 = vsub.s32 4, %v685_v19 }
 0x186   :  { %v774_v30 = vsel %vm760_vm6, %v771_v42, %v773_v14  ;;  %v3831_v56 = vsel %vm5206_vm12, %v4993_v18, %v3828_v33  ;;  %v5273_v41 = vsub.s32 %v683_v31, %v686_v37  ;;  %vm842_vm7 = vcmp.gt.s32.totalorder %v841_v49, 0 }
 0x187   :  { %v5267_v47 = vmul.u32.u64.low %v5187_v24, %v774_v30  ;;  %v5268_v6 = vmul.u32.u64.high %v5187_v24, %v774_v30, %v5267_v47  ;;  %4420 = vcosq.f32 %v3831_v56  ;;  %v843_v38 = vsel %vm842_vm7, %v841_v49, 0 }
 0x188   :  { %v5276_v46 = vmul.u32.u64.low %v5187_v24, %v770_v44  ;;  %v5277_v62 = vmul.u32.u64.high %v5187_v24, %v770_v44, %v5276_v46  ;;  %4422 = vsinq.f32 %v3831_v56  ;;  %v689_v57 = vsub.s32 0, %v5273_v41 }
 0x189   :  { %v766_v3 = vsel %vm760_vm6, %v763_v60, %v765_v36  ;;  %v839_v31 = vor.u32 8388608, %v5191_v23  ;;  %v845_v8 = vand.u32 31, %v843_v38  ;;  %v5285_v50 = vand.u32 3, %v3836_v52 }
 0x18a   :  { %v4034_v35 = vmin.u32 %v689_v57, %v5273_v41  ;;  %v5290_v2 = vsel %vm625_vm8, %v709_v20, %v685_v19  ;;  %vm784_vm9 = vc.u32 %v5268_v6, %v5276_v46  ;;  %v785_v45 = vadd.s32 1, %v5277_v62 }
 0x18b   :  { %v846_v39 = vsub.s32 32, %v845_v8  ;;  %v7351_v54 = vand.u32 2147483647, %v5045_v63  ;;  %v679_v52 = vadd.s32 %v5218_v53, %v5231_v17  ;;  %v782_v29 = vmul.u32 %v5187_v24, %v766_v3 }
 0x18c   :  { %v691_v23 = vclz %v4034_v35  ;;  %v786_v55 = vsel %vm784_vm9, %v785_v45, %v5277_v62  ;;  %v5309_v7 = vshll.u32 %v839_v31, 8  ;;  %vm3842_vm11 = vcmp.eq.s32.totalorder %v5285_v50, 2 }
 0x18d   :  { %vm5297_vm10 = vcmp.le.f32.partialorder %v7351_v54, 0.7853982  ;;  %v849_v34 = vshrl.u32 %v7347_v25, %v846_v39  ;;  %v787_v14 = vadd.s32 %v786_v55, %v782_v29  ;;  %v5312_v37 = vshrl.u32 %v843_v38, 5 }
 0x18e   :  { %v4035_v60 = vadd.s32 4294967294, %v691_v23  ;;  %v852_v53 = vshrl.u32 %v7348_v32, %v846_v39  ;;  %vm3839_vm12 = vcmp.eq.s32.totalorder %v5285_v50, 0  ;;  %v848_v24 = vshll.u32 %v7346_v43, %v845_v8 }
 0x18f   :  { %v851_v17 = vshll.u32 %v7347_v25, %v845_v8  ;;  %v855_v44 = vshrl.u32 %v7349_v61, %v846_v39  ;;  %v858_v30 = vshrl.u32 %v4574_v58, %v846_v39  ;;  %vm3838_vm13 = vcmp.lt.s32.totalorder %v5285_v50, 2 }
 0x190   :  { %vm4036_vm14 = vcmp.lt.s32.totalorder %v4035_v60, 0  ;;  %v788_v49 = vadd.s32 536870912, %v787_v14  ;;  %v847_v33 = vshrl.u32 %v7346_v43, %v846_v39  ;;  %v854_v36 = vshll.u32 %v7348_v32, %v845_v8 }
 0x191   :  { %vm3835_vm15 = vweird.f32 %v4993_v18  ;;  %v694_v47 = vsel %vm4036_vm14, 0, %v4035_v60  ;;  %v850_v56 = vor.u32 %v849_v34, %v848_v24  ;;  %v857_v20 = vshll.u32 %v7349_v61, %v845_v8 }
 0x192   :  { %v861_v62 = vshrl.u32 %v7350_v59, %v846_v39  ;;  %v695_v57 = vsub.s32 32, %v694_v47  ;;  %v699_v38 = vsub.s32 4294967266, %v694_v47  ;;  %vm729_vm0 = vcmp.lt.s32.totalorder %v5106_v51, 0 }
 0x193   :  { %v789_v3 = vshrl.u32 %v788_v49, 30  ;;  %v853_v31 = vor.u32 %v852_v53, %v851_v17  ;;  %v856_v35 = vor.u32 %v855_v44, %v854_v36  ;;  %v859_v45 = vor.u32 %v858_v30, %v857_v20 }
 0x194   :  { %v860_v54 = vshll.u32 %v4574_v58, %v845_v8  ;;  %vm863_vm1 = vcmp.lt.s32.totalorder %v5312_v37, 1  ;;  %v4421_v23 = vpop.eup %4420  ;;  %v696_v29 = vshll.u32 %v5273_v41, %v694_v47  ;;  %v697_v55 = vshrl.u32 %v679_v52, %v695_v57 }
 0x195   :  { %v700_v34 = vadd.s32 127, %v699_v38  ;;  %v790_v60 = vshll.u32 %v789_v3, 30  ;;  %v4423_v24 = vpop.eup %4422  ;;  %v3843_v39 = vxor.u32 2147483648, %v4421_v23  ;;  %vm864_vm2 = vcmp.lt.s32.totalorder %v5312_v37, 2 }
 0x196   :  { %v862_v19 = vor.u32 %v861_v62, %v860_v54  ;;  %vm866_vm3 = vcmp.lt.s32.totalorder %v5312_v37, 4  ;;  %v3840_v53 = vxor.u32 2147483648, %v4423_v24  ;;  %v698_v17 = vor.u32 %v697_v55, %v696_v29 }
 0x197   :  { %v701_v44 = vshll.u32 %v700_v34, 23  ;;  %v5332_v30 = vsub.s32 %v787_v14, %v790_v60  ;;  %v3844_v8 = vsel %vm3842_vm11, %v3843_v39, %v4423_v24  ;;  %v7354_v41 = vand.u32 2147483647, %v5106_v51 }
 0x198   :  { %v813_v49 = vsub.s32 4, %v789_v3  ;;  %vm865_vm5 = vcmp.lt.s32.totalorder %v5312_v37, 3  ;;  %v872_v36 = vsel %vm866_vm3, %v859_v45, 920167782  ;;  %v3841_v47 = vsel %vm3839_vm12, %v4421_v23, %v3840_v53 }
 0x199   :  { %vm5338_vm4 = vcmp.le.f32.partialorder %v7354_v41, 0.7853982  ;;  %v702_v14 = vor.u32 4788187, %v701_v44  ;;  %v793_v20 = vsub.s32 0, %v5332_v30  ;;  %v871_v62 = vsel %vm863_vm1, %v850_v56, %v853_v31 }
 0x19a   :  { %v3845_v57 = vsel %vm3838_vm13, %v3841_v47, %v3844_v8  ;;  %v867_v38 = vsel %vm863_vm1, %v847_v33, %v850_v56  ;;  %v868_v54 = vsel %vm866_vm3, %v856_v35, 2102212464  ;;  %v873_v29 = vsel %vm865_vm5, %v856_v35, %v872_v36 }
 0x19b   :  { %v3846_v23 = vsel %vm3835_vm15, nan, %v3845_v57  ;;  %v703_v55 = vand.u32 2147483647, %v702_v14  ;;  %v705_v34 = vcvt.s32.f32 %v698_v17  ;;  %v4038_v60 = vmin.u32 %v793_v20, %v5332_v30 }
 0x19c   :  { %3981 = vst [vmem:[#allocation2 + $0xf0] sm:$0xff] %v3846_v23  ;;  %v814_v50 = vsel %vm729_vm0, %v813_v49, %v789_v3  ;;  %v874_v33 = vsel %vm864_vm2, %v871_v62, %v873_v29  ;;  %v875_v56 = vsel %vm863_vm1, %v853_v31, %v856_v35  ;;  %v876_v24 = vsel %vm866_vm3, %v862_v19, 1326507024 }
 0x19d   :  { %v706_v39 = vmul.f32 %v705_v34, %v703_v55  ;;  %v795_v18 = vclz %v4038_v60  ;;  %v869_v53 = vsel %vm865_vm5, %v853_v31, %v868_v54  ;;  %v877_v17 = vsel %vm865_vm5, %v859_v45, %v876_v24 }
 0x19e   :  { %v878_v3 = vsel %vm864_vm2, %v875_v56, %v877_v17  ;;  %v5376_v44 = vmul.u32.u64.low %v5309_v7, %v874_v33  ;;  %v5377_v8 = vmul.u32.u64.high %v5309_v7, %v874_v33, %v5376_v44  ;;  %v938_v35 = vand.u32 2139095040, %v5042_v4 }
 0x19f   :  { %v707_v41 = vxor.u32 2147483648, %v706_v39  ;;  %v7357_v19 = vsel %vm5297_vm10, 0, %v5290_v2  ;;  %v4039_v36 = vadd.s32 4294967294, %v795_v18  ;;  %v935_v31 = vand.u32 2147483647, %v5042_v4 }
 0x1a0   :  { %v716_v49 = vadd.s32 3, %v7357_v19  ;;  %v870_v45 = vsel %vm864_vm2, %v867_v38, %v869_v53  ;;  %v5388_v47 = vmul.u32.u64.low %v5309_v7, %v878_v3  ;;  %v5389_v14 = vmul.u32.u64.high %v5309_v7, %v878_v3, %v5388_v47 }
 0x1a1   :  { %v939_v20 = vshrl.u32 %v938_v35, 23  ;;  %v708_v62 = vsel %vm625_vm8, %v707_v41, %v706_v39  ;;  %v783_v57 = vadd.s32 %v5276_v46, %v5268_v6  ;;  %vm4040_vm6 = vcmp.lt.s32.totalorder %v4039_v36, 0 }
 0x1a2   :  { %v816_v2 = vsel %vm5338_vm4, 0, %v814_v50  ;;  %v711_v37 = vsel %vm5297_vm10, %v5045_v63, %v708_v62  ;;  %v798_v38 = vsel %vm4040_vm6, 0, %v4039_v36  ;;  %v889_v54 = vadd.s32 1, %v5377_v8 }
 0x1a3   :  { %v4045_v29 = vadd.s32 4294967169, %v939_v20  ;;  %4424 = vcosq.f32 %v711_v37  ;;  %v799_v23 = vsub.s32 32, %v798_v38  ;;  %v803_v55 = vsub.s32 4294967266, %v798_v38 }
 0x1a4   :  { %v886_v34 = vmul.u32 %v5309_v7, %v870_v45  ;;  %4426 = vsinq.f32 %v711_v37  ;;  %v800_v6 = vshll.u32 %v5332_v30, %v798_v38  ;;  %vm888_vm7 = vc.u32 %v5389_v14, %v5376_v44 }
 0x1a5   :  { %v942_v46 = vand.u32 8388607, %v935_v31  ;;  %v801_v60 = vshrl.u32 %v783_v57, %v799_v23  ;;  %v804_v42 = vadd.s32 127, %v803_v55  ;;  %v890_v50 = vsel %vm888_vm7, %v889_v54, %v5377_v8 }
 0x1a6   :  { %v945_v33 = vadd.s32 1, %v4045_v29  ;;  %v5407_v56 = vand.u32 3, %v716_v49  ;;  %v820_v24 = vadd.s32 3, %v816_v2  ;;  %v891_v39 = vadd.s32 %v890_v50, %v886_v34 }
 0x1a7   :  { %v802_v18 = vor.u32 %v801_v60, %v800_v6  ;;  %v805_v53 = vshll.u32 %v804_v42, 23  ;;  %v943_v17 = vor.u32 8388608, %v942_v46  ;;  %vm833_vm10 = vcmp.lt.s32.totalorder %v5039_v21, 0 }
 0x1a8   :  { %vm946_vm8 = vcmp.gt.s32.totalorder %v945_v33, 0  ;;  %v892_v7 = vadd.s32 536870912, %v891_v39  ;;  %vm722_vm9 = vcmp.eq.s32.totalorder %v5407_v56, 2  ;;  %v5410_v41 = vand.u32 3, %v820_v24 }
 0x1a9   :  { %v947_v30 = vsel %vm946_vm8, %v945_v33, 0  ;;  %v806_v3 = vor.u32 4788187, %v805_v53  ;;  %vm719_vm11 = vcmp.eq.s32.totalorder %v5407_v56, 0  ;;  %v809_v49 = vcvt.s32.f32 %v802_v18 }
 0x1aa   :  { %v949_v35 = vand.u32 31, %v947_v30  ;;  %v893_v8 = vshrl.u32 %v892_v7, 30  ;;  %v5415_v36 = vadd.s32 %v5376_v44, %v5389_v14  ;;  %vm718_vm12 = vcmp.lt.s32.totalorder %v5407_v56, 2 }
 0x1ab   :  { %v807_v19 = vand.u32 2147483647, %v806_v3  ;;  %v7358_v47 = vand.u32 2147483647, %v5039_v21  ;;  %v5424_v2 = vshll.u32 %v943_v17, 8  ;;  %vm715_vm14 = vweird.f32 %v5045_v63 }
 0x1ac   :  { %v950_v45 = vsub.s32 32, %v949_v35  ;;  %v894_v62 = vshll.u32 %v893_v8, 30  ;;  %v917_v57 = vsub.s32 4, %v893_v8  ;;  %v1039_v37 = vand.u32 2147483647, %v5048_v22 }
 0x1ad   :  { %vm5420_vm13 = vcmp.le.f32.partialorder %v7358_v47, 0.7853982  ;;  %v810_v38 = vmul.f32 %v809_v49, %v807_v19  ;;  %v1042_v54 = vand.u32 2139095040, %v5048_v22  ;;  %v948_v23 = vshrl.u32 %v947_v30, 5 }
 0x1ae   :  { %v953_v44 = vshrl.u32 %v7347_v25, %v950_v45  ;;  %v956_v14 = vshrl.u32 %v7348_v32, %v950_v45  ;;  %v5431_v29 = vsub.s32 %v891_v39, %v894_v62  ;;  %v952_v55 = vshll.u32 %v7346_v43, %v949_v35 }
 0x1af   :  { %v959_v34 = vshrl.u32 %v7349_v61, %v950_v45  ;;  %v811_v6 = vxor.u32 2147483648, %v810_v38  ;;  %v955_v46 = vshll.u32 %v7347_v25, %v949_v35  ;;  %v958_v60 = vshll.u32 %v7348_v32, %v949_v35 }
 0x1b0   :  { %v962_v42 = vshrl.u32 %v4574_v58, %v950_v45  ;;  %v4425_v50 = vpop.eup %4424  ;;  %v897_v33 = vsub.s32 0, %v5431_v29  ;;  %v918_v24 = vsel %vm833_vm10, %v917_v57, %v893_v8  ;;  %v954_v39 = vor.u32 %v953_v44, %v952_v55 }
 0x1b1   :  { %v961_v18 = vshll.u32 %v7349_v61, %v949_v35  ;;  %v4427_v53 = vpop.eup %4426  ;;  %v723_v7 = vxor.u32 2147483648, %v4425_v50  ;;  %v812_v17 = vsel %vm729_vm0, %v811_v6, %v810_v38  ;;  %v957_v30 = vor.u32 %v956_v14, %v955_v46 }
 0x1b2   :  { %v965_v3 = vshrl.u32 %v7350_v59, %v950_v45  ;;  %v720_v19 = vxor.u32 2147483648, %v4427_v53  ;;  %v815_v49 = vsel %vm5338_vm4, %v5106_v51, %v812_v17  ;;  %v4042_v47 = vmin.u32 %v897_v33, %v5431_v29 }
 0x1b3   :  { %v960_v62 = vor.u32 %v959_v34, %v958_v60  ;;  %v724_v8 = vsel %vm722_vm9, %v723_v7, %v4427_v53  ;;  %4428 = vcosq.f32 %v815_v49  ;;  %v963_v57 = vor.u32 %v962_v42, %v961_v18 }
 0x1b4   :  { %v964_v44 = vshll.u32 %v4574_v58, %v949_v35  ;;  %v721_v38 = vsel %vm719_vm11, %v4425_v50, %v720_v19  ;;  %4430 = vsinq.f32 %v815_v49  ;;  %v899_v14 = vclz %v4042_v47 }
 0x1b5   :  { %v1043_v55 = vshrl.u32 %v1042_v54, 23  ;;  %v725_v52 = vsel %vm718_vm12, %v721_v38, %v724_v8  ;;  %v920_v6 = vsel %vm5420_vm13, 0, %v918_v24  ;;  %v951_v34 = vshrl.u32 %v7346_v43, %v950_v45 }
 0x1b6   :  { %v966_v46 = vor.u32 %v965_v3, %v964_v44  ;;  %v726_v60 = vsel %vm715_vm14, nan, %v725_v52  ;;  %v4043_v42 = vadd.s32 4294967294, %v899_v14  ;;  %vm967_vm15 = vcmp.lt.s32.totalorder %v948_v23, 1 }
 0x1b7   :  { %vm970_vm0 = vcmp.lt.s32.totalorder %v948_v23, 4  ;;  %vm969_vm1 = vcmp.lt.s32.totalorder %v948_v23, 3  ;;  %v975_v50 = vsel %vm967_vm15, %v954_v39, %v957_v30  ;;  %3951 = vst [vmem:[#allocation2] sm:$0xff] %v726_v60  ;;  %vm968_vm3 = vcmp.lt.s32.totalorder %v948_v23, 2 }
 0x1b8   :  { %v972_v35 = vsel %vm970_vm0, %v960_v62, 2102212464  ;;  %v976_v33 = vsel %vm970_vm0, %v963_v57, 920167782  ;;  %vm4044_vm2 = vcmp.lt.s32.totalorder %v4043_v42, 0  ;;  %v979_v54 = vsel %vm967_vm15, %v957_v30, %v960_v62 }
 0x1b9   :  { %v977_v56 = vsel %vm969_vm1, %v960_v62, %v976_v33  ;;  %v902_v24 = vsel %vm4044_vm2, 0, %v4043_v42  ;;  %v971_v18 = vsel %vm967_vm15, %v951_v34, %v954_v39  ;;  %v980_v53 = vsel %vm970_vm0, %v966_v46, 1326507024 }
 0x1ba   :  { %v978_v45 = vsel %vm968_vm3, %v975_v50, %v977_v56  ;;  %v903_v63 = vsub.s32 32, %v902_v24  ;;  %v907_v7 = vsub.s32 4294967266, %v902_v24  ;;  %v973_v17 = vsel %vm969_vm1, %v957_v30, %v972_v35 }
 0x1bb   :  { %v981_v3 = vsel %vm969_vm1, %v963_v57, %v980_v53  ;;  %v904_v19 = vshll.u32 %v5431_v29, %v902_v24  ;;  %v5468_v47 = vmul.u32.u64.low %v5424_v2, %v978_v45  ;;  %v5469_v8 = vmul.u32.u64.high %v5424_v2, %v978_v45, %v5468_v47 }
 0x1bc   :  { %v982_v49 = vsel %vm968_vm3, %v979_v54, %v981_v3  ;;  %v905_v39 = vshrl.u32 %v5415_v36, %v903_v63  ;;  %v908_v62 = vadd.s32 127, %v907_v7  ;;  %v974_v30 = vsel %vm968_vm3, %v971_v18, %v973_v17 }
 0x1bd   :  { %v5474_v44 = vmul.u32.u64.low %v5424_v2, %v982_v49  ;;  %v5475_v38 = vmul.u32.u64.high %v5424_v2, %v982_v49, %v5474_v44  ;;  %v4049_v14 = vadd.s32 4294967169, %v1043_v55  ;;  %vm826_vm4 = vcmp.eq.s32.totalorder %v5410_v41, 2 }
 0x1be   :  { %v906_v29 = vor.u32 %v905_v39, %v904_v19  ;;  %v909_v57 = vshll.u32 %v908_v62, 23  ;;  %v924_v52 = vadd.s32 3, %v920_v6  ;;  %v993_v34 = vadd.s32 1, %v5469_v8 }
 0x1bf   :  { %v1046_v46 = vand.u32 8388607, %v1039_v37  ;;  %v1049_v60 = vadd.s32 1, %v4049_v14  ;;  %v990_v35 = vmul.u32 %v5424_v2, %v974_v30  ;;  %vm992_vm5 = vc.u32 %v5475_v38, %v5468_v47 }
 0x1c0   :  { %v4429_v36 = vpop.eup %4428  ;;  %v910_v42 = vor.u32 4788187, %v909_v57  ;;  %v1146_v23 = vand.u32 2139095040, %v5051_v5  ;;  %v913_v33 = vcvt.s32.f32 %v906_v29  ;;  %v994_v6 = vsel %vm992_vm5, %v993_v34, %v5469_v8 }
 0x1c1   :  { %v4431_v55 = vpop.eup %4430  ;;  %v827_v50 = vxor.u32 2147483648, %v4429_v36  ;;  %vm1050_vm6 = vcmp.gt.s32.totalorder %v1049_v60, 0  ;;  %v995_v24 = vadd.s32 %v994_v6, %v990_v35  ;;  %vm819_vm7 = vweird.f32 %v5106_v51 }
 0x1c2   :  { %v824_v56 = vxor.u32 2147483648, %v4431_v55  ;;  %v911_v54 = vand.u32 2147483647, %v910_v42  ;;  %v1051_v18 = vsel %vm1050_vm6, %v1049_v60, 0  ;;  %vm823_vm8 = vcmp.eq.s32.totalorder %v5410_v41, 0 }
 0x1c3   :  { %v828_v2 = vsel %vm826_vm4, %v827_v50, %v4431_v55  ;;  %v1053_v45 = vand.u32 31, %v1051_v18  ;;  %vm822_vm9 = vcmp.lt.s32.totalorder %v5410_v41, 2  ;;  %v996_v7 = vadd.s32 536870912, %v995_v24 }
 0x1c4   :  { %v825_v53 = vsel %vm823_vm8, %v4429_v36, %v824_v56  ;;  %v914_v63 = vmul.f32 %v913_v33, %v911_v54  ;;  %v5492_v3 = vand.u32 3, %v924_v52  ;;  %v1047_v19 = vor.u32 8388608, %v1046_v46 }
 0x1c5   :  { %v829_v17 = vsel %vm822_vm9, %v825_v53, %v828_v2  ;;  %v1054_v49 = vsub.s32 32, %v1053_v45  ;;  %v997_v62 = vshrl.u32 %v996_v7, 30  ;;  %v1147_v51 = vshrl.u32 %v1146_v23, 23 }
 0x1c6   :  { %v830_v8 = vsel %vm819_vm7, nan, %v829_v17  ;;  %v915_v39 = vxor.u32 2147483648, %v914_v63  ;;  %vm937_vm11 = vcmp.lt.s32.totalorder %v5042_v4, 0  ;;  %v1056_v44 = vshll.u32 %v7346_v43, %v1053_v45 }
 0x1c7   :  { %v1057_v30 = vshrl.u32 %v7347_v25, %v1054_v49  ;;  %v1060_v41 = vshrl.u32 %v7348_v32, %v1054_v49  ;;  %v1063_v14 = vshrl.u32 %v7349_v61, %v1054_v49  ;;  %3952 = vst [vmem:[#allocation2 + $0x8] sm:$0xff] %v830_v8  ;;  %v998_v57 = vshll.u32 %v997_v62, 30 }
 0x1c8   :  { %v916_v29 = vsel %vm833_vm10, %v915_v39, %v914_v63  ;;  %v1052_v52 = vshrl.u32 %v1051_v18, 5  ;;  %v1062_v34 = vshll.u32 %v7348_v32, %v1053_v45  ;;  %v1059_v36 = vshll.u32 %v7347_v25, %v1053_v45 }
 0x1c9   :  { %v919_v46 = vsel %vm5420_vm13, %v5039_v21, %v916_v29  ;;  %v1058_v60 = vor.u32 %v1057_v30, %v1056_v44  ;;  %v1065_v42 = vshll.u32 %v7349_v61, %v1053_v45  ;;  %v5507_v35 = vsub.s32 %v995_v24, %v998_v57 }
 0x1ca   :  { %4432 = vcosq.f32 %v919_v46  ;;  %v1064_v23 = vor.u32 %v1063_v14, %v1062_v34  ;;  %v1066_v55 = vshrl.u32 %v4574_v58, %v1054_v49  ;;  %v1061_v50 = vor.u32 %v1060_v41, %v1059_v36 }
 0x1cb   :  { %4434 = vsinq.f32 %v919_v46  ;;  %v1068_v33 = vshll.u32 %v4574_v58, %v1053_v45  ;;  %v1069_v6 = vshrl.u32 %v7350_v59, %v1054_v49  ;;  %v1001_v20 = vsub.s32 0, %v5507_v35 }
 0x1cc   :  { %v1021_v56 = vsub.s32 4, %v997_v62  ;;  %v1067_v54 = vor.u32 %v1066_v55, %v1065_v42  ;;  %v5513_v18 = vshll.u32 %v1047_v19, 8  ;;  %vm5517_vm10 = vcmp.le.f32.partialorder %v935_v31, 0.7853982 }
 0x1cd   :  { %v1055_v2 = vshrl.u32 %v7346_v43, %v1054_v49  ;;  %v1070_v53 = vor.u32 %v1069_v6, %v1068_v33  ;;  %vm1074_vm12 = vcmp.lt.s32.totalorder %v1052_v52, 4  ;;  %v4053_v63 = vadd.s32 4294967169, %v1147_v51 }
 0x1ce   :  { %v4046_v45 = vmin.u32 %v1001_v20, %v5507_v35  ;;  %vm1071_vm13 = vcmp.lt.s32.totalorder %v1052_v52, 1  ;;  %vm1073_vm14 = vcmp.lt.s32.totalorder %v1052_v52, 3  ;;  %v1076_v7 = vsel %vm1074_vm12, %v1064_v23, 2102212464 }
 0x1cf   :  { %v1075_v17 = vsel %vm1071_vm13, %v1055_v2, %v1058_v60  ;;  %v1077_v19 = vsel %vm1073_vm14, %v1061_v50, %v1076_v7  ;;  %v1079_v8 = vsel %vm1071_vm13, %v1058_v60, %v1061_v50  ;;  %v1080_v31 = vsel %vm1074_vm12, %v1067_v54, 920167782 }
 0x1d0   :  { %v1003_v39 = vclz %v4046_v45  ;;  %v5528_v44 = vsel %vm937_vm11, %v1021_v56, %v997_v62  ;;  %v1083_v49 = vsel %vm1071_vm13, %v1061_v50, %v1064_v23  ;;  %v1143_v51 = vand.u32 2147483647, %v5051_v5 }
 0x1d1   :  { %vm1072_vm15 = vcmp.lt.s32.totalorder %v1052_v52, 2  ;;  %v1081_v30 = vsel %vm1073_vm14, %v1064_v23, %v1080_v31  ;;  %v1084_v41 = vsel %vm1074_vm12, %v1070_v53, 1326507024  ;;  %v1153_v14 = vadd.s32 1, %v4053_v63 }
 0x1d2   :  { %vm927_vm0 = vcmp.eq.s32.totalorder %v5492_v3, 0  ;;  %v4047_v29 = vadd.s32 4294967294, %v1003_v39  ;;  %v1078_v57 = vsel %vm1072_vm15, %v1075_v17, %v1077_v19  ;;  %v1082_v34 = vsel %vm1072_vm15, %v1079_v8, %v1081_v30 }
 0x1d3   :  { %v1085_v46 = vsel %vm1073_vm14, %v1067_v54, %v1084_v41  ;;  %vm926_vm1 = vcmp.lt.s32.totalorder %v5492_v3, 2  ;;  %v5537_v60 = vmul.u32.u64.low %v5513_v18, %v1082_v34  ;;  %v5538_v36 = vmul.u32.u64.high %v5513_v18, %v1082_v34, %v5537_v60 }
 0x1d4   :  { %v1086_v62 = vsel %vm1072_vm15, %v1083_v49, %v1085_v46  ;;  %vm1154_vm2 = vcmp.gt.s32.totalorder %v1153_v14, 0  ;;  %vm923_vm3 = vweird.f32 %v5039_v21  ;;  %vm4048_vm4 = vcmp.lt.s32.totalorder %v4047_v29, 0 }
 0x1d5   :  { %v5543_v42 = vmul.u32.u64.low %v5513_v18, %v1086_v62  ;;  %v5544_v23 = vmul.u32.u64.high %v5513_v18, %v1086_v62, %v5543_v42  ;;  %v1155_v55 = vsel %vm1154_vm2, %v1153_v14, 0  ;;  %vm930_vm5 = vcmp.eq.s32.totalorder %v5492_v3, 2 }
 0x1d6   :  { %v1006_v52 = vsel %vm4048_vm4, 0, %v4047_v29  ;;  %v1150_v50 = vand.u32 8388607, %v1143_v51  ;;  %v1157_v33 = vand.u32 31, %v1155_v55  ;;  %v991_v6 = vadd.s32 %v5468_v47, %v5475_v38 }
 0x1d7   :  { %v1007_v20 = vsub.s32 32, %v1006_v52  ;;  %v1011_v56 = vsub.s32 4294967266, %v1006_v52  ;;  %v1024_v54 = vsel %vm5517_vm10, 0, %v5528_v44  ;;  %v4433_v2 = vpop.eup %4432  ;;  %v1094_v53 = vmul.u32 %v5513_v18, %v1078_v57 }
 0x1d8   :  { %v1097_v63 = vadd.s32 1, %v5538_v36  ;;  %v5556_v45 = vshrl.u32 %v1155_v55, 5  ;;  %v1158_v7 = vsub.s32 32, %v1157_v33  ;;  %v4435_v17 = vpop.eup %4434  ;;  %v931_v19 = vxor.u32 2147483648, %v4433_v2 }
 0x1d9   :  { %v1008_v8 = vshll.u32 %v5507_v35, %v1006_v52  ;;  %v1009_v31 = vshrl.u32 %v991_v6, %v1007_v20  ;;  %v1012_v47 = vadd.s32 127, %v1011_v56  ;;  %v928_v38 = vxor.u32 2147483648, %v4435_v17 }
 0x1da   :  { %vm1096_vm6 = vc.u32 %v5544_v23, %v5537_v60  ;;  %v1160_v39 = vshll.u32 %v7346_v43, %v1157_v33  ;;  %v1161_v44 = vshrl.u32 %v7347_v25, %v1158_v7  ;;  %v932_v18 = vsel %vm930_vm5, %v931_v19, %v4435_v17 }
 0x1db   :  { %v1010_v49 = vor.u32 %v1009_v31, %v1008_v8  ;;  %v1013_v30 = vshll.u32 %v1012_v47, 23  ;;  %v1098_v41 = vsel %vm1096_vm6, %v1097_v63, %v5538_v36  ;;  %v929_v35 = vsel %vm927_vm0, %v4433_v2, %v928_v38 }
 0x1dc   :  { %v1099_v14 = vadd.s32 %v1098_v41, %v1094_v53  ;;  %v1163_v29 = vshll.u32 %v7347_v25, %v1157_v33  ;;  %v1164_v57 = vshrl.u32 %v7348_v32, %v1158_v7  ;;  %v933_v34 = vsel %vm926_vm1, %v929_v35, %v932_v18 }
 0x1dd   :  { %v1014_v46 = vor.u32 4788187, %v1013_v30  ;;  %v1017_v62 = vcvt.s32.f32 %v1010_v49  ;;  %v1162_v42 = vor.u32 %v1161_v44, %v1160_v39  ;;  %v934_v55 = vsel %vm923_vm3, nan, %v933_v34 }
 0x1de   :  { %v1100_v52 = vadd.s32 536870912, %v1099_v14  ;;  %v1166_v36 = vshll.u32 %v7348_v32, %v1157_v33  ;;  %v1167_v6 = vshrl.u32 %v7349_v61, %v1158_v7  ;;  %v1165_v56 = vor.u32 %v1164_v57, %v1163_v29  ;;  %3953 = vst [vmem:[#allocation2 + $0x10] sm:$0xff] %v934_v55 }
 0x1df   :  { %v1015_v20 = vand.u32 2147483647, %v1014_v46  ;;  %v1169_v2 = vshll.u32 %v7349_v61, %v1157_v33  ;;  %v1170_v53 = vshrl.u32 %v4574_v58, %v1158_v7  ;;  %v1151_v63 = vor.u32 8388608, %v1150_v50 }
 0x1e0   :  { %v1101_v3 = vshrl.u32 %v1100_v52, 30  ;;  %v1173_v17 = vshrl.u32 %v7350_v59, %v1158_v7  ;;  %v1168_v8 = vor.u32 %v1167_v6, %v1166_v36  ;;  %v1172_v31 = vshll.u32 %v4574_v58, %v1157_v33 }
 0x1e1   :  { %v1018_v19 = vmul.f32 %v1017_v62, %v1015_v20  ;;  %v1171_v21 = vor.u32 %v1170_v53, %v1169_v2  ;;  %v1028_v47 = vadd.s32 3, %v1024_v54  ;;  %vm1175_vm7 = vcmp.lt.s32.totalorder %v5556_v45, 1 }
 0x1e2   :  { %v1102_v38 = vshll.u32 %v1101_v3, 30  ;;  %v1174_v44 = vor.u32 %v1173_v17, %v1172_v31  ;;  %vm1178_vm8 = vcmp.lt.s32.totalorder %v5556_v45, 4  ;;  %v1183_v18 = vsel %vm1175_vm7, %v1162_v42, %v1165_v56 }
 0x1e3   :  { %v1019_v39 = vxor.u32 2147483648, %v1018_v19  ;;  %vm1177_vm9 = vcmp.lt.s32.totalorder %v5556_v45, 3  ;;  %v1184_v50 = vsel %vm1178_vm8, %v1171_v21, 920167782  ;;  %v1191_v30 = vshll.u32 %v1151_v63, 8 }
 0x1e4   :  { %v5584_v49 = vsub.s32 %v1099_v14, %v1102_v38  ;;  %v1159_v54 = vshrl.u32 %v7346_v43, %v1158_v7  ;;  %vm1176_vm12 = vcmp.lt.s32.totalorder %v5556_v45, 2  ;;  %v1185_v41 = vsel %vm1177_vm9, %v1168_v8, %v1184_v50 }
 0x1e5   :  { %v1020_v33 = vsel %vm937_vm11, %v1019_v39, %v1018_v19  ;;  %v1180_v29 = vsel %vm1178_vm8, %v1168_v8, 2102212464  ;;  %v1186_v57 = vsel %vm1176_vm12, %v1183_v18, %v1185_v41  ;;  %v1125_v34 = vsub.s32 4, %v1101_v3 }
 0x1e6   :  { %v1023_v35 = vsel %vm5517_vm10, %v5042_v4, %v1020_v33  ;;  %v1105_v14 = vsub.s32 0, %v5584_v49  ;;  %v1187_v7 = vsel %vm1175_vm7, %v1165_v56, %v1168_v8  ;;  %v1188_v46 = vsel %vm1178_vm8, %v1174_v44, 1326507024 }
 0x1e7   :  { %4436 = vcosq.f32 %v1023_v35  ;;  %v1179_v62 = vsel %vm1175_vm7, %v1159_v54, %v1162_v42  ;;  %v1189_v55 = vsel %vm1177_vm9, %v1171_v21, %v1188_v46  ;;  %v1181_v52 = vsel %vm1177_vm9, %v1165_v56, %v1180_v29 }
 0x1e8   :  { %4438 = vsinq.f32 %v1023_v35  ;;  %v4050_v24 = vmin.u32 %v1105_v14, %v5584_v49  ;;  %v1190_v36 = vsel %vm1176_vm12, %v1187_v7, %v1189_v55  ;;  %vm1041_vm11 = vcmp.lt.s32.totalorder %v5048_v22, 0 }
 0x1e9   :  { %v5616_v6 = vmul.u32.u64.low %v1191_v30, %v1186_v57  ;;  %v5617_v20 = vmul.u32.u64.high %v1191_v30, %v1186_v57, %v5616_v6  ;;  %v1126_v53 = vsel %vm1041_vm11, %v1125_v34, %v1101_v3  ;;  %v1250_v17 = vand.u32 2139095040, %v5054_v12 }
 0x1ea   :  { %v1107_v2 = vclz %v4050_v24  ;;  %v5622_v63 = vmul.u32.u64.low %v1191_v30, %v1190_v36  ;;  %v5623_v42 = vmul.u32.u64.high %v1191_v30, %v1190_v36, %v5622_v63  ;;  %v1182_v56 = vsel %vm1176_vm12, %v1179_v62, %v1181_v52 }
 0x1eb   :  { %v1247_v8 = vand.u32 2147483647, %v5054_v12  ;;  %v1029_v21 = vand.u32 3, %v1028_v47  ;;  %vm5631_vm10 = vcmp.le.f32.partialorder %v1039_v37, 0.7853982  ;;  %v1201_v3 = vadd.s32 1, %v5617_v20 }
 0x1ec   :  { %v4051_v19 = vadd.s32 4294967294, %v1107_v2  ;;  %v1251_v38 = vshrl.u32 %v1250_v17, 23  ;;  %v1095_v39 = vadd.s32 %v5537_v60, %v5544_v23  ;;  %v1128_v45 = vsel %vm5631_vm10, 0, %v1126_v53 }
 0x1ed   :  { %v1198_v18 = vmul.u32 %v1191_v30, %v1182_v56  ;;  %vm1200_vm14 = vc.u32 %v5623_v42, %v5616_v6  ;;  %v1254_v54 = vand.u32 8388607, %v1247_v8  ;;  %vm1027_vm15 = vweird.f32 %v5042_v4 }
 0x1ee   :  { %vm4052_vm13 = vcmp.lt.s32.totalorder %v4051_v19, 0  ;;  %v4057_v47 = vadd.s32 4294967169, %v1251_v38  ;;  %v1202_v33 = vsel %vm1200_vm14, %v1201_v3, %v5617_v20  ;;  %vm1030_vm0 = vcmp.lt.s32.totalorder %v1029_v21, 2 }
 0x1ef   :  { %v1110_v44 = vsel %vm4052_vm13, 0, %v4051_v19  ;;  %v1203_v60 = vadd.s32 %v1202_v33, %v1198_v18  ;;  %v1354_v41 = vand.u32 2139095040, %v5057_v13  ;;  %v1132_v29 = vadd.s32 3, %v1128_v45 }
 0x1f0   :  { %v1111_v50 = vsub.s32 32, %v1110_v44  ;;  %v1115_v37 = vsub.s32 4294967266, %v1110_v44  ;;  %v1257_v23 = vadd.s32 1, %v4057_v47  ;;  %v1112_v35 = vshll.u32 %v5584_v49, %v1110_v44 }
 0x1f1   :  { %vm1031_vm1 = vcmp.eq.s32.totalorder %v1029_v21, 0  ;;  %v1204_v57 = vadd.s32 536870912, %v1203_v60  ;;  %v1351_v34 = vand.u32 2147483647, %v5057_v13  ;;  %v1255_v62 = vor.u32 8388608, %v1254_v54 }
 0x1f2   :  { %v1113_v30 = vshrl.u32 %v1095_v39, %v1111_v50  ;;  %v1116_v14 = vadd.s32 127, %v1115_v37  ;;  %vm1258_vm2 = vcmp.gt.s32.totalorder %v1257_v23, 0  ;;  %v1355_v53 = vshrl.u32 %v1354_v41, 23 }
 0x1f3   :  { %v1259_v55 = vsel %vm1258_vm2, %v1257_v23, 0  ;;  %v1205_v20 = vshrl.u32 %v1204_v57, 30  ;;  %vm1034_vm3 = vcmp.eq.s32.totalorder %v1029_v21, 2  ;;  %v5648_v17 = vand.u32 3, %v1132_v29 }
 0x1f4   :  { %v4437_v7 = vpop.eup %4436  ;;  %v1114_v46 = vor.u32 %v1113_v30, %v1112_v35  ;;  %v1117_v24 = vshll.u32 %v1116_v14, 23  ;;  %v1261_v2 = vand.u32 31, %v1259_v55  ;;  %v5652_v38 = vand.u32 8388607, %v1351_v34 }
 0x1f5   :  { %v4439_v52 = vpop.eup %4438  ;;  %v1035_v36 = vxor.u32 2147483648, %v4437_v7  ;;  %v1206_v56 = vshll.u32 %v1205_v20, 30  ;;  %vm1145_vm4 = vcmp.lt.s32.totalorder %v5051_v5, 0  ;;  %v1199_v18 = vadd.s32 %v5616_v6, %v5623_v42 }
 0x1f6   :  { %v1032_v63 = vxor.u32 2147483648, %v4439_v52  ;;  %v1118_v49 = vor.u32 4788187, %v1117_v24  ;;  %v1262_v3 = vsub.s32 32, %v1261_v2  ;;  %v1121_v44 = vcvt.s32.f32 %v1114_v46 }
 0x1f7   :  { %v1036_v19 = vsel %vm1034_vm3, %v1035_v36, %v4439_v52  ;;  %v5658_v50 = vsub.s32 %v1203_v60, %v1206_v56  ;;  %v5660_v37 = vshll.u32 %v1255_v62, 8  ;;  %v4061_v33 = vadd.s32 4294967169, %v1355_v53 }
 0x1f8   :  { %v1033_v39 = vsel %vm1031_vm1, %v4437_v7, %v1032_v63  ;;  %v1119_v45 = vand.u32 2147483647, %v1118_v49  ;;  %v1260_v41 = vshrl.u32 %v1259_v55, 5  ;;  %v1265_v35 = vshrl.u32 %v7347_v25, %v1262_v3 }
 0x1f9   :  { %v1037_v47 = vsel %vm1030_vm0, %v1033_v39, %v1036_v19  ;;  %v1209_v30 = vsub.s32 0, %v5658_v50  ;;  %v1229_v14 = vsub.s32 4, %v1205_v20  ;;  %v1264_v29 = vshll.u32 %v7346_v43, %v1261_v2 }
 0x1fa   :  { %v1038_v54 = vsel %vm1027_vm15, nan, %v1037_v47  ;;  %v1122_v23 = vmul.f32 %v1121_v44, %v1119_v45  ;;  %v1268_v6 = vshrl.u32 %v7348_v32, %v1262_v3  ;;  %v1267_v21 = vshll.u32 %v7347_v25, %v1261_v2 }
 0x1fb   :  { %3954 = vst [vmem:[#allocation2 + $0x18] sm:$0xff] %v1038_v54  ;;  %v1270_v60 = vshll.u32 %v7348_v32, %v1261_v2  ;;  %v1271_v4 = vshrl.u32 %v7349_v61, %v1262_v3  ;;  %v4054_v57 = vmin.u32 %v1209_v30, %v5658_v50  ;;  %v1266_v7 = vor.u32 %v1265_v35, %v1264_v29 }
 0x1fc   :  { %v1123_v42 = vxor.u32 2147483648, %v1122_v23  ;;  %v1273_v46 = vshll.u32 %v7349_v61, %v1261_v2  ;;  %v1274_v24 = vshrl.u32 %v4574_v58, %v1262_v3  ;;  %v1269_v55 = vor.u32 %v1268_v6, %v1267_v21 }
 0x1fd   :  { %v1276_v52 = vshll.u32 %v4574_v58, %v1261_v2  ;;  %v1277_v36 = vshrl.u32 %v7350_v59, %v1262_v3  ;;  %v1211_v63 = vclz %v4054_v57  ;;  %v1272_v49 = vor.u32 %v1271_v4, %v1270_v60 }
 0x1fe   :  { %v1124_v62 = vsel %vm1041_vm11, %v1123_v42, %v1122_v23  ;;  %v1361_v19 = vadd.s32 1, %v4061_v33  ;;  %v1263_v56 = vshrl.u32 %v7346_v43, %v1262_v3  ;;  %v1275_v39 = vor.u32 %v1274_v24, %v1273_v46 }
 0x1ff   :  { %v1127_v53 = vsel %vm5631_vm10, %v5048_v22, %v1124_v62  ;;  %v1278_v45 = vor.u32 %v1277_v36, %v1276_v52  ;;  %v4055_v44 = vadd.s32 4294967294, %v1211_v63  ;;  %v5684_v47 = vsel %vm1145_vm4, %v1229_v14, %v1205_v20 }
 0x200   :  { %4440 = vcosq.f32 %v1127_v53  ;;  %vm1279_vm5 = vcmp.lt.s32.totalorder %v1260_v41, 1  ;;  %vm1281_vm6 = vcmp.lt.s32.totalorder %v1260_v41, 3  ;;  %vm1282_vm7 = vcmp.lt.s32.totalorder %v1260_v41, 4 }
 0x201   :  { %4442 = vsinq.f32 %v1127_v53  ;;  %v1283_v2 = vsel %vm1279_vm5, %v1263_v56, %v1266_v7  ;;  %v1287_v31 = vsel %vm1279_vm5, %v1266_v7, %v1269_v55  ;;  %vm4056_vm8 = vcmp.lt.s32.totalorder %v4055_v44, 0 }
 0x202   :  { %v1284_v54 = vsel %vm1282_vm7, %v1272_v49, 2102212464  ;;  %v1288_v23 = vsel %vm1282_vm7, %v1275_v39, 920167782  ;;  %v1291_v33 = vsel %vm1279_vm5, %v1269_v55, %v1272_v49  ;;  %v1214_v35 = vsel %vm4056_vm8, 0, %v4055_v44 }
 0x203   :  { %v1285_v3 = vsel %vm1281_vm6, %v1269_v55, %v1284_v54  ;;  %v1289_v30 = vsel %vm1281_vm6, %v1272_v49, %v1288_v23  ;;  %v1292_v29 = vsel %vm1282_vm7, %v1278_v45, 1326507024  ;;  %v1215_v6 = vsub.s32 32, %v1214_v35 }
 0x204   :  { %v1216_v42 = vshll.u32 %v5658_v50, %v1214_v35  ;;  %v1219_v20 = vsub.s32 4294967266, %v1214_v35  ;;  %vm1280_vm9 = vcmp.lt.s32.totalorder %v1260_v41, 2  ;;  %v1293_v60 = vsel %vm1281_vm6, %v1275_v39, %v1292_v29 }
 0x205   :  { %v1286_v14 = vsel %vm1280_vm9, %v1283_v2, %v1285_v3  ;;  %v1290_v21 = vsel %vm1280_vm9, %v1287_v31, %v1289_v30  ;;  %vm1362_vm12 = vcmp.gt.s32.totalorder %v1361_v19, 0  ;;  %v1217_v4 = vshrl.u32 %v1199_v18, %v1215_v6 }
 0x206   :  { %v1220_v57 = vadd.s32 127, %v1219_v20  ;;  %v1294_v7 = vsel %vm1280_vm9, %v1291_v33, %v1293_v60  ;;  %v1363_v46 = vsel %vm1362_vm12, %v1361_v19, 0  ;;  %vm5701_vm11 = vcmp.le.f32.partialorder %v1143_v51, 0.7853982 }
 0x207   :  { %v5691_v24 = vmul.u32.u64.low %v5660_v37, %v1294_v7  ;;  %v5692_v62 = vmul.u32.u64.high %v5660_v37, %v1294_v7, %v5691_v24  ;;  %v5695_v55 = vmul.u32.u64.low %v5660_v37, %v1290_v21  ;;  %v5696_v52 = vmul.u32.u64.high %v5660_v37, %v1290_v21, %v5695_v55 }
 0x208   :  { %v1218_v41 = vor.u32 %v1217_v4, %v1216_v42  ;;  %v1221_v18 = vshll.u32 %v1220_v57, 23  ;;  %v1365_v36 = vand.u32 31, %v1363_v46  ;;  %vm1131_vm10 = vweird.f32 %v5048_v22 }
 0x209   :  { %vm1134_vm13 = vcmp.lt.s32.totalorder %v5648_v17, 2  ;;  %vm1135_vm14 = vcmp.eq.s32.totalorder %v5648_v17, 0  ;;  %vm1138_vm15 = vcmp.eq.s32.totalorder %v5648_v17, 2  ;;  %v1359_v53 = vor.u32 8388608, %v5652_v38 }
 0x20a   :  { %v1222_v63 = vor.u32 4788187, %v1221_v18  ;;  %v1232_v51 = vsel %vm5701_vm11, 0, %v5684_v47  ;;  %v1302_v49 = vmul.u32 %v5660_v37, %v1286_v14  ;;  %v1366_v19 = vsub.s32 32, %v1365_v36 }
 0x20b   :  { %v1225_v56 = vcvt.s32.f32 %v1218_v41  ;;  %vm1304_vm0 = vc.u32 %v5692_v62, %v5695_v55  ;;  %v1305_v39 = vadd.s32 1, %v5696_v52  ;;  %v5717_v45 = vshrl.u32 %v1363_v46, 5 }
 0x20c   :  { %v1223_v2 = vand.u32 2147483647, %v1222_v63  ;;  %v1368_v38 = vshll.u32 %v7346_v43, %v1365_v36  ;;  %v1369_v31 = vshrl.u32 %v7347_v25, %v1366_v19  ;;  %v1372_v54 = vshrl.u32 %v7348_v32, %v1366_v19 }
 0x20d   :  { %v4441_v44 = vpop.eup %4440  ;;  %v1306_v37 = vsel %vm1304_vm0, %v1305_v39, %v5696_v52  ;;  %v1371_v33 = vshll.u32 %v7347_v25, %v1365_v36  ;;  %v1375_v35 = vshrl.u32 %v7349_v61, %v1366_v19  ;;  %v1374_v6 = vshll.u32 %v7348_v32, %v1365_v36 }
 0x20e   :  { %v4443_v47 = vpop.eup %4442  ;;  %v1139_v23 = vxor.u32 2147483648, %v4441_v44  ;;  %v1226_v30 = vmul.f32 %v1225_v56, %v1223_v2  ;;  %v1307_v29 = vadd.s32 %v1306_v37, %v1302_v49  ;;  %v1370_v20 = vor.u32 %v1369_v31, %v1368_v38 }
 0x20f   :  { %v1136_v3 = vxor.u32 2147483648, %v4443_v47  ;;  %v1373_v14 = vor.u32 %v1372_v54, %v1371_v33  ;;  %v1377_v21 = vshll.u32 %v7349_v61, %v1365_v36  ;;  %v1378_v7 = vshrl.u32 %v4574_v58, %v1366_v19 }
 0x210   :  { %v1140_v42 = vsel %vm1138_vm15, %v1139_v23, %v4443_v47  ;;  %v1227_v4 = vxor.u32 2147483648, %v1226_v30  ;;  %v1308_v57 = vadd.s32 536870912, %v1307_v29  ;;  %v1376_v24 = vor.u32 %v1375_v35, %v1374_v6 }
 0x211   :  { %v1137_v60 = vsel %vm1135_vm14, %v4441_v44, %v1136_v3  ;;  %v1380_v52 = vshll.u32 %v4574_v58, %v1365_v36  ;;  %v1381_v41 = vshrl.u32 %v7350_v59, %v1366_v19  ;;  %v1379_v56 = vor.u32 %v1378_v7, %v1377_v21 }
 0x212   :  { %v1141_v46 = vsel %vm1134_vm13, %v1137_v60, %v1140_v42  ;;  %v1228_v63 = vsel %vm1145_vm4, %v1227_v4, %v1226_v30  ;;  %v1309_v49 = vshrl.u32 %v1308_v57, 30  ;;  %v1236_v44 = vadd.s32 3, %v1232_v51 }
 0x213   :  { %v1142_v18 = vsel %vm1131_vm10, nan, %v1141_v46  ;;  %v1231_v39 = vsel %vm5701_vm11, %v5051_v5, %v1228_v63  ;;  %v1455_v17 = vand.u32 2147483647, %v5060_v0  ;;  %v1458_v2 = vand.u32 2139095040, %v5060_v0 }
 0x214   :  { %3955 = vst [vmem:[#allocation2 + $0x20] sm:$0xff] %v1142_v18  ;;  %4444 = vcosq.f32 %v1231_v39  ;;  %v1310_v36 = vshll.u32 %v1309_v49, 30  ;;  %v1382_v38 = vor.u32 %v1381_v41, %v1380_v52  ;;  %vm1383_vm1 = vcmp.lt.s32.totalorder %v5717_v45, 1 }
 0x215   :  { %4446 = vsinq.f32 %v1231_v39  ;;  %v1367_v22 = vshrl.u32 %v7346_v43, %v1366_v19  ;;  %vm1386_vm2 = vcmp.lt.s32.totalorder %v5717_v45, 4  ;;  %v1391_v31 = vsel %vm1383_vm1, %v1370_v20, %v1373_v14 }
 0x216   :  { %v5748_v54 = vsub.s32 %v1307_v29, %v1310_v36  ;;  %vm1385_vm3 = vcmp.lt.s32.totalorder %v5717_v45, 3  ;;  %v1388_v50 = vsel %vm1386_vm2, %v1376_v24, 2102212464  ;;  %v1392_v51 = vsel %vm1386_vm2, %v1379_v56, 920167782 }
 0x217   :  { %vm1384_vm4 = vcmp.lt.s32.totalorder %v5717_v45, 2  ;;  %v1393_v47 = vsel %vm1385_vm3, %v1376_v24, %v1392_v51  ;;  %v1395_v23 = vsel %vm1383_vm1, %v1373_v14, %v1376_v24  ;;  %v1399_v37 = vshll.u32 %v1359_v53, 8 }
 0x218   :  { %v1313_v33 = vsub.s32 0, %v5748_v54  ;;  %v1387_v35 = vsel %vm1383_vm1, %v1367_v22, %v1370_v20  ;;  %v1394_v19 = vsel %vm1384_vm4, %v1391_v31, %v1393_v47  ;;  %v1396_v3 = vsel %vm1386_vm2, %v1382_v38, 1326507024 }
 0x219   :  { %v1389_v30 = vsel %vm1385_vm3, %v1373_v14, %v1388_v50  ;;  %v1397_v6 = vsel %vm1385_vm3, %v1379_v56, %v1396_v3  ;;  %v5755_v29 = vmul.u32.u64.low %v1399_v37, %v1394_v19  ;;  %v5756_v42 = vmul.u32.u64.high %v1399_v37, %v1394_v19, %v5755_v29 }
 0x21a   :  { %v1237_v21 = vand.u32 3, %v1236_v44  ;;  %v4058_v60 = vmin.u32 %v1313_v33, %v5748_v54  ;;  %v1398_v4 = vsel %vm1384_vm4, %v1395_v23, %v1397_v6  ;;  %v1459_v53 = vshrl.u32 %v1458_v2, 23 }
 0x21b   :  { %v1333_v57 = vsub.s32 4, %v1309_v49  ;;  %v5762_v7 = vmul.u32.u64.low %v1399_v37, %v1398_v4  ;;  %v5763_v20 = vmul.u32.u64.high %v1399_v37, %v1398_v4, %v5762_v7  ;;  %v1390_v14 = vsel %vm1384_vm4, %v1387_v35, %v1389_v30 }
 0x21c   :  { %v1315_v46 = vclz %v4058_v60  ;;  %vm5769_vm5 = vcmp.le.f32.partialorder %v1247_v8, 0.7853982  ;;  %v1409_v52 = vadd.s32 1, %v5756_v42  ;;  %v4065_v41 = vadd.s32 4294967169, %v1459_v53 }
 0x21d   :  { %vm1238_vm6 = vcmp.lt.s32.totalorder %v1237_v21, 2  ;;  %vm1249_vm7 = vcmp.lt.s32.totalorder %v5054_v12, 0  ;;  %v1462_v63 = vand.u32 8388607, %v1455_v17  ;;  %v1406_v56 = vmul.u32 %v1399_v37, %v1390_v14 }
 0x21e   :  { %v4059_v18 = vadd.s32 4294967294, %v1315_v46  ;;  %v1334_v45 = vsel %vm1249_vm7, %v1333_v57, %v1309_v49  ;;  %vm1408_vm8 = vc.u32 %v5763_v20, %v5755_v29  ;;  %v1465_v8 = vadd.s32 1, %v4065_v41 }
 0x21f   :  { %vm1239_vm9 = vcmp.eq.s32.totalorder %v1237_v21, 0  ;;  %vm1242_vm12 = vcmp.eq.s32.totalorder %v1237_v21, 2  ;;  %v1410_v39 = vsel %vm1408_vm8, %v1409_v52, %v5756_v42  ;;  %v1303_v2 = vadd.s32 %v5695_v55, %v5692_v62 }
 0x220   :  { %vm4060_vm11 = vcmp.lt.s32.totalorder %v4059_v18, 0  ;;  %v1411_v38 = vadd.s32 %v1410_v39, %v1406_v56  ;;  %vm1466_vm10 = vcmp.gt.s32.totalorder %v1465_v8, 0  ;;  %v1336_v51 = vsel %vm5769_vm5, 0, %v1334_v45 }
 0x221   :  { %v4445_v44 = vpop.eup %4444  ;;  %v1318_v36 = vsel %vm4060_vm11, 0, %v4059_v18  ;;  %v1463_v37 = vor.u32 8388608, %v1462_v63  ;;  %v1467_v33 = vsel %vm1466_vm10, %v1465_v8, 0  ;;  %v1562_v42 = vand.u32 2139095040, %v5063_v10 }
 0x222   :  { %v4447_v22 = vpop.eup %4446  ;;  %v1243_v31 = vxor.u32 2147483648, %v4445_v44  ;;  %v1319_v49 = vsub.s32 32, %v1318_v36  ;;  %v1323_v50 = vsub.s32 4294967266, %v1318_v36  ;;  %v1412_v23 = vadd.s32 536870912, %v1411_v38 }
 0x223   :  { %v1240_v47 = vxor.u32 2147483648, %v4447_v22  ;;  %v1320_v19 = vshll.u32 %v5748_v54, %v1318_v36  ;;  %v1469_v6 = vand.u32 31, %v1467_v33  ;;  %vm1235_vm13 = vweird.f32 %v5051_v5 }
 0x224   :  { %v1244_v35 = vsel %vm1242_vm12, %v1243_v31, %v4447_v22  ;;  %v1321_v3 = vshrl.u32 %v1303_v2, %v1319_v49  ;;  %v1324_v62 = vadd.s32 127, %v1323_v50  ;;  %v5789_v30 = vshrl.u32 %v1412_v23, 30 }
 0x225   :  { %v1241_v55 = vsel %vm1239_vm9, %v4445_v44, %v1240_v47  ;;  %v1470_v46 = vsub.s32 32, %v1469_v6  ;;  %v5795_v14 = vadd.s32 3, %v1336_v51  ;;  %v5797_v52 = vshll.u32 %v1463_v37, 8 }
 0x226   :  { %v1245_v60 = vsel %vm1238_vm6, %v1241_v55, %v1244_v35  ;;  %v1322_v4 = vor.u32 %v1321_v3, %v1320_v19  ;;  %v1325_v53 = vshll.u32 %v1324_v62, 23  ;;  %v1414_v7 = vshll.u32 %v5789_v30, 30 }
 0x227   :  { %v1246_v57 = vsel %vm1235_vm13, nan, %v1245_v60  ;;  %v1559_v41 = vand.u32 2147483647, %v5063_v10  ;;  %v1468_v63 = vshrl.u32 %v1467_v33, 5  ;;  %v1473_v5 = vshrl.u32 %v7347_v25, %v1470_v46 }
 0x228   :  { %v1326_v54 = vor.u32 4788187, %v1325_v53  ;;  %3956 = vst [vmem:[#allocation2 + $0x28] sm:$0xff] %v1246_v57  ;;  %v5800_v18 = vsub.s32 %v1411_v38, %v1414_v7  ;;  %v1563_v21 = vshrl.u32 %v1562_v42, 23  ;;  %v1329_v56 = vcvt.s32.f32 %v1322_v4 }
 0x229   :  { %v1472_v8 = vshll.u32 %v7346_v43, %v1469_v6  ;;  %v1476_v39 = vshrl.u32 %v7348_v32, %v1470_v46  ;;  %v1475_v2 = vshll.u32 %v7347_v25, %v1469_v6  ;;  %v1478_v36 = vshll.u32 %v7348_v32, %v1469_v6 }
 0x22a   :  { %v1327_v45 = vand.u32 2147483647, %v1326_v54  ;;  %v1417_v44 = vsub.s32 0, %v5800_v18  ;;  %v1479_v22 = vshrl.u32 %v7349_v61, %v1470_v46  ;;  %v1407_v31 = vadd.s32 %v5755_v29, %v5763_v20 }
 0x22b   :  { %v1481_v49 = vshll.u32 %v7349_v61, %v1469_v6  ;;  %v1482_v50 = vshrl.u32 %v4574_v58, %v1470_v46  ;;  %v1474_v47 = vor.u32 %v1473_v5, %v1472_v8  ;;  %v1477_v23 = vor.u32 %v1476_v39, %v1475_v2 }
 0x22c   :  { %v1330_v38 = vmul.f32 %v1329_v56, %v1327_v45  ;;  %v4062_v51 = vmin.u32 %v1417_v44, %v5800_v18  ;;  %v1480_v37 = vor.u32 %v1479_v22, %v1478_v36  ;;  %v1484_v19 = vshll.u32 %v4574_v58, %v1469_v6 }
 0x22d   :  { %v1483_v35 = vor.u32 %v1482_v50, %v1481_v49  ;;  %v1485_v3 = vshrl.u32 %v7350_v59, %v1470_v46  ;;  %v1437_v55 = vsub.s32 4, %v5789_v30  ;;  %vm1487_vm14 = vcmp.lt.s32.totalorder %v1468_v63, 1 }
 0x22e   :  { %v1331_v33 = vxor.u32 2147483648, %v1330_v38  ;;  %v1419_v62 = vclz %v4062_v51  ;;  %v4069_v29 = vadd.s32 4294967169, %v1563_v21  ;;  %v1471_v42 = vshrl.u32 %v7346_v43, %v1470_v46 }
 0x22f   :  { %v1486_v60 = vor.u32 %v1485_v3, %v1484_v19  ;;  %vm1488_vm15 = vcmp.lt.s32.totalorder %v1468_v63, 2  ;;  %vm1489_vm0 = vcmp.lt.s32.totalorder %v1468_v63, 3  ;;  %vm1490_vm1 = vcmp.lt.s32.totalorder %v1468_v63, 4 }
 0x230   :  { %v1332_v20 = vsel %vm1249_vm7, %v1331_v33, %v1330_v38  ;;  %v4063_v53 = vadd.s32 4294967294, %v1419_v62  ;;  %v1492_v6 = vsel %vm1490_vm1, %v1480_v37, 2102212464  ;;  %v1495_v57 = vsel %vm1487_vm14, %v1474_v47, %v1477_v23 }
 0x231   :  { %v1335_v4 = vsel %vm5769_vm5, %v5054_v12, %v1332_v20  ;;  %v1496_v7 = vsel %vm1490_vm1, %v1483_v35, 920167782  ;;  %v1491_v54 = vsel %vm1487_vm14, %v1471_v42, %v1474_v47  ;;  %v1499_v24 = vsel %vm1487_vm14, %v1477_v23, %v1480_v37 }
 0x232   :  { %4448 = vcosq.f32 %v1335_v4  ;;  %vm4064_vm2 = vcmp.lt.s32.totalorder %v4063_v53, 0  ;;  %v1497_v46 = vsel %vm1489_vm0, %v1480_v37, %v1496_v7  ;;  %v1500_v45 = vsel %vm1490_vm1, %v1486_v60, 1326507024 }
 0x233   :  { %4450 = vsinq.f32 %v1335_v4  ;;  %v1422_v5 = vsel %vm4064_vm2, 0, %v4063_v53  ;;  %v1498_v21 = vsel %vm1488_vm15, %v1495_v57, %v1497_v46  ;;  %v1493_v39 = vsel %vm1489_vm0, %v1477_v23, %v1492_v6 }
 0x234   :  { %v1423_v56 = vsub.s32 32, %v1422_v5  ;;  %v1427_v8 = vsub.s32 4294967266, %v1422_v5  ;;  %v1501_v44 = vsel %vm1489_vm0, %v1483_v35, %v1500_v45  ;;  %v1424_v2 = vshll.u32 %v5800_v18, %v1422_v5 }
 0x235   :  { %v1502_v36 = vsel %vm1488_vm15, %v1499_v24, %v1501_v44  ;;  %v5833_v22 = vmul.u32.u64.low %v5797_v52, %v1498_v21  ;;  %v5834_v38 = vmul.u32.u64.high %v5797_v52, %v1498_v21, %v5833_v22  ;;  %vm1353_vm3 = vcmp.lt.s32.totalorder %v5057_v13, 0 }
 0x236   :  { %v1425_v49 = vshrl.u32 %v1407_v31, %v1423_v56  ;;  %v1428_v50 = vadd.s32 127, %v1427_v8  ;;  %v5838_v51 = vmul.u32.u64.low %v5797_v52, %v1502_v36  ;;  %v5839_v47 = vmul.u32.u64.high %v5797_v52, %v1502_v36, %v5838_v51 }
 0x237   :  { %v1494_v23 = vsel %vm1488_vm15, %v1491_v54, %v1493_v39  ;;  %v1569_v37 = vadd.s32 1, %v4069_v29  ;;  %v1438_v35 = vsel %vm1353_vm3, %v1437_v55, %v5789_v30  ;;  %v1341_v19 = vand.u32 3, %v5795_v14 }
 0x238   :  { %v1426_v33 = vor.u32 %v1425_v49, %v1424_v2  ;;  %v1429_v18 = vshll.u32 %v1428_v50, 23  ;;  %vm5849_vm4 = vcmp.le.f32.partialorder %v1351_v34, 0.7853982  ;;  %v1513_v3 = vadd.s32 1, %v5834_v38 }
 0x239   :  { %vm1570_vm5 = vcmp.gt.s32.totalorder %v1569_v37, 0  ;;  %v1510_v62 = vmul.u32 %v5797_v52, %v1494_v23  ;;  %vm1512_vm6 = vc.u32 %v5839_v47, %v5833_v22  ;;  %v1566_v30 = vand.u32 8388607, %v1559_v41 }
 0x23a   :  { %v1430_v63 = vor.u32 4788187, %v1429_v18  ;;  %v1440_v14 = vsel %vm5849_vm4, 0, %v1438_v35  ;;  %v1514_v34 = vsel %vm1512_vm6, %v1513_v3, %v5834_v38  ;;  %v1571_v55 = vsel %vm1570_vm5, %v1569_v37, 0 }
 0x23b   :  { %v1666_v29 = vand.u32 2139095040, %v5066_v9  ;;  %v1433_v42 = vcvt.s32.f32 %v1426_v33  ;;  %v1515_v60 = vadd.s32 %v1514_v34, %v1510_v62  ;;  %v1573_v4 = vand.u32 31, %v1571_v55 }
 0x23c   :  { %v1431_v20 = vand.u32 2147483647, %v1430_v63  ;;  %vm1339_vm7 = vweird.f32 %v5054_v12  ;;  %vm1342_vm8 = vcmp.lt.s32.totalorder %v1341_v19, 2  ;;  %vm1343_vm9 = vcmp.eq.s32.totalorder %v1341_v19, 0 }
 0x23d   :  { %vm1346_vm12 = vcmp.eq.s32.totalorder %v1341_v19, 2  ;;  %v1516_v6 = vadd.s32 536870912, %v1515_v60  ;;  %v1574_v57 = vsub.s32 32, %v1573_v4  ;;  %v1444_v46 = vadd.s32 3, %v1440_v14 }
 0x23e   :  { %v1434_v53 = vmul.f32 %v1433_v42, %v1431_v20  ;;  %v1567_v5 = vor.u32 8388608, %v1566_v30  ;;  %v1667_v21 = vshrl.u32 %v1666_v29, 23  ;;  %v5866_v8 = vshrl.u32 %v1571_v55, 5 }
 0x23f   :  { %v4449_v52 = vpop.eup %4448  ;;  %v5864_v56 = vshrl.u32 %v1516_v6, 30  ;;  %v1576_v44 = vshll.u32 %v7346_v43, %v1573_v4  ;;  %v1577_v2 = vshrl.u32 %v7347_v25, %v1574_v57  ;;  %v1580_v36 = vshrl.u32 %v7348_v32, %v1574_v57 }
 0x240   :  { %v4451_v7 = vpop.eup %4450  ;;  %v1347_v54 = vxor.u32 2147483648, %v4449_v52  ;;  %v1435_v45 = vxor.u32 2147483648, %v1434_v53  ;;  %v1583_v51 = vshrl.u32 %v7349_v61, %v1574_v57  ;;  %v1579_v33 = vshll.u32 %v7347_v25, %v1573_v4 }
 0x241   :  { %v1344_v24 = vxor.u32 2147483648, %v4451_v7  ;;  %v1518_v50 = vshll.u32 %v5864_v56, 30  ;;  %v1582_v18 = vshll.u32 %v7348_v32, %v1573_v4  ;;  %v1585_v63 = vshll.u32 %v7349_v61, %v1573_v4 }
 0x242   :  { %v1348_v39 = vsel %vm1346_vm12, %v1347_v54, %v4451_v7  ;;  %v1436_v49 = vsel %vm1353_vm3, %v1435_v45, %v1434_v53  ;;  %v1578_v62 = vor.u32 %v1577_v2, %v1576_v44  ;;  %v1581_v19 = vor.u32 %v1580_v36, %v1579_v33 }
 0x243   :  { %v1345_v38 = vsel %vm1343_vm9, %v4449_v52, %v1344_v24  ;;  %v1439_v37 = vsel %vm5849_vm4, %v5057_v13, %v1436_v49  ;;  %v5884_v3 = vsub.s32 %v1515_v60, %v1518_v50  ;;  %v1586_v30 = vshrl.u32 %v4574_v58, %v1574_v57 }
 0x244   :  { %v1349_v23 = vsel %vm1342_vm8, %v1345_v38, %v1348_v39  ;;  %4452 = vcosq.f32 %v1439_v37  ;;  %v1584_v14 = vor.u32 %v1583_v51, %v1582_v18  ;;  %v1588_v34 = vshll.u32 %v4574_v58, %v1573_v4 }
 0x245   :  { %v1350_v35 = vsel %vm1339_vm7, nan, %v1349_v23  ;;  %4454 = vsinq.f32 %v1439_v37  ;;  %v1521_v31 = vsub.s32 0, %v5884_v3  ;;  %v1589_v55 = vshrl.u32 %v7350_v59, %v1574_v57 }
 0x246   :  { %3957 = vst [vmem:[#allocation2 + $0x30] sm:$0xff] %v1350_v35  ;;  %v5891_v12 = vand.u32 3, %v1444_v46  ;;  %v1587_v29 = vor.u32 %v1586_v30, %v1585_v63  ;;  %v1607_v20 = vshll.u32 %v1567_v5, 8  ;;  %v1663_v42 = vand.u32 2147483647, %v5066_v9 }
 0x247   :  { %vm1457_vm11 = vcmp.lt.s32.totalorder %v5060_v0, 0  ;;  %v4066_v60 = vmin.u32 %v1521_v31, %v5884_v3  ;;  %v1590_v52 = vor.u32 %v1589_v55, %v1588_v34  ;;  %vm1591_vm10 = vcmp.lt.s32.totalorder %v5866_v8, 1 }
 0x248   :  { %vm1594_vm13 = vcmp.lt.s32.totalorder %v5866_v8, 4  ;;  %v1575_v53 = vshrl.u32 %v7346_v43, %v1574_v57  ;;  %v1599_v4 = vsel %vm1591_vm10, %v1578_v62, %v1581_v19  ;;  %v4073_v7 = vadd.s32 4294967169, %v1667_v21 }
 0x249   :  { %v1600_v6 = vsel %vm1594_vm13, %v1587_v29, 920167782  ;;  %v1523_v54 = vclz %v4066_v60  ;;  %v1541_v46 = vsub.s32 4, %v5864_v56  ;;  %vm1593_vm14 = vcmp.lt.s32.totalorder %v5866_v8, 3 }
 0x24a   :  { %v1596_v5 = vsel %vm1594_vm13, %v1584_v14, 2102212464  ;;  %vm1592_vm15 = vcmp.lt.s32.totalorder %v5866_v8, 2  ;;  %v1601_v24 = vsel %vm1593_vm14, %v1584_v14, %v1600_v6  ;;  %v1603_v45 = vsel %vm1591_vm10, %v1581_v19, %v1584_v14 }
 0x24b   :  { %v1604_v39 = vsel %vm1594_vm13, %v1590_v52, 1326507024  ;;  %v4067_v44 = vadd.s32 4294967294, %v1523_v54  ;;  %v1595_v2 = vsel %vm1591_vm10, %v1575_v53, %v1578_v62  ;;  %v1602_v36 = vsel %vm1592_vm15, %v1599_v4, %v1601_v24 }
 0x24c   :  { %v1605_v57 = vsel %vm1593_vm14, %v1587_v29, %v1604_v39  ;;  %vm1446_vm0 = vcmp.lt.s32.totalorder %v5891_v12, 2  ;;  %vm5907_vm1 = vcmp.le.f32.partialorder %v1455_v17, 0.7853982  ;;  %v1597_v38 = vsel %vm1593_vm14, %v1581_v19, %v1596_v5 }
 0x24d   :  { %v1606_v49 = vsel %vm1592_vm15, %v1603_v45, %v1605_v57  ;;  %v5913_v50 = vmul.u32.u64.low %v1607_v20, %v1602_v36  ;;  %v5914_v51 = vmul.u32.u64.high %v1607_v20, %v1602_v36, %v5913_v50  ;;  %vm1443_vm2 = vweird.f32 %v5057_v13 }
 0x24e   :  { %vm4068_vm3 = vcmp.lt.s32.totalorder %v4067_v44, 0  ;;  %v5918_v23 = vmul.u32.u64.low %v1607_v20, %v1606_v49  ;;  %v5919_v37 = vmul.u32.u64.high %v1607_v20, %v1606_v49, %v5918_v23  ;;  %v1673_v33 = vadd.s32 1, %v4073_v7 }
 0x24f   :  { %vm1447_vm4 = vcmp.eq.s32.totalorder %v5891_v12, 0  ;;  %vm1450_vm5 = vcmp.eq.s32.totalorder %v5891_v12, 2  ;;  %v1511_v17 = vadd.s32 %v5833_v22, %v5839_v47  ;;  %v1526_v18 = vsel %vm4068_vm3, 0, %v4067_v44 }
 0x250   :  { %v1527_v35 = vsub.s32 32, %v1526_v18  ;;  %v1531_v63 = vsub.s32 4294967266, %v1526_v18  ;;  %v1598_v62 = vsel %vm1592_vm15, %v1595_v2, %v1597_v38  ;;  %vm1674_vm6 = vcmp.gt.s32.totalorder %v1673_v33, 0 }
 0x251   :  { %v4453_v19 = vpop.eup %4452  ;;  %v1542_v30 = vsel %vm1457_vm11, %v1541_v46, %v5864_v56  ;;  %v1617_v31 = vadd.s32 1, %v5914_v51  ;;  %v1670_v14 = vand.u32 8388607, %v1663_v42  ;;  %v1675_v34 = vsel %vm1674_vm6, %v1673_v33, 0 }
 0x252   :  { %v4455_v55 = vpop.eup %4454  ;;  %v1451_v22 = vxor.u32 2147483648, %v4453_v19  ;;  %v1528_v47 = vshll.u32 %v5884_v3, %v1526_v18  ;;  %v1529_v29 = vshrl.u32 %v1511_v17, %v1527_v35  ;;  %v1532_v60 = vadd.s32 127, %v1531_v63 }
 0x253   :  { %v1448_v8 = vxor.u32 2147483648, %v4455_v55  ;;  %v1614_v52 = vmul.u32 %v1607_v20, %v1598_v62  ;;  %vm1616_vm7 = vc.u32 %v5919_v37, %v5913_v50  ;;  %v1677_v53 = vand.u32 31, %v1675_v34 }
 0x254   :  { %v1452_v56 = vsel %vm1450_vm5, %v1451_v22, %v4455_v55  ;;  %v1530_v4 = vor.u32 %v1529_v29, %v1528_v47  ;;  %v1533_v6 = vshll.u32 %v1532_v60, 23  ;;  %v1618_v7 = vsel %vm1616_vm7, %v1617_v31, %v5914_v51 }
 0x255   :  { %v1449_v54 = vsel %vm1447_vm4, %v4453_v19, %v1448_v8  ;;  %v1619_v46 = vadd.s32 %v1618_v7, %v1614_v52  ;;  %v1678_v3 = vsub.s32 32, %v1677_v53  ;;  %v1767_v5 = vand.u32 2147483647, %v5069_v11 }
 0x256   :  { %v1453_v20 = vsel %vm1446_vm0, %v1449_v54, %v1452_v56  ;;  %v1534_v24 = vor.u32 4788187, %v1533_v6  ;;  %v1544_v45 = vsel %vm5907_vm1, 0, %v1542_v30  ;;  %v1671_v39 = vor.u32 8388608, %v1670_v14 }
 0x257   :  { %v1454_v44 = vsel %vm1443_vm2, nan, %v1453_v20  ;;  %v1620_v2 = vadd.s32 536870912, %v1619_v46  ;;  %v1681_v36 = vshrl.u32 %v7347_v25, %v1678_v3  ;;  %v1770_v57 = vand.u32 2139095040, %v5069_v11 }
 0x258   :  { %v1535_v38 = vand.u32 2147483647, %v1534_v24  ;;  %v1537_v49 = vcvt.s32.f32 %v1530_v4  ;;  %v1684_v51 = vshrl.u32 %v7348_v32, %v1678_v3  ;;  %v1687_v12 = vshrl.u32 %v7349_v61, %v1678_v3  ;;  %3958 = vst [vmem:[#allocation2 + $0x38] sm:$0xff] %v1454_v44 }
 0x259   :  { %v1621_v23 = vshrl.u32 %v1620_v2, 30  ;;  %v1680_v33 = vshll.u32 %v7346_v43, %v1677_v53  ;;  %v1683_v17 = vshll.u32 %v7347_v25, %v1677_v53  ;;  %v1690_v13 = vshrl.u32 %v4574_v58, %v1678_v3 }
 0x25a   :  { %v1538_v18 = vmul.f32 %v1537_v49, %v1535_v38  ;;  %v1676_v35 = vshrl.u32 %v1675_v34, 5  ;;  %v1686_v63 = vshll.u32 %v7348_v32, %v1677_v53  ;;  %v1689_v62 = vshll.u32 %v7349_v61, %v1677_v53 }
 0x25b   :  { %v1622_v19 = vshll.u32 %v1621_v23, 30  ;;  %v1682_v30 = vor.u32 %v1681_v36, %v1680_v33  ;;  %v1685_v31 = vor.u32 %v1684_v51, %v1683_v17  ;;  %v1693_v14 = vshrl.u32 %v7350_v59, %v1678_v3 }
 0x25c   :  { %v1539_v55 = vxor.u32 2147483648, %v1538_v18  ;;  %v1688_v22 = vor.u32 %v1687_v12, %v1686_v63  ;;  %v1691_v47 = vor.u32 %v1690_v13, %v1689_v62  ;;  %v1692_v29 = vshll.u32 %v4574_v58, %v1677_v53 }
 0x25d   :  { %v1548_v60 = vadd.s32 3, %v1544_v45  ;;  %v5959_v8 = vsub.s32 %v1619_v46, %v1622_v19  ;;  %v1711_v52 = vshll.u32 %v1671_v39, 8  ;;  %v1771_v56 = vshrl.u32 %v1770_v57, 23 }
 0x25e   :  { %v1540_v34 = vsel %vm1457_vm11, %v1539_v55, %v1538_v18  ;;  %v1679_v4 = vshrl.u32 %v7346_v43, %v1678_v3  ;;  %v1694_v6 = vor.u32 %v1693_v14, %v1692_v29  ;;  %vm1695_vm8 = vcmp.lt.s32.totalorder %v1676_v35, 1 }
 0x25f   :  { %v1543_v7 = vsel %vm5907_vm1, %v5060_v0, %v1540_v34  ;;  %v1625_v54 = vsub.s32 0, %v5959_v8  ;;  %vm1697_vm9 = vcmp.lt.s32.totalorder %v1676_v35, 3  ;;  %vm1698_vm12 = vcmp.lt.s32.totalorder %v1676_v35, 4 }
 0x260   :  { %4456 = vcosq.f32 %v1543_v7  ;;  %v1700_v53 = vsel %vm1698_vm12, %v1688_v22, 2102212464  ;;  %v1703_v46 = vsel %vm1695_vm8, %v1682_v30, %v1685_v31  ;;  %v1704_v20 = vsel %vm1698_vm12, %v1691_v47, 920167782 }
 0x261   :  { %4458 = vsinq.f32 %v1543_v7  ;;  %v4070_v24 = vmin.u32 %v1625_v54, %v5959_v8  ;;  %vm1696_vm11 = vcmp.lt.s32.totalorder %v1676_v35, 2  ;;  %v1705_v3 = vsel %vm1697_vm9, %v1688_v22, %v1704_v20 }
 0x262   :  { %v1706_v45 = vsel %vm1696_vm11, %v1703_v46, %v1705_v3  ;;  %v1707_v21 = vsel %vm1695_vm8, %v1685_v31, %v1688_v22  ;;  %v1708_v39 = vsel %vm1698_vm12, %v1694_v6, 1326507024  ;;  %v1774_v44 = vand.u32 8388607, %v1767_v5 }
 0x263   :  { %v1627_v2 = vclz %v4070_v24  ;;  %v1645_v36 = vsub.s32 4, %v1621_v23  ;;  %v1699_v57 = vsel %vm1695_vm8, %v1679_v4, %v1682_v30  ;;  %v1701_v38 = vsel %vm1697_vm9, %v1685_v31, %v1700_v53 }
 0x264   :  { %v1709_v49 = vsel %vm1697_vm9, %v1691_v47, %v1708_v39  ;;  %v5978_v51 = vmul.u32.u64.low %v1711_v52, %v1706_v45  ;;  %v5979_v12 = vmul.u32.u64.high %v1711_v52, %v1706_v45, %v5978_v51  ;;  %v4077_v33 = vadd.s32 4294967169, %v1771_v56 }
 0x265   :  { %v1549_v17 = vand.u32 3, %v1548_v60  ;;  %v4071_v13 = vadd.s32 4294967294, %v1627_v2  ;;  %v1710_v18 = vsel %vm1696_vm11, %v1707_v21, %v1709_v49  ;;  %vm1561_vm10 = vcmp.lt.s32.totalorder %v5063_v10, 0 }
 0x266   :  { %v5984_v63 = vmul.u32.u64.low %v1711_v52, %v1710_v18  ;;  %v5985_v62 = vmul.u32.u64.high %v1711_v52, %v1710_v18, %v5984_v63  ;;  %v1777_v19 = vadd.s32 1, %v4077_v33  ;;  %vm5989_vm13 = vcmp.le.f32.partialorder %v1559_v41, 0.7853982 }
 0x267   :  { %vm4072_vm14 = vcmp.lt.s32.totalorder %v4071_v13, 0  ;;  %v1646_v31 = vsel %vm1561_vm10, %v1645_v36, %v1621_v23  ;;  %v1702_v14 = vsel %vm1696_vm11, %v1699_v57, %v1701_v38  ;;  %v1721_v22 = vadd.s32 1, %v5979_v12 }
 0x268   :  { %v1630_v55 = vsel %vm4072_vm14, 0, %v4071_v13  ;;  %v1775_v47 = vor.u32 8388608, %v1774_v44  ;;  %vm1778_vm15 = vcmp.gt.s32.totalorder %v1777_v19, 0  ;;  %vm1550_vm0 = vcmp.lt.s32.totalorder %v1549_v17, 2 }
 0x269   :  { %v1615_v29 = vadd.s32 %v5913_v50, %v5919_v37  ;;  %v1631_v60 = vsub.s32 32, %v1630_v55  ;;  %v1635_v41 = vsub.s32 4294967266, %v1630_v55  ;;  %v1779_v56 = vsel %vm1778_vm15, %v1777_v19, 0 }
 0x26a   :  { %vm1547_vm1 = vweird.f32 %v5060_v0  ;;  %v1648_v34 = vsel %vm5989_vm13, 0, %v1646_v31  ;;  %v1718_v23 = vmul.u32 %v1711_v52, %v1702_v14  ;;  %vm1720_vm2 = vc.u32 %v5985_v62, %v5978_v51 }
 0x26b   :  { %v1781_v35 = vand.u32 31, %v1779_v56  ;;  %v1632_v4 = vshll.u32 %v5959_v8, %v1630_v55  ;;  %v1633_v6 = vshrl.u32 %v1615_v29, %v1631_v60  ;;  %v1636_v7 = vadd.s32 127, %v1635_v41 }
 0x26c   :  { %v1722_v54 = vsel %vm1720_vm2, %v1721_v22, %v5979_v12  ;;  %vm1551_vm3 = vcmp.eq.s32.totalorder %v1549_v17, 0  ;;  %vm1554_vm4 = vcmp.eq.s32.totalorder %v1549_v17, 2  ;;  %v6006_v24 = vadd.s32 3, %v1648_v34 }
 0x26d   :  { %v1723_v50 = vadd.s32 %v1722_v54, %v1718_v23  ;;  %v1782_v37 = vsub.s32 32, %v1781_v35  ;;  %v4457_v53 = vpop.eup %4456  ;;  %v1634_v46 = vor.u32 %v1633_v6, %v1632_v4  ;;  %v1637_v20 = vshll.u32 %v1636_v7, 23 }
 0x26e   :  { %v6008_v52 = vshll.u32 %v1775_v47, 8  ;;  %v4459_v3 = vpop.eup %4458  ;;  %v1555_v45 = vxor.u32 2147483648, %v4457_v53  ;;  %v6010_v39 = vshrl.u32 %v1779_v56, 5  ;;  %v1874_v8 = vand.u32 2139095040, %v5072_v1 }
 0x26f   :  { %v1724_v21 = vadd.s32 536870912, %v1723_v50  ;;  %v1552_v44 = vxor.u32 2147483648, %v4459_v3  ;;  %v1638_v2 = vor.u32 4788187, %v1637_v20  ;;  %v1785_v36 = vshrl.u32 %v7347_v25, %v1782_v37 }
 0x270   :  { %v1790_v57 = vshll.u32 %v7348_v32, %v1781_v35  ;;  %v1556_v38 = vsel %vm1554_vm4, %v1555_v45, %v4459_v3  ;;  %v1641_v49 = vcvt.s32.f32 %v1634_v46  ;;  %v1791_v33 = vshrl.u32 %v7349_v61, %v1782_v37 }
 0x271   :  { %v1725_v12 = vshrl.u32 %v1724_v21, 30  ;;  %v1553_v13 = vsel %vm1551_vm3, %v4457_v53, %v1552_v44  ;;  %v1639_v18 = vand.u32 2147483647, %v1638_v2  ;;  %v1788_v63 = vshrl.u32 %v7348_v32, %v1782_v37 }
 0x272   :  { %v1794_v19 = vshrl.u32 %v4574_v58, %v1782_v37  ;;  %v1557_v31 = vsel %vm1550_vm0, %v1553_v13, %v1556_v38  ;;  %vm1665_vm5 = vcmp.lt.s32.totalorder %v5066_v9, 0  ;;  %v1784_v55 = vshll.u32 %v7346_v43, %v1781_v35 }
 0x273   :  { %v1726_v14 = vshll.u32 %v1725_v12, 30  ;;  %v1787_v22 = vshll.u32 %v7347_v25, %v1781_v35  ;;  %v1558_v47 = vsel %vm1547_vm1, nan, %v1557_v31  ;;  %v1642_v29 = vmul.f32 %v1641_v49, %v1639_v18 }
 0x274   :  { %v1792_v60 = vor.u32 %v1791_v33, %v1790_v57  ;;  %v1793_v41 = vshll.u32 %v7349_v61, %v1781_v35  ;;  %v1786_v34 = vor.u32 %v1785_v36, %v1784_v55  ;;  %v1797_v17 = vshrl.u32 %v7350_v59, %v1782_v37  ;;  %3959 = vst [vmem:[#allocation2 + $0x40] sm:$0xff] %v1558_v47 }
 0x275   :  { %v6027_v56 = vsub.s32 %v1723_v50, %v1726_v14  ;;  %v1871_v23 = vand.u32 2147483647, %v5072_v1  ;;  %v1643_v4 = vxor.u32 2147483648, %v1642_v29  ;;  %v1789_v6 = vor.u32 %v1788_v63, %v1787_v22 }
 0x276   :  { %v1795_v7 = vor.u32 %v1794_v19, %v1793_v41  ;;  %v1796_v54 = vshll.u32 %v4574_v58, %v1781_v35  ;;  %v1783_v53 = vshrl.u32 %v7346_v43, %v1782_v37  ;;  %vm1802_vm6 = vcmp.lt.s32.totalorder %v6010_v39, 4 }
 0x277   :  { %v1729_v0 = vsub.s32 0, %v6027_v56  ;;  %v1875_v46 = vshrl.u32 %v1874_v8, 23  ;;  %v1644_v50 = vsel %vm1561_vm10, %v1643_v4, %v1642_v29  ;;  %v1749_v20 = vsub.s32 4, %v1725_v12 }
 0x278   :  { %v1798_v3 = vor.u32 %v1797_v17, %v1796_v54  ;;  %v1804_v45 = vsel %vm1802_vm6, %v1792_v60, 2102212464  ;;  %v1647_v21 = vsel %vm5989_vm13, %v5063_v10, %v1644_v50  ;;  %vm1799_vm7 = vcmp.lt.s32.totalorder %v6010_v39, 1 }
 0x279   :  { %v4074_v35 = vmin.u32 %v1729_v0, %v6027_v56  ;;  %vm1801_vm8 = vcmp.lt.s32.totalorder %v6010_v39, 3  ;;  %4460 = vcosq.f32 %v1647_v21  ;;  %v1803_v37 = vsel %vm1799_vm7, %v1783_v53, %v1786_v34 }
 0x27a   :  { %v1807_v8 = vsel %vm1799_vm7, %v1786_v34, %v1789_v6  ;;  %v1808_v44 = vsel %vm1802_vm6, %v1795_v7, 920167782  ;;  %4462 = vsinq.f32 %v1647_v21  ;;  %v1805_v36 = vsel %vm1801_vm8, %v1789_v6, %v1804_v45 }
 0x27b   :  { %v1731_v2 = vclz %v4074_v35  ;;  %v1811_v57 = vsel %vm1799_vm7, %v1789_v6, %v1792_v60  ;;  %v1750_v30 = vsel %vm1665_vm5, %v1749_v20, %v1725_v12  ;;  %vm1800_vm9 = vcmp.lt.s32.totalorder %v6010_v39, 2 }
 0x27c   :  { %v1809_v38 = vsel %vm1801_vm8, %v1792_v60, %v1808_v44  ;;  %v1812_v49 = vsel %vm1802_vm6, %v1798_v3, 1326507024  ;;  %v4081_v63 = vadd.s32 4294967169, %v1875_v46  ;;  %v1806_v19 = vsel %vm1800_vm9, %v1803_v37, %v1805_v36 }
 0x27d   :  { %v4075_v33 = vadd.s32 4294967294, %v1731_v2  ;;  %v1810_v13 = vsel %vm1800_vm9, %v1807_v8, %v1809_v38  ;;  %v1813_v18 = vsel %vm1801_vm8, %v1795_v7, %v1812_v49  ;;  %v1653_v39 = vand.u32 3, %v6006_v24 }
 0x27e   :  { %v1814_v31 = vsel %vm1800_vm9, %v1811_v57, %v1813_v18  ;;  %v6053_v14 = vmul.u32.u64.low %v6008_v52, %v1810_v13  ;;  %v6054_v55 = vmul.u32.u64.high %v6008_v52, %v1810_v13, %v6053_v14  ;;  %v1881_v47 = vadd.s32 1, %v4081_v63 }
 0x27f   :  { %vm4076_vm12 = vcmp.lt.s32.totalorder %v4075_v33, 0  ;;  %v6058_v12 = vmul.u32.u64.low %v6008_v52, %v1814_v31  ;;  %v6059_v22 = vmul.u32.u64.high %v6008_v52, %v1814_v31, %v6058_v12  ;;  %vm6064_vm11 = vcmp.le.f32.partialorder %v1663_v42, 0.7853982 }
 0x280   :  { %v1734_v60 = vsel %vm4076_vm12, 0, %v4075_v33  ;;  %v1878_v41 = vand.u32 8388607, %v1871_v23  ;;  %v1719_v34 = vadd.s32 %v5978_v51, %v5985_v62  ;;  %vm1882_vm10 = vcmp.gt.s32.totalorder %v1881_v47, 0 }
 0x281   :  { %v1735_v17 = vsub.s32 32, %v1734_v60  ;;  %v1739_v4 = vsub.s32 4294967266, %v1734_v60  ;;  %v1752_v6 = vsel %vm6064_vm11, 0, %v1750_v30  ;;  %v1822_v24 = vmul.u32 %v6008_v52, %v1806_v19 }
 0x282   :  { %v1825_v42 = vadd.s32 1, %v6054_v55  ;;  %v1883_v7 = vsel %vm1882_vm10, %v1881_v47, 0  ;;  %v1736_v54 = vshll.u32 %v6027_v56, %v1734_v60  ;;  %vm1824_vm13 = vc.u32 %v6059_v22, %v6053_v14 }
 0x283   :  { %v1737_v0 = vshrl.u32 %v1719_v34, %v1735_v17  ;;  %v1740_v53 = vadd.s32 127, %v1739_v4  ;;  %vm1651_vm14 = vweird.f32 %v5063_v10  ;;  %v1885_v62 = vand.u32 31, %v1883_v7 }
 0x284   :  { %v1826_v51 = vsel %vm1824_vm13, %v1825_v42, %v6054_v55  ;;  %vm1654_vm15 = vcmp.lt.s32.totalorder %v1653_v39, 2  ;;  %vm1655_vm0 = vcmp.eq.s32.totalorder %v1653_v39, 0  ;;  %vm1658_vm1 = vcmp.eq.s32.totalorder %v1653_v39, 2 }
 0x285   :  { %v1738_v46 = vor.u32 %v1737_v0, %v1736_v54  ;;  %v1741_v50 = vshll.u32 %v1740_v53, 23  ;;  %v1827_v20 = vadd.s32 %v1826_v51, %v1822_v24  ;;  %v6081_v52 = vadd.s32 3, %v1752_v6 }
 0x286   :  { %v1886_v3 = vsub.s32 32, %v1885_v62  ;;  %v4461_v56 = vpop.eup %4460  ;;  %v1879_v35 = vor.u32 8388608, %v1878_v41  ;;  %v1978_v37 = vand.u32 2139095040, %v5075_v15  ;;  %v1884_v36 = vshrl.u32 %v1883_v7, 5 }
 0x287   :  { %v1742_v45 = vor.u32 4788187, %v1741_v50  ;;  %v1828_v21 = vadd.s32 536870912, %v1827_v20  ;;  %v4463_v8 = vpop.eup %4462  ;;  %v1659_v44 = vxor.u32 2147483648, %v4461_v56  ;;  %v1745_v2 = vcvt.s32.f32 %v1738_v46 }
 0x288   :  { %v1889_v57 = vshrl.u32 %v7347_v25, %v1886_v3  ;;  %v1656_v30 = vxor.u32 2147483648, %v4463_v8  ;;  %v1895_v33 = vshrl.u32 %v7349_v61, %v1886_v3  ;;  %v1888_v18 = vshll.u32 %v7346_v43, %v1885_v62 }
 0x289   :  { %v1743_v38 = vand.u32 2147483647, %v1742_v45  ;;  %v6085_v49 = vshrl.u32 %v1828_v21, 30  ;;  %v1660_v13 = vsel %vm1658_vm1, %v1659_v44, %v4463_v8  ;;  %v1892_v63 = vshrl.u32 %v7348_v32, %v1886_v3 }
 0x28a   :  { %v1898_v19 = vshrl.u32 %v4574_v58, %v1886_v3  ;;  %v1657_v31 = vsel %vm1655_vm0, %v4461_v56, %v1656_v30  ;;  %v1894_v47 = vshll.u32 %v7348_v32, %v1885_v62  ;;  %v1890_v41 = vor.u32 %v1889_v57, %v1888_v18 }
 0x28b   :  { %v1746_v55 = vmul.f32 %v1745_v2, %v1743_v38  ;;  %v1830_v12 = vshll.u32 %v6085_v49, 30  ;;  %v1661_v60 = vsel %vm1654_vm15, %v1657_v31, %v1660_v13  ;;  %v1891_v34 = vshll.u32 %v7347_v25, %v1885_v62 }
 0x28c   :  { %v1897_v17 = vshll.u32 %v7349_v61, %v1885_v62  ;;  %v1662_v4 = vsel %vm1651_vm14, nan, %v1661_v60  ;;  %v1896_v42 = vor.u32 %v1895_v33, %v1894_v47  ;;  %v1900_v0 = vshll.u32 %v4574_v58, %v1885_v62 }
 0x28d   :  { %v1747_v6 = vxor.u32 2147483648, %v1746_v55  ;;  %v6100_v24 = vsub.s32 %v1827_v20, %v1830_v12  ;;  %v1893_v7 = vor.u32 %v1892_v63, %v1891_v34  ;;  %v1901_v53 = vshrl.u32 %v7350_v59, %v1886_v3  ;;  %3960 = vst [vmem:[#allocation2 + $0x48] sm:$0xff] %v1662_v4 }
 0x28e   :  { %v1899_v54 = vor.u32 %v1898_v19, %v1897_v17  ;;  %v1919_v46 = vshll.u32 %v1879_v35, 8  ;;  %v1975_v10 = vand.u32 2147483647, %v5075_v15  ;;  %v1887_v20 = vshrl.u32 %v7346_v43, %v1886_v3 }
 0x28f   :  { %v1748_v39 = vsel %vm1665_vm5, %v1747_v6, %v1746_v55  ;;  %v1833_v51 = vsub.s32 0, %v6100_v24  ;;  %v1902_v56 = vor.u32 %v1901_v53, %v1900_v0  ;;  %vm1906_vm2 = vcmp.lt.s32.totalorder %v1884_v36, 4 }
 0x290   :  { %v1751_v50 = vsel %vm6064_vm11, %v5066_v9, %v1748_v39  ;;  %vm1903_vm3 = vcmp.lt.s32.totalorder %v1884_v36, 1  ;;  %v1908_v45 = vsel %vm1906_vm2, %v1896_v42, 2102212464  ;;  %v1912_v35 = vsel %vm1906_vm2, %v1899_v54, 920167782 }
 0x291   :  { %4464 = vcosq.f32 %v1751_v50  ;;  %v4078_v62 = vmin.u32 %v1833_v51, %v6100_v24  ;;  %v1911_v21 = vsel %vm1903_vm3, %v1890_v41, %v1893_v7  ;;  %v1979_v8 = vshrl.u32 %v1978_v37, 23 }
 0x292   :  { %4466 = vsinq.f32 %v1751_v50  ;;  %vm1904_vm4 = vcmp.lt.s32.totalorder %v1884_v36, 2  ;;  %vm1905_vm5 = vcmp.lt.s32.totalorder %v1884_v36, 3  ;;  %v1907_v29 = vsel %vm1903_vm3, %v1887_v20, %v1890_v41 }
 0x293   :  { %v1835_v44 = vclz %v4078_v62  ;;  %v1909_v2 = vsel %vm1905_vm5, %v1893_v7, %v1908_v45  ;;  %v1913_v57 = vsel %vm1905_vm5, %v1896_v42, %v1912_v35  ;;  %v1915_v3 = vsel %vm1903_vm3, %v1893_v7, %v1896_v42 }
 0x294   :  { %v1916_v30 = vsel %vm1906_vm2, %v1902_v56, 1326507024  ;;  %v1853_v33 = vsub.s32 4, %v6085_v49  ;;  %v1914_v13 = vsel %vm1904_vm4, %v1911_v21, %v1913_v57  ;;  %v4085_v37 = vadd.s32 4294967169, %v1979_v8 }
 0x295   :  { %v4079_v38 = vadd.s32 4294967294, %v1835_v44  ;;  %v1917_v18 = vsel %vm1905_vm5, %v1899_v54, %v1916_v30  ;;  %v6117_v19 = vmul.u32.u64.low %v1919_v46, %v1914_v13  ;;  %v6118_v31 = vmul.u32.u64.high %v1919_v46, %v1914_v13, %v6117_v19 }
 0x296   :  { %v1918_v63 = vsel %vm1904_vm4, %v1915_v3, %v1917_v18  ;;  %v1910_v55 = vsel %vm1904_vm4, %v1907_v29, %v1909_v2  ;;  %v1757_v60 = vand.u32 3, %v6081_v52  ;;  %vm1769_vm7 = vcmp.lt.s32.totalorder %v5069_v11, 0 }
 0x297   :  { %vm4080_vm6 = vcmp.lt.s32.totalorder %v4079_v38, 0  ;;  %v6121_v12 = vmul.u32.u64.low %v1919_v46, %v1918_v63  ;;  %v6122_v47 = vmul.u32.u64.high %v1919_v46, %v1918_v63, %v6121_v12  ;;  %v1985_v41 = vadd.s32 1, %v4085_v37 }
 0x298   :  { %v1838_v36 = vsel %vm4080_vm6, 0, %v4079_v38  ;;  %v1823_v34 = vadd.s32 %v6053_v14, %v6059_v22  ;;  %v1982_v6 = vand.u32 8388607, %v1975_v10  ;;  %v1854_v42 = vsel %vm1769_vm7, %v1853_v33, %v6085_v49 }
 0x299   :  { %v1839_v17 = vsub.s32 32, %v1838_v36  ;;  %v1843_v4 = vsub.s32 4294967266, %v1838_v36  ;;  %v1926_v7 = vmul.u32 %v1919_v46, %v1910_v55  ;;  %v1929_v54 = vadd.s32 1, %v6118_v31 }
 0x29a   :  { %vm1986_vm8 = vcmp.gt.s32.totalorder %v1985_v41, 0  ;;  %v1840_v52 = vshll.u32 %v6100_v24, %v1838_v36  ;;  %vm1928_vm9 = vc.u32 %v6122_v47, %v6117_v19  ;;  %vm6139_vm12 = vcmp.le.f32.partialorder %v1767_v5, 0.7853982 }
 0x29b   :  { %v1841_v0 = vshrl.u32 %v1823_v34, %v1839_v17  ;;  %v1844_v53 = vadd.s32 127, %v1843_v4  ;;  %v1930_v22 = vsel %vm1928_vm9, %v1929_v54, %v6118_v31  ;;  %v1987_v49 = vsel %vm1986_vm8, %v1985_v41, 0 }
 0x29c   :  { %v1856_v46 = vsel %vm6139_vm12, 0, %v1854_v42  ;;  %v1931_v24 = vadd.s32 %v1930_v22, %v1926_v7  ;;  %vm1755_vm11 = vweird.f32 %v5066_v9  ;;  %vm1758_vm10 = vcmp.lt.s32.totalorder %v1757_v60, 2 }
 0x29d   :  { %v1842_v39 = vor.u32 %v1841_v0, %v1840_v52  ;;  %v1845_v51 = vshll.u32 %v1844_v53, 23  ;;  %v1983_v20 = vor.u32 8388608, %v1982_v6  ;;  %v1989_v56 = vand.u32 31, %v1987_v49 }
 0x29e   :  { %v4465_v50 = vpop.eup %4464  ;;  %vm1759_vm13 = vcmp.eq.s32.totalorder %v1757_v60, 0  ;;  %v1932_v21 = vadd.s32 536870912, %v1931_v24  ;;  %vm1762_vm14 = vcmp.eq.s32.totalorder %v1757_v60, 2  ;;  %v6147_v8 = vadd.s32 3, %v1856_v46 }
 0x29f   :  { %v4467_v62 = vpop.eup %4466  ;;  %v1763_v5 = vxor.u32 2147483648, %v4465_v50  ;;  %v1846_v45 = vor.u32 4788187, %v1845_v51  ;;  %v1990_v44 = vsub.s32 32, %v1989_v56  ;;  %v1849_v57 = vcvt.s32.f32 %v1842_v39 }
 0x2a0   :  { %v1760_v35 = vxor.u32 2147483648, %v4467_v62  ;;  %v6149_v3 = vshrl.u32 %v1932_v21, 30  ;;  %v6152_v33 = vshll.u32 %v1983_v20, 8  ;;  %v2079_v13 = vand.u32 2147483647, %v5078_v16 }
 0x2a1   :  { %v1764_v29 = vsel %vm1762_vm14, %v1763_v5, %v4467_v62  ;;  %v1847_v2 = vand.u32 2147483647, %v1846_v45  ;;  %v1993_v38 = vshrl.u32 %v7347_v25, %v1990_v44  ;;  %v2082_v37 = vand.u32 2139095040, %v5078_v16 }
 0x2a2   :  { %v1761_v30 = vsel %vm1759_vm13, %v4465_v50, %v1760_v35  ;;  %v1934_v31 = vshll.u32 %v6149_v3, 30  ;;  %v1992_v12 = vshll.u32 %v7346_v43, %v1989_v56  ;;  %v1996_v36 = vshrl.u32 %v7348_v32, %v1990_v44 }
 0x2a3   :  { %v1765_v18 = vsel %vm1758_vm10, %v1761_v30, %v1764_v29  ;;  %v1850_v63 = vmul.f32 %v1849_v57, %v1847_v2  ;;  %v1999_v41 = vshrl.u32 %v7349_v61, %v1990_v44  ;;  %v1988_v4 = vshrl.u32 %v1987_v49, 5 }
 0x2a4   :  { %v1766_v55 = vsel %vm1755_vm11, nan, %v1765_v18  ;;  %v6163_v17 = vsub.s32 %v1931_v24, %v1934_v31  ;;  %v1995_v60 = vshll.u32 %v7347_v25, %v1989_v56  ;;  %v1994_v6 = vor.u32 %v1993_v38, %v1992_v12 }
 0x2a5   :  { %v1851_v34 = vxor.u32 2147483648, %v1850_v63  ;;  %3961 = vst [vmem:[#allocation2 + $0x50] sm:$0xff] %v1766_v55  ;;  %v1998_v42 = vshll.u32 %v7348_v32, %v1989_v56  ;;  %v2001_v7 = vshll.u32 %v7349_v61, %v1989_v56  ;;  %v2002_v9 = vshrl.u32 %v4574_v58, %v1990_v44 }
 0x2a6   :  { %v1937_v52 = vsub.s32 0, %v6163_v17  ;;  %v2004_v0 = vshll.u32 %v4574_v58, %v1989_v56  ;;  %v2005_v53 = vshrl.u32 %v7350_v59, %v1990_v44  ;;  %v1997_v49 = vor.u32 %v1996_v36, %v1995_v60 }
 0x2a7   :  { %v1852_v54 = vsel %vm1769_vm7, %v1851_v34, %v1850_v63  ;;  %v2000_v39 = vor.u32 %v1999_v41, %v1998_v42  ;;  %v2003_v51 = vor.u32 %v2002_v9, %v2001_v7  ;;  %vm1873_vm15 = vcmp.lt.s32.totalorder %v5072_v1, 0 }
 0x2a8   :  { %v1855_v22 = vsel %vm6139_vm12, %v5069_v11, %v1852_v54  ;;  %v4082_v46 = vmin.u32 %v1937_v52, %v6163_v17  ;;  %v2006_v24 = vor.u32 %v2005_v53, %v2004_v0  ;;  %v2083_v50 = vshrl.u32 %v2082_v37, 23 }
 0x2a9   :  { %4468 = vcosq.f32 %v1855_v22  ;;  %v1957_v20 = vsub.s32 4, %v6149_v3  ;;  %v1991_v56 = vshrl.u32 %v7346_v43, %v1990_v44  ;;  %vm2007_vm0 = vcmp.lt.s32.totalorder %v1988_v4, 1 }
 0x2aa   :  { %4470 = vsinq.f32 %v1855_v22  ;;  %v1939_v62 = vclz %v4082_v46  ;;  %vm2008_vm1 = vcmp.lt.s32.totalorder %v1988_v4, 2  ;;  %vm2009_vm2 = vcmp.lt.s32.totalorder %v1988_v4, 3 }
 0x2ab   :  { %vm2010_vm3 = vcmp.lt.s32.totalorder %v1988_v4, 4  ;;  %v2015_v5 = vsel %vm2007_vm0, %v1994_v6, %v1997_v49  ;;  %v2019_v21 = vsel %vm2007_vm0, %v1997_v49, %v2000_v39  ;;  %v2011_v29 = vsel %vm2007_vm0, %v1991_v56, %v1994_v6 }
 0x2ac   :  { %v2012_v14 = vsel %vm2010_vm3, %v2000_v39, 2102212464  ;;  %v2016_v45 = vsel %vm2010_vm3, %v2003_v51, 920167782  ;;  %v4083_v35 = vadd.s32 4294967294, %v1939_v62  ;;  %v4089_v63 = vadd.s32 4294967169, %v2083_v50 }
 0x2ad   :  { %v2017_v2 = vsel %vm2009_vm2, %v2000_v39, %v2016_v45  ;;  %v2020_v57 = vsel %vm2010_vm3, %v2006_v24, 1326507024  ;;  %v2013_v30 = vsel %vm2009_vm2, %v1997_v49, %v2012_v14  ;;  %v1927_v55 = vadd.s32 %v6117_v19, %v6122_v47 }
 0x2ae   :  { %v2018_v38 = vsel %vm2008_vm1, %v2015_v5, %v2017_v2  ;;  %v2021_v18 = vsel %vm2009_vm2, %v2003_v51, %v2020_v57  ;;  %vm4084_vm4 = vcmp.lt.s32.totalorder %v4083_v35, 0  ;;  %v2014_v6 = vsel %vm2008_vm1, %v2011_v29, %v2013_v30 }
 0x2af   :  { %v2022_v44 = vsel %vm2008_vm1, %v2019_v21, %v2021_v18  ;;  %v6184_v31 = vmul.u32.u64.low %v6152_v33, %v2018_v38  ;;  %v6185_v37 = vmul.u32.u64.high %v6152_v33, %v2018_v38, %v6184_v31  ;;  %v1942_v12 = vsel %vm4084_vm4, 0, %v4083_v35 }
 0x2b0   :  { %v6191_v36 = vmul.u32.u64.low %v6152_v33, %v2022_v44  ;;  %v6192_v41 = vmul.u32.u64.high %v6152_v33, %v2022_v44, %v6191_v36  ;;  %v1943_v34 = vsub.s32 32, %v1942_v12  ;;  %v1947_v60 = vsub.s32 4294967266, %v1942_v12 }
 0x2b1   :  { %v2089_v42 = vadd.s32 1, %v4089_v63  ;;  %v1861_v7 = vand.u32 3, %v6147_v8  ;;  %v1944_v9 = vshll.u32 %v6163_v17, %v1942_v12  ;;  %v1958_v54 = vsel %vm1873_vm15, %v1957_v20, %v6149_v3 }
 0x2b2   :  { %vm1859_vm5 = vweird.f32 %v5069_v11  ;;  %v1945_v19 = vshrl.u32 %v1927_v55, %v1943_v34  ;;  %v1948_v47 = vadd.s32 127, %v1947_v60  ;;  %v2033_v52 = vadd.s32 1, %v6185_v37 }
 0x2b3   :  { %vm2090_vm6 = vcmp.gt.s32.totalorder %v2089_v42, 0  ;;  %v2030_v0 = vmul.u32 %v6152_v33, %v2014_v6  ;;  %vm2032_vm7 = vc.u32 %v6192_v41, %v6184_v31  ;;  %v2086_v8 = vand.u32 8388607, %v2079_v13 }
 0x2b4   :  { %v2091_v17 = vsel %vm2090_vm6, %v2089_v42, 0  ;;  %vm6209_vm8 = vcmp.le.f32.partialorder %v1871_v23, 0.7853982  ;;  %v1946_v4 = vor.u32 %v1945_v19, %v1944_v9  ;;  %v1949_v53 = vshll.u32 %v1948_v47, 23 }
 0x2b5   :  { %v2034_v22 = vsel %vm2032_vm7, %v2033_v52, %v6185_v37  ;;  %vm1862_vm9 = vcmp.lt.s32.totalorder %v1861_v7, 2  ;;  %v1960_v33 = vsel %vm6209_vm8, 0, %v1958_v54  ;;  %v2093_v51 = vand.u32 31, %v2091_v17 }
 0x2b6   :  { %v4469_v49 = vpop.eup %4468  ;;  %v2035_v39 = vadd.s32 %v2034_v22, %v2030_v0  ;;  %vm1863_vm12 = vcmp.eq.s32.totalorder %v1861_v7, 0  ;;  %vm1866_vm11 = vcmp.eq.s32.totalorder %v1861_v7, 2  ;;  %v1950_v50 = vor.u32 4788187, %v1949_v53 }
 0x2b7   :  { %v4471_v46 = vpop.eup %4470  ;;  %v1867_v24 = vxor.u32 2147483648, %v4469_v49  ;;  %v2087_v56 = vor.u32 8388608, %v2086_v8  ;;  %v2094_v62 = vsub.s32 32, %v2093_v51  ;;  %v1953_v45 = vcvt.s32.f32 %v1946_v4 }
 0x2b8   :  { %v1864_v23 = vxor.u32 2147483648, %v4471_v46  ;;  %v2036_v20 = vadd.s32 536870912, %v2035_v39  ;;  %v1951_v5 = vand.u32 2147483647, %v1950_v50  ;;  %v1964_v21 = vadd.s32 3, %v1960_v33 }
 0x2b9   :  { %v1868_v14 = vsel %vm1866_vm11, %v1867_v24, %v4471_v46  ;;  %v2096_v2 = vshll.u32 %v7346_v43, %v2093_v51  ;;  %v2097_v57 = vshrl.u32 %v7347_v25, %v2094_v62  ;;  %v2100_v18 = vshrl.u32 %v7348_v32, %v2094_v62 }
 0x2ba   :  { %v1865_v35 = vsel %vm1863_vm12, %v4469_v49, %v1864_v23  ;;  %v6216_v29 = vshrl.u32 %v2036_v20, 30  ;;  %v1954_v38 = vmul.f32 %v1953_v45, %v1951_v5  ;;  %v2103_v63 = vshrl.u32 %v7349_v61, %v2094_v62 }
 0x2bb   :  { %v1869_v30 = vsel %vm1862_vm9, %v1865_v35, %v1868_v14  ;;  %v2099_v55 = vshll.u32 %v7347_v25, %v2093_v51  ;;  %v2186_v12 = vand.u32 2139095040, %v5081_v40  ;;  %v2092_v34 = vshrl.u32 %v2091_v17, 5 }
 0x2bc   :  { %v1870_v44 = vsel %vm1859_vm5, nan, %v1869_v30  ;;  %v2038_v37 = vshll.u32 %v6216_v29, 30  ;;  %v1955_v36 = vxor.u32 2147483648, %v1954_v38  ;;  %v2098_v60 = vor.u32 %v2097_v57, %v2096_v2 }
 0x2bd   :  { %v2102_v6 = vshll.u32 %v7348_v32, %v2093_v51  ;;  %3962 = vst [vmem:[#allocation2 + $0x58] sm:$0xff] %v1870_v44  ;;  %v2101_v7 = vor.u32 %v2100_v18, %v2099_v55  ;;  %v2105_v9 = vshll.u32 %v7349_v61, %v2093_v51  ;;  %v2106_v11 = vshrl.u32 %v4574_v58, %v2094_v62 }
 0x2be   :  { %v6229_v42 = vsub.s32 %v2035_v39, %v2038_v37  ;;  %v1956_v54 = vsel %vm1873_vm15, %v1955_v36, %v1954_v38  ;;  %v2108_v47 = vshll.u32 %v4574_v58, %v2093_v51  ;;  %v2109_v52 = vshrl.u32 %v7350_v59, %v2094_v62 }
 0x2bf   :  { %v2104_v19 = vor.u32 %v2103_v63, %v2102_v6  ;;  %v1959_v0 = vsel %vm6209_vm8, %v5072_v1, %v1956_v54  ;;  %v2107_v17 = vor.u32 %v2106_v11, %v2105_v9  ;;  %v2127_v4 = vshll.u32 %v2087_v56, 8 }
 0x2c0   :  { %v2041_v8 = vsub.s32 0, %v6229_v42  ;;  %4472 = vcosq.f32 %v1959_v0  ;;  %v2110_v53 = vor.u32 %v2109_v52, %v2108_v47  ;;  %vm2111_vm10 = vcmp.lt.s32.totalorder %v2092_v34, 1 }
 0x2c1   :  { %v2187_v22 = vshrl.u32 %v2186_v12, 23  ;;  %4474 = vsinq.f32 %v1959_v0  ;;  %v2095_v33 = vshrl.u32 %v7346_v43, %v2094_v62  ;;  %vm2114_vm13 = vcmp.lt.s32.totalorder %v2092_v34, 4 }
 0x2c2   :  { %v4086_v49 = vmin.u32 %v2041_v8, %v6229_v42  ;;  %vm2112_vm14 = vcmp.lt.s32.totalorder %v2092_v34, 2  ;;  %v2116_v39 = vsel %vm2114_vm13, %v2104_v19, 2102212464  ;;  %v2119_v51 = vsel %vm2111_vm10, %v2098_v60, %v2101_v7 }
 0x2c3   :  { %v2120_v46 = vsel %vm2114_vm13, %v2107_v17, 920167782  ;;  %vm2113_vm15 = vcmp.lt.s32.totalorder %v2092_v34, 3  ;;  %v2115_v24 = vsel %vm2111_vm10, %v2095_v33, %v2098_v60  ;;  %v2123_v50 = vsel %vm2111_vm10, %v2101_v7, %v2104_v19 }
 0x2c4   :  { %v2043_v3 = vclz %v4086_v49  ;;  %v2117_v23 = vsel %vm2113_vm15, %v2101_v7, %v2116_v39  ;;  %v2121_v20 = vsel %vm2113_vm15, %v2104_v19, %v2120_v46  ;;  %v2124_v56 = vsel %vm2114_vm13, %v2110_v53, 1326507024 }
 0x2c5   :  { %v4093_v14 = vadd.s32 4294967169, %v2187_v22  ;;  %v2122_v45 = vsel %vm2112_vm14, %v2119_v51, %v2121_v20  ;;  %v2125_v35 = vsel %vm2113_vm15, %v2107_v17, %v2124_v56  ;;  %v2061_v2 = vsub.s32 4, %v6216_v29 }
 0x2c6   :  { %v4087_v5 = vadd.s32 4294967294, %v2043_v3  ;;  %v2126_v62 = vsel %vm2112_vm14, %v2123_v50, %v2125_v35  ;;  %v6246_v57 = vmul.u32.u64.low %v2127_v4, %v2122_v45  ;;  %v6247_v30 = vmul.u32.u64.high %v2127_v4, %v2122_v45, %v6246_v57 }
 0x2c7   :  { %v2118_v38 = vsel %vm2112_vm14, %v2115_v24, %v2117_v23  ;;  %v6251_v18 = vmul.u32.u64.low %v2127_v4, %v2126_v62  ;;  %v6252_v63 = vmul.u32.u64.high %v2127_v4, %v2126_v62, %v6251_v18  ;;  %v1965_v44 = vand.u32 3, %v1964_v21 }
 0x2c8   :  { %vm4088_vm0 = vcmp.lt.s32.totalorder %v4087_v5, 0  ;;  %vm1977_vm1 = vcmp.lt.s32.totalorder %v5075_v15, 0  ;;  %v2193_v55 = vadd.s32 1, %v4093_v14  ;;  %v2031_v12 = vadd.s32 %v6184_v31, %v6192_v41 }
 0x2c9   :  { %v2046_v37 = vsel %vm4088_vm0, 0, %v4087_v5  ;;  %v2183_v6 = vand.u32 2147483647, %v5081_v40  ;;  %v2062_v34 = vsel %vm1977_vm1, %v2061_v2, %v6216_v29  ;;  %v2134_v7 = vmul.u32 %v2127_v4, %v2118_v38 }
 0x2ca   :  { %v2047_v36 = vsub.s32 32, %v2046_v37  ;;  %v2051_v60 = vsub.s32 4294967266, %v2046_v37  ;;  %v2137_v9 = vadd.s32 1, %v6247_v30  ;;  %vm2194_vm2 = vcmp.gt.s32.totalorder %v2193_v55, 0 }
 0x2cb   :  { %v2048_v21 = vshll.u32 %v6229_v42, %v2046_v37  ;;  %vm2136_vm3 = vc.u32 %v6252_v63, %v6246_v57  ;;  %vm1963_vm4 = vweird.f32 %v5072_v1  ;;  %vm6268_vm5 = vcmp.le.f32.partialorder %v1975_v10, 0.7853982 }
 0x2cc   :  { %v2049_v11 = vshrl.u32 %v2031_v12, %v2047_v36  ;;  %v2052_v54 = vadd.s32 127, %v2051_v60  ;;  %v2138_v41 = vsel %vm2136_vm3, %v2137_v9, %v6247_v30  ;;  %v2195_v29 = vsel %vm2194_vm2, %v2193_v55, 0 }
 0x2cd   :  { %v4473_v19 = vpop.eup %4472  ;;  %v2064_v42 = vsel %vm6268_vm5, 0, %v2062_v34  ;;  %v2139_v0 = vadd.s32 %v2138_v41, %v2134_v7  ;;  %vm1966_vm6 = vcmp.lt.s32.totalorder %v1965_v44, 2  ;;  %v2190_v4 = vand.u32 8388607, %v2183_v6 }
 0x2ce   :  { %v2050_v47 = vor.u32 %v2049_v11, %v2048_v21  ;;  %v2053_v52 = vshll.u32 %v2052_v54, 23  ;;  %v4475_v8 = vpop.eup %4474  ;;  %v1971_v17 = vxor.u32 2147483648, %v4473_v19  ;;  %v2197_v10 = vand.u32 31, %v2195_v29 }
 0x2cf   :  { %v1968_v53 = vxor.u32 2147483648, %v4475_v8  ;;  %vm1970_vm7 = vcmp.eq.s32.totalorder %v1965_v44, 2  ;;  %v2140_v49 = vadd.s32 536870912, %v2139_v0  ;;  %vm1967_vm8 = vcmp.eq.s32.totalorder %v1965_v44, 0 }
 0x2d0   :  { %v2054_v22 = vor.u32 4788187, %v2053_v52  ;;  %v1972_v33 = vsel %vm1970_vm7, %v1971_v17, %v4475_v8  ;;  %v6277_v39 = vadd.s32 3, %v2064_v42  ;;  %v2198_v51 = vsub.s32 32, %v2197_v10 }
 0x2d1   :  { %v1969_v46 = vsel %vm1967_vm8, %v4473_v19, %v1968_v53  ;;  %v2057_v24 = vcvt.s32.f32 %v2050_v47  ;;  %v6279_v50 = vshrl.u32 %v2140_v49, 30  ;;  %v2191_v20 = vor.u32 8388608, %v2190_v4 }
 0x2d2   :  { %v2055_v3 = vand.u32 2147483647, %v2054_v22  ;;  %v1973_v23 = vsel %vm1966_vm6, %v1969_v46, %v1972_v33  ;;  %v2201_v56 = vshrl.u32 %v7347_v25, %v2198_v51  ;;  %v2287_v14 = vand.u32 2147483647, %v5084_v26 }
 0x2d3   :  { %v1974_v5 = vsel %vm1963_vm4, nan, %v1973_v23  ;;  %v2142_v35 = vshll.u32 %v6279_v50, 30  ;;  %v2204_v2 = vshrl.u32 %v7348_v32, %v2198_v51  ;;  %v2196_v62 = vshrl.u32 %v2195_v29, 5 }
 0x2d4   :  { %v2058_v45 = vmul.f32 %v2057_v24, %v2055_v3  ;;  %v2200_v30 = vshll.u32 %v7346_v43, %v2197_v10  ;;  %v2207_v38 = vshrl.u32 %v7349_v61, %v2198_v51  ;;  %v2290_v18 = vand.u32 2139095040, %v5084_v26  ;;  %3963 = vst [vmem:[#allocation2 + $0x60] sm:$0xff] %v1974_v5 }
 0x2d5   :  { %v6291_v37 = vsub.s32 %v2139_v0, %v2142_v35  ;;  %v2203_v55 = vshll.u32 %v7347_v25, %v2197_v10  ;;  %v2210_v1 = vshrl.u32 %v4574_v58, %v2198_v51  ;;  %v2206_v12 = vshll.u32 %v7348_v32, %v2197_v10 }
 0x2d6   :  { %v2059_v44 = vxor.u32 2147483648, %v2058_v45  ;;  %v2209_v36 = vshll.u32 %v7349_v61, %v2197_v10  ;;  %v2212_v60 = vshll.u32 %v4574_v58, %v2197_v10  ;;  %v2213_v34 = vshrl.u32 %v7350_v59, %v2198_v51 }
 0x2d7   :  { %v2145_v9 = vsub.s32 0, %v6291_v37  ;;  %v2202_v21 = vor.u32 %v2201_v56, %v2200_v30  ;;  %v2205_v11 = vor.u32 %v2204_v2, %v2203_v55  ;;  %vm2081_vm9 = vcmp.lt.s32.totalorder %v5078_v16, 0 }
 0x2d8   :  { %v2060_v7 = vsel %vm1977_vm1, %v2059_v44, %v2058_v45  ;;  %v2208_v41 = vor.u32 %v2207_v38, %v2206_v12  ;;  %v2211_v29 = vor.u32 %v2210_v1, %v2209_v36  ;;  %v2214_v19 = vor.u32 %v2213_v34, %v2212_v60 }
 0x2d9   :  { %v2063_v54 = vsel %vm6268_vm5, %v5075_v15, %v2060_v7  ;;  %v4090_v47 = vmin.u32 %v2145_v9, %v6291_v37  ;;  %v2231_v52 = vshll.u32 %v2191_v20, 8  ;;  %v2291_v42 = vshrl.u32 %v2290_v18, 23 }
 0x2da   :  { %4476 = vcosq.f32 %v2063_v54  ;;  %v2165_v0 = vsub.s32 4, %v6279_v50  ;;  %v2199_v8 = vshrl.u32 %v7346_v43, %v2198_v51  ;;  %vm2215_vm12 = vcmp.lt.s32.totalorder %v2196_v62, 1 }
 0x2db   :  { %4478 = vsinq.f32 %v2063_v54  ;;  %v2147_v17 = vclz %v4090_v47  ;;  %vm2217_vm11 = vcmp.lt.s32.totalorder %v2196_v62, 3  ;;  %vm2218_vm10 = vcmp.lt.s32.totalorder %v2196_v62, 4 }
 0x2dc   :  { %v2223_v31 = vsel %vm2215_vm12, %v2202_v21, %v2205_v11  ;;  %v2220_v4 = vsel %vm2218_vm10, %v2208_v41, 2102212464  ;;  %v2224_v10 = vsel %vm2218_vm10, %v2211_v29, 920167782  ;;  %v2227_v53 = vsel %vm2215_vm12, %v2205_v11, %v2208_v41 }
 0x2dd   :  { %v2228_v22 = vsel %vm2218_vm10, %v2214_v19, 1326507024  ;;  %v4091_v49 = vadd.s32 4294967294, %v2147_v17  ;;  %vm2216_vm13 = vcmp.lt.s32.totalorder %v2196_v62, 2  ;;  %v2225_v33 = vsel %vm2217_vm11, %v2208_v41, %v2224_v10 }
 0x2de   :  { %v2229_v46 = vsel %vm2217_vm11, %v2211_v29, %v2228_v22  ;;  %v2219_v3 = vsel %vm2215_vm12, %v2199_v8, %v2202_v21  ;;  %v2226_v24 = vsel %vm2216_vm13, %v2223_v31, %v2225_v33  ;;  %v4097_v23 = vadd.s32 4294967169, %v2291_v42 }
 0x2df   :  { %v2230_v51 = vsel %vm2216_vm13, %v2227_v53, %v2229_v46  ;;  %vm4092_vm14 = vcmp.lt.s32.totalorder %v4091_v49, 0  ;;  %v2221_v20 = vsel %vm2217_vm11, %v2205_v11, %v2220_v4  ;;  %v2135_v38 = vadd.s32 %v6246_v57, %v6252_v63 }
 0x2e0   :  { %v6314_v56 = vmul.u32.u64.low %v2231_v52, %v2230_v51  ;;  %v6315_v5 = vmul.u32.u64.high %v2231_v52, %v2230_v51, %v6314_v56  ;;  %v2150_v45 = vsel %vm4092_vm14, 0, %v4091_v49  ;;  %v2297_v30 = vadd.s32 1, %v4097_v23 }
 0x2e1   :  { %v6317_v35 = vmul.u32.u64.low %v2231_v52, %v2226_v24  ;;  %v6318_v2 = vmul.u32.u64.high %v2231_v52, %v2226_v24, %v6317_v35  ;;  %v2151_v18 = vsub.s32 32, %v2150_v45  ;;  %v2155_v44 = vsub.s32 4294967266, %v2150_v45 }
 0x2e2   :  { %v2166_v55 = vsel %vm2081_vm9, %v2165_v0, %v6279_v50  ;;  %v2069_v1 = vand.u32 3, %v6277_v39  ;;  %vm6329_vm15 = vcmp.le.f32.partialorder %v2079_v13, 0.7853982  ;;  %v2222_v36 = vsel %vm2216_vm13, %v2219_v3, %v2221_v20 }
 0x2e3   :  { %vm2298_vm0 = vcmp.gt.s32.totalorder %v2297_v30, 0  ;;  %v2152_v60 = vshll.u32 %v6291_v37, %v2150_v45  ;;  %v2153_v57 = vshrl.u32 %v2135_v38, %v2151_v18  ;;  %v2156_v63 = vadd.s32 127, %v2155_v44 }
 0x2e4   :  { %vm2240_vm1 = vc.u32 %v6315_v5, %v6317_v35  ;;  %v2168_v50 = vsel %vm6329_vm15, 0, %v2166_v55  ;;  %v2241_v39 = vadd.s32 1, %v6318_v2  ;;  %v2294_v13 = vand.u32 8388607, %v2287_v14 }
 0x2e5   :  { %v2299_v34 = vsel %vm2298_vm0, %v2297_v30, 0  ;;  %v2154_v7 = vor.u32 %v2153_v57, %v2152_v60  ;;  %v2157_v62 = vshll.u32 %v2156_v63, 23  ;;  %v2238_v9 = vmul.u32 %v2231_v52, %v2222_v36 }
 0x2e6   :  { %v2301_v21 = vand.u32 31, %v2299_v34  ;;  %vm2067_vm2 = vweird.f32 %v5075_v15  ;;  %vm2070_vm3 = vcmp.lt.s32.totalorder %v2069_v1, 2  ;;  %vm2071_vm4 = vcmp.eq.s32.totalorder %v2069_v1, 0 }
 0x2e7   :  { %v4477_v11 = vpop.eup %4476  ;;  %v2242_v37 = vsel %vm2240_vm1, %v2241_v39, %v6318_v2  ;;  %vm2074_vm5 = vcmp.eq.s32.totalorder %v2069_v1, 2  ;;  %v2158_v29 = vor.u32 4788187, %v2157_v62  ;;  %v6344_v42 = vadd.s32 3, %v2168_v50 }
 0x2e8   :  { %v4479_v54 = vpop.eup %4478  ;;  %v2075_v41 = vxor.u32 2147483648, %v4477_v11  ;;  %v2243_v19 = vadd.s32 %v2242_v37, %v2238_v9  ;;  %v2295_v0 = vor.u32 8388608, %v2294_v13  ;;  %v2302_v8 = vsub.s32 32, %v2301_v21 }
 0x2e9   :  { %v2072_v47 = vxor.u32 2147483648, %v4479_v54  ;;  %v2159_v52 = vand.u32 2147483647, %v2158_v29  ;;  %v2161_v31 = vcvt.s32.f32 %v2154_v7  ;;  %v2304_v53 = vshll.u32 %v7346_v43, %v2301_v21 }
 0x2ea   :  { %v2076_v17 = vsel %vm2074_vm5, %v2075_v41, %v4479_v54  ;;  %v2244_v4 = vadd.s32 536870912, %v2243_v19  ;;  %v2305_v22 = vshrl.u32 %v7347_v25, %v2302_v8  ;;  %v2308_v49 = vshrl.u32 %v7348_v32, %v2302_v8 }
 0x2eb   :  { %v2073_v10 = vsel %vm2071_vm4, %v4477_v11, %v2072_v47  ;;  %v2162_v46 = vmul.f32 %v2161_v31, %v2159_v52  ;;  %v2311_v24 = vshrl.u32 %v7349_v61, %v2302_v8  ;;  %v2300_v23 = vshrl.u32 %v2299_v34, 5 }
 0x2ec   :  { %v2077_v33 = vsel %vm2070_vm3, %v2073_v10, %v2076_v17  ;;  %v6350_v3 = vshrl.u32 %v2244_v4, 30  ;;  %v2307_v20 = vshll.u32 %v7347_v25, %v2301_v21  ;;  %v2394_v56 = vand.u32 2139095040, %v5087_v27 }
 0x2ed   :  { %v2078_v51 = vsel %vm2067_vm2, nan, %v2077_v33  ;;  %v2163_v45 = vxor.u32 2147483648, %v2162_v46  ;;  %v2306_v30 = vor.u32 %v2305_v22, %v2304_v53  ;;  %v2310_v38 = vshll.u32 %v7348_v32, %v2301_v21 }
 0x2ee   :  { %v2246_v2 = vshll.u32 %v6350_v3, 30  ;;  %3964 = vst [vmem:[#allocation2 + $0x68] sm:$0xff] %v2078_v51  ;;  %v2313_v18 = vshll.u32 %v7349_v61, %v2301_v21  ;;  %v2314_v44 = vshrl.u32 %v4574_v58, %v2302_v8  ;;  %v2316_v55 = vshll.u32 %v4574_v58, %v2301_v21 }
 0x2ef   :  { %v2317_v15 = vshrl.u32 %v7350_v59, %v2302_v8  ;;  %v2164_v1 = vsel %vm2081_vm9, %v2163_v45, %v2162_v46  ;;  %v2309_v60 = vor.u32 %v2308_v49, %v2307_v20  ;;  %v2312_v57 = vor.u32 %v2311_v24, %v2310_v38 }
 0x2f0   :  { %v6365_v36 = vsub.s32 %v2243_v19, %v2246_v2  ;;  %v2167_v63 = vsel %vm6329_vm15, %v5078_v16, %v2164_v1  ;;  %v2315_v50 = vor.u32 %v2314_v44, %v2313_v18  ;;  %v2335_v13 = vshll.u32 %v2295_v0, 8 }
 0x2f1   :  { %v2318_v39 = vor.u32 %v2317_v15, %v2316_v55  ;;  %4480 = vcosq.f32 %v2167_v63  ;;  %v2303_v7 = vshrl.u32 %v7346_v43, %v2302_v8  ;;  %v2395_v62 = vshrl.u32 %v2394_v56, 23 }
 0x2f2   :  { %v2249_v34 = vsub.s32 0, %v6365_v36  ;;  %4482 = vsinq.f32 %v2167_v63  ;;  %vm2319_vm6 = vcmp.lt.s32.totalorder %v2300_v23, 1  ;;  %vm2321_vm7 = vcmp.lt.s32.totalorder %v2300_v23, 3 }
 0x2f3   :  { %vm2322_vm8 = vcmp.lt.s32.totalorder %v2300_v23, 4  ;;  %v2327_v11 = vsel %vm2319_vm6, %v2306_v30, %v2309_v60  ;;  %v2331_v54 = vsel %vm2319_vm6, %v2309_v60, %v2312_v57  ;;  %v2391_v29 = vand.u32 2147483647, %v5087_v27 }
 0x2f4   :  { %v4094_v9 = vmin.u32 %v2249_v34, %v6365_v36  ;;  %v2324_v21 = vsel %vm2322_vm8, %v2312_v57, 2102212464  ;;  %v2328_v37 = vsel %vm2322_vm8, %v2315_v50, 920167782  ;;  %v2332_v41 = vsel %vm2322_vm8, %v2318_v39, 1326507024 }
 0x2f5   :  { %v2329_v12 = vsel %vm2321_vm7, %v2312_v57, %v2328_v37  ;;  %v2269_v47 = vsub.s32 4, %v6350_v3  ;;  %vm2320_vm9 = vcmp.lt.s32.totalorder %v2300_v23, 2  ;;  %v2323_v0 = vsel %vm2319_vm6, %v2303_v7, %v2306_v30 }
 0x2f6   :  { %v2251_v19 = vclz %v4094_v9  ;;  %v2325_v8 = vsel %vm2321_vm7, %v2309_v60, %v2324_v21  ;;  %v2330_v17 = vsel %vm2320_vm9, %v2327_v11, %v2329_v12  ;;  %v2333_v52 = vsel %vm2321_vm7, %v2315_v50, %v2332_v41 }
 0x2f7   :  { %v4101_v31 = vadd.s32 4294967169, %v2395_v62  ;;  %v2334_v10 = vsel %vm2320_vm9, %v2331_v54, %v2333_v52  ;;  %v6378_v53 = vmul.u32.u64.low %v2335_v13, %v2330_v17  ;;  %v6379_v22 = vmul.u32.u64.high %v2335_v13, %v2330_v17, %v6378_v53 }
 0x2f8   :  { %v4095_v4 = vadd.s32 4294967294, %v2251_v19  ;;  %vm2185_vm12 = vcmp.lt.s32.totalorder %v5081_v40, 0  ;;  %v6383_v49 = vmul.u32.u64.low %v2335_v13, %v2334_v10  ;;  %v6384_v33 = vmul.u32.u64.high %v2335_v13, %v2334_v10, %v6383_v49 }
 0x2f9   :  { %vm6388_vm11 = vcmp.le.f32.partialorder %v2183_v6, 0.7853982  ;;  %v2326_v24 = vsel %vm2320_vm9, %v2323_v0, %v2325_v8  ;;  %v2401_v51 = vadd.s32 1, %v4101_v31  ;;  %v2173_v23 = vand.u32 3, %v6344_v42 }
 0x2fa   :  { %vm4096_vm10 = vcmp.lt.s32.totalorder %v4095_v4, 0  ;;  %v2239_v20 = vadd.s32 %v6317_v35, %v6315_v5  ;;  %v2398_v45 = vand.u32 8388607, %v2391_v29  ;;  %vm2171_vm13 = vweird.f32 %v5078_v16 }
 0x2fb   :  { %v2254_v56 = vsel %vm4096_vm10, 0, %v4095_v4  ;;  %v2270_v6 = vsel %vm2185_vm12, %v2269_v47, %v6350_v3  ;;  %v2345_v38 = vadd.s32 1, %v6379_v22  ;;  %v2342_v42 = vmul.u32 %v2335_v13, %v2326_v24 }
 0x2fc   :  { %v2255_v2 = vsub.s32 32, %v2254_v56  ;;  %v2259_v30 = vsub.s32 4294967266, %v2254_v56  ;;  %v2256_v18 = vshll.u32 %v6365_v36, %v2254_v56  ;;  %vm2344_vm14 = vc.u32 %v6384_v33, %v6378_v53 }
 0x2fd   :  { %vm2402_vm15 = vcmp.gt.s32.totalorder %v2401_v51, 0  ;;  %v2346_v44 = vsel %vm2344_vm14, %v2345_v38, %v6379_v22  ;;  %v2272_v1 = vsel %vm6388_vm11, 0, %v2270_v6  ;;  %v2399_v3 = vor.u32 8388608, %v2398_v45 }
 0x2fe   :  { %v2257_v5 = vshrl.u32 %v2239_v20, %v2255_v2  ;;  %v2260_v35 = vadd.s32 127, %v2259_v30  ;;  %v2403_v55 = vsel %vm2402_vm15, %v2401_v51, 0  ;;  %v4481_v15 = vpop.eup %4480  ;;  %v2347_v60 = vadd.s32 %v2346_v44, %v2342_v42 }
 0x2ff   :  { %v2405_v57 = vand.u32 31, %v2403_v55  ;;  %v4483_v63 = vpop.eup %4482  ;;  %vm2174_vm0 = vcmp.lt.s32.totalorder %v2173_v23, 2  ;;  %v2179_v36 = vxor.u32 2147483648, %v4481_v15  ;;  %vm2178_vm1 = vcmp.eq.s32.totalorder %v2173_v23, 2 }
 0x300   :  { %v2258_v50 = vor.u32 %v2257_v5, %v2256_v18  ;;  %v2261_v39 = vshll.u32 %v2260_v35, 23  ;;  %v2176_v13 = vxor.u32 2147483648, %v4483_v63  ;;  %v2348_v34 = vadd.s32 536870912, %v2347_v60 }
 0x301   :  { %v2406_v7 = vsub.s32 32, %v2405_v57  ;;  %vm2175_vm2 = vcmp.eq.s32.totalorder %v2173_v23, 0  ;;  %v2180_v62 = vsel %vm2178_vm1, %v2179_v36, %v4483_v63  ;;  %v6408_v21 = vadd.s32 3, %v2272_v1 }
 0x302   :  { %v2262_v9 = vor.u32 4788187, %v2261_v39  ;;  %v2177_v11 = vsel %vm2175_vm2, %v4481_v15, %v2176_v13  ;;  %v2349_v37 = vshrl.u32 %v2348_v34, 30  ;;  %v6410_v12 = vshll.u32 %v2399_v3, 8 }
 0x303   :  { %v2495_v54 = vand.u32 2147483647, %v5090_v28  ;;  %v2181_v41 = vsel %vm2174_vm0, %v2177_v11, %v2180_v62  ;;  %v2265_v47 = vcvt.s32.f32 %v2258_v50  ;;  %v2409_v0 = vshrl.u32 %v7347_v25, %v2406_v7 }
 0x304   :  { %v2263_v19 = vand.u32 2147483647, %v2262_v9  ;;  %v2182_v8 = vsel %vm2171_vm13, nan, %v2181_v41  ;;  %v2350_v17 = vshll.u32 %v2349_v37, 30  ;;  %v2412_v52 = vshrl.u32 %v7348_v32, %v2406_v7 }
 0x305   :  { %v2498_v31 = vand.u32 2139095040, %v5090_v28  ;;  %v2404_v10 = vshrl.u32 %v2403_v55, 5  ;;  %v2408_v22 = vshll.u32 %v7346_v43, %v2405_v57  ;;  %v2415_v49 = vshrl.u32 %v7349_v61, %v2406_v7  ;;  %3965 = vst [vmem:[#allocation2 + $0x70] sm:$0xff] %v2182_v8 }
 0x306   :  { %v2266_v4 = vmul.f32 %v2265_v47, %v2263_v19  ;;  %v6421_v24 = vsub.s32 %v2347_v60, %v2350_v17  ;;  %v2411_v51 = vshll.u32 %v7347_v25, %v2405_v57  ;;  %v2414_v23 = vshll.u32 %v7348_v32, %v2405_v57 }
 0x307   :  { %v2418_v16 = vshrl.u32 %v4574_v58, %v2406_v7  ;;  %v2410_v56 = vor.u32 %v2409_v0, %v2408_v22  ;;  %v2417_v45 = vshll.u32 %v7349_v61, %v2405_v57  ;;  %v2421_v2 = vshrl.u32 %v7350_v59, %v2406_v7 }
 0x308   :  { %v2267_v20 = vxor.u32 2147483648, %v2266_v4  ;;  %vm2289_vm3 = vcmp.lt.s32.totalorder %v5084_v26, 0  ;;  %v2353_v30 = vsub.s32 0, %v6421_v24  ;;  %v2413_v6 = vor.u32 %v2412_v52, %v2411_v51 }
 0x309   :  { %v2416_v38 = vor.u32 %v2415_v49, %v2414_v23  ;;  %v2420_v18 = vshll.u32 %v4574_v58, %v2405_v57  ;;  %v2343_v5 = vadd.s32 %v6378_v53, %v6384_v33  ;;  %v2419_v35 = vor.u32 %v2418_v16, %v2417_v45 }
 0x30a   :  { %v2268_v42 = vsel %vm2185_vm12, %v2267_v20, %v2266_v4  ;;  %v2499_v44 = vshrl.u32 %v2498_v31, 23  ;;  %v4098_v15 = vmin.u32 %v2353_v30, %v6421_v24  ;;  %v2407_v1 = vshrl.u32 %v7346_v43, %v2406_v7 }
 0x30b   :  { %v2271_v55 = vsel %vm6388_vm11, %v5081_v40, %v2268_v42  ;;  %v2422_v60 = vor.u32 %v2421_v2, %v2420_v18  ;;  %v2373_v3 = vsub.s32 4, %v2349_v37  ;;  %vm2423_vm4 = vcmp.lt.s32.totalorder %v2404_v10, 1 }
 0x30c   :  { %4484 = vcosq.f32 %v2271_v55  ;;  %vm2426_vm5 = vcmp.lt.s32.totalorder %v2404_v10, 4  ;;  %v2355_v57 = vclz %v4098_v15  ;;  %v2431_v36 = vsel %vm2423_vm4, %v2410_v56, %v2413_v6 }
 0x30d   :  { %4486 = vsinq.f32 %v2271_v55  ;;  %v2428_v63 = vsel %vm2426_vm5, %v2416_v38, 2102212464  ;;  %vm2424_vm6 = vcmp.lt.s32.totalorder %v2404_v10, 2  ;;  %vm2425_vm7 = vcmp.lt.s32.totalorder %v2404_v10, 3 }
 0x30e   :  { %v2432_v53 = vsel %vm2426_vm5, %v2419_v35, 920167782  ;;  %v2435_v33 = vsel %vm2423_vm4, %v2413_v6, %v2416_v38  ;;  %v4099_v50 = vadd.s32 4294967294, %v2355_v57  ;;  %v2427_v46 = vsel %vm2423_vm4, %v2407_v1, %v2410_v56 }
 0x30f   :  { %v2433_v39 = vsel %vm2425_vm7, %v2416_v38, %v2432_v53  ;;  %v2436_v13 = vsel %vm2426_vm5, %v2422_v60, 1326507024  ;;  %v2429_v34 = vsel %vm2425_vm7, %v2413_v6, %v2428_v63  ;;  %v4105_v9 = vadd.s32 4294967169, %v2499_v44 }
 0x310   :  { %v2434_v7 = vsel %vm2424_vm6, %v2431_v36, %v2433_v39  ;;  %v2437_v62 = vsel %vm2425_vm7, %v2419_v35, %v2436_v13  ;;  %vm4100_vm8 = vcmp.lt.s32.totalorder %v4099_v50, 0  ;;  %v2374_v0 = vsel %vm2289_vm3, %v2373_v3, %v2349_v37 }
 0x311   :  { %v2438_v11 = vsel %vm2424_vm6, %v2435_v33, %v2437_v62  ;;  %v6443_v41 = vmul.u32.u64.low %v6410_v12, %v2434_v7  ;;  %v6444_v19 = vmul.u32.u64.high %v6410_v12, %v2434_v7, %v6443_v41  ;;  %v2358_v47 = vsel %vm4100_vm8, 0, %v4099_v50 }
 0x312   :  { %v6450_v8 = vmul.u32.u64.low %v6410_v12, %v2438_v11  ;;  %v6451_v17 = vmul.u32.u64.high %v6410_v12, %v2438_v11, %v6450_v8  ;;  %v2359_v52 = vsub.s32 32, %v2358_v47  ;;  %v2363_v31 = vsub.s32 4294967266, %v2358_v47 }
 0x313   :  { %v2430_v4 = vsel %vm2424_vm6, %v2427_v46, %v2429_v34  ;;  %v2505_v22 = vadd.s32 1, %v4105_v9  ;;  %v2277_v49 = vand.u32 3, %v6408_v21  ;;  %vm6457_vm9 = vcmp.le.f32.partialorder %v2287_v14, 0.7853982 }
 0x314   :  { %v2360_v23 = vshll.u32 %v6421_v24, %v2358_v47  ;;  %v2502_v37 = vand.u32 8388607, %v2495_v54  ;;  %v2361_v16 = vshrl.u32 %v2343_v5, %v2359_v52  ;;  %v2364_v20 = vadd.s32 127, %v2363_v31 }
 0x315   :  { %v2449_v56 = vadd.s32 1, %v6444_v19  ;;  %vm2506_vm12 = vcmp.gt.s32.totalorder %v2505_v22, 0  ;;  %v2376_v10 = vsel %vm6457_vm9, 0, %v2374_v0  ;;  %v2446_v21 = vmul.u32 %v6410_v12, %v2430_v4 }
 0x316   :  { %vm2448_vm11 = vc.u32 %v6451_v17, %v6443_v41  ;;  %v2507_v14 = vsel %vm2506_vm12, %v2505_v22, 0  ;;  %v2362_v45 = vor.u32 %v2361_v16, %v2360_v23  ;;  %v2365_v2 = vshll.u32 %v2364_v20, 23 }
 0x317   :  { %v2450_v24 = vsel %vm2448_vm11, %v2449_v56, %v6444_v19  ;;  %vm2275_vm10 = vweird.f32 %v5081_v40  ;;  %vm2278_vm13 = vcmp.lt.s32.totalorder %v2277_v49, 2  ;;  %v2509_v6 = vand.u32 31, %v2507_v14 }
 0x318   :  { %v2451_v30 = vadd.s32 %v2450_v24, %v2446_v21  ;;  %vm2279_vm14 = vcmp.eq.s32.totalorder %v2277_v49, 0  ;;  %vm2282_vm15 = vcmp.eq.s32.totalorder %v2277_v49, 2  ;;  %v2366_v18 = vor.u32 4788187, %v2365_v2 }
 0x319   :  { %v4485_v38 = vpop.eup %4484  ;;  %v6472_v42 = vadd.s32 3, %v2376_v10  ;;  %v2503_v44 = vor.u32 8388608, %v2502_v37  ;;  %v2510_v55 = vsub.s32 32, %v2509_v6  ;;  %v2369_v60 = vcvt.s32.f32 %v2362_v45 }
 0x31a   :  { %v4487_v12 = vpop.eup %4486  ;;  %v2283_v5 = vxor.u32 2147483648, %v4485_v38  ;;  %v2452_v35 = vadd.s32 536870912, %v2451_v30  ;;  %v2367_v1 = vand.u32 2147483647, %v2366_v18  ;;  %v2602_v3 = vand.u32 2139095040, %v5093_v48 }
 0x31b   :  { %v2280_v15 = vxor.u32 2147483648, %v4487_v12  ;;  %v2512_v36 = vshll.u32 %v7346_v43, %v2509_v6  ;;  %v2513_v53 = vshrl.u32 %v7347_v25, %v2510_v55  ;;  %v2516_v46 = vshrl.u32 %v7348_v32, %v2510_v55 }
 0x31c   :  { %v2284_v57 = vsel %vm2282_vm15, %v2283_v5, %v4487_v12  ;;  %v6475_v63 = vshrl.u32 %v2452_v35, 30  ;;  %v2370_v50 = vmul.f32 %v2369_v60, %v2367_v1  ;;  %v2519_v39 = vshrl.u32 %v7349_v61, %v2510_v55 }
 0x31d   :  { %v2281_v33 = vsel %vm2279_vm14, %v4485_v38, %v2280_v15  ;;  %v2508_v7 = vshrl.u32 %v2507_v14, 5  ;;  %v2515_v62 = vshll.u32 %v7347_v25, %v2509_v6  ;;  %v2514_v19 = vor.u32 %v2513_v53, %v2512_v36 }
 0x31e   :  { %v2285_v13 = vsel %vm2278_vm13, %v2281_v33, %v2284_v57  ;;  %v2454_v34 = vshll.u32 %v6475_v63, 30  ;;  %v2371_v11 = vxor.u32 2147483648, %v2370_v50  ;;  %v2518_v47 = vshll.u32 %v7348_v32, %v2509_v6 }
 0x31f   :  { %v2286_v9 = vsel %vm2275_vm10, nan, %v2285_v13  ;;  %v2517_v8 = vor.u32 %v2516_v46, %v2515_v62  ;;  %v2521_v52 = vshll.u32 %v7349_v61, %v2509_v6  ;;  %v2522_v31 = vshrl.u32 %v4574_v58, %v2510_v55 }
 0x320   :  { %v6488_v0 = vsub.s32 %v2451_v30, %v2454_v34  ;;  %3966 = vst [vmem:[#allocation2 + $0x78] sm:$0xff] %v2286_v9  ;;  %v2372_v4 = vsel %vm2289_vm3, %v2371_v11, %v2370_v50  ;;  %v2520_v22 = vor.u32 %v2519_v39, %v2518_v47  ;;  %v2524_v49 = vshll.u32 %v4574_v58, %v2509_v6 }
 0x321   :  { %v2525_v40 = vshrl.u32 %v7350_v59, %v2510_v55  ;;  %v2375_v23 = vsel %vm6457_vm9, %v5084_v26, %v2372_v4  ;;  %v2523_v16 = vor.u32 %v2522_v31, %v2521_v52  ;;  %v2543_v20 = vshll.u32 %v2503_v44, 8 }
 0x322   :  { %v2457_v37 = vsub.s32 0, %v6488_v0  ;;  %4488 = vcosq.f32 %v2375_v23  ;;  %vm2527_vm0 = vcmp.lt.s32.totalorder %v2508_v7, 1  ;;  %v2603_v10 = vshrl.u32 %v2602_v3, 23 }
 0x323   :  { %v2526_v56 = vor.u32 %v2525_v40, %v2524_v49  ;;  %4490 = vsinq.f32 %v2375_v23  ;;  %v2511_v14 = vshrl.u32 %v7346_v43, %v2510_v55  ;;  %vm2530_vm1 = vcmp.lt.s32.totalorder %v2508_v7, 4 }
 0x324   :  { %v4102_v21 = vmin.u32 %v2457_v37, %v6488_v0  ;;  %vm2528_vm2 = vcmp.lt.s32.totalorder %v2508_v7, 2  ;;  %v2532_v45 = vsel %vm2530_vm1, %v2520_v22, 2102212464  ;;  %v2535_v2 = vsel %vm2527_vm0, %v2514_v19, %v2517_v8 }
 0x325   :  { %v2536_v24 = vsel %vm2530_vm1, %v2523_v16, 920167782  ;;  %vm2529_vm3 = vcmp.lt.s32.totalorder %v2508_v7, 3  ;;  %v2531_v30 = vsel %vm2527_vm0, %v2511_v14, %v2514_v19  ;;  %v2539_v6 = vsel %vm2527_vm0, %v2517_v8, %v2520_v22 }
 0x326   :  { %v2459_v51 = vclz %v4102_v21  ;;  %v2533_v38 = vsel %vm2529_vm3, %v2517_v8, %v2532_v45  ;;  %v2537_v18 = vsel %vm2529_vm3, %v2520_v22, %v2536_v24  ;;  %v2540_v12 = vsel %vm2530_vm1, %v2526_v56, 1326507024 }
 0x327   :  { %v4109_v5 = vadd.s32 4294967169, %v2603_v10  ;;  %v2538_v44 = vsel %vm2528_vm2, %v2535_v2, %v2537_v18  ;;  %v2541_v15 = vsel %vm2529_vm3, %v2523_v16, %v2540_v12  ;;  %v2477_v1 = vsub.s32 4, %v6475_v63 }
 0x328   :  { %v4103_v35 = vadd.s32 4294967294, %v2459_v51  ;;  %v2542_v55 = vsel %vm2528_vm2, %v2539_v6, %v2541_v15  ;;  %v6505_v60 = vmul.u32.u64.low %v2543_v20, %v2538_v44  ;;  %v6506_v3 = vmul.u32.u64.high %v2543_v20, %v2538_v44, %v6505_v60  ;;  %v7391_v6 = vld [vmem:[#allocation5_spill] sm:$0xff] }
 0x329   :  { %v2534_v57 = vsel %vm2528_vm2, %v2531_v30, %v2533_v38  ;;  %v6510_v36 = vmul.u32.u64.low %v2543_v20, %v2542_v55  ;;  %v6511_v53 = vmul.u32.u64.high %v2543_v20, %v2542_v55, %v6510_v36  ;;  %v2381_v33 = vand.u32 3, %v6472_v42 }
 0x32a   :  { %vm4104_vm4 = vcmp.lt.s32.totalorder %v4103_v35, 0  ;;  %vm2393_vm5 = vcmp.lt.s32.totalorder %v5087_v27, 0  ;;  %v2609_v46 = vadd.s32 1, %v4109_v5  ;;  %v2447_v39 = vadd.s32 %v6443_v41, %v6451_v17 }
 0x32b   :  { %v2462_v50 = vsel %vm4104_vm4, 0, %v4103_v35  ;;  %v2599_v62 = vand.u32 2147483647, %v5093_v48  ;;  %v2478_v7 = vsel %vm2393_vm5, %v2477_v1, %v6475_v63  ;;  %v2550_v9 = vmul.u32 %v2543_v20, %v2534_v57 }
 0x32c   :  { %v2463_v13 = vsub.s32 32, %v2462_v50  ;;  %v2467_v34 = vsub.s32 4294967266, %v2462_v50  ;;  %v2553_v11 = vadd.s32 1, %v6506_v3  ;;  %vm2610_vm6 = vcmp.gt.s32.totalorder %v2609_v46, 0 }
 0x32d   :  { %v2464_v42 = vshll.u32 %v6488_v0, %v2462_v50  ;;  %vm2552_vm7 = vc.u32 %v6511_v53, %v6505_v60  ;;  %vm2379_vm8 = vweird.f32 %v5084_v26  ;;  %vm6528_vm9 = vcmp.le.f32.partialorder %v2391_v29, 0.7853982 }
 0x32e   :  { %v2465_v19 = vshrl.u32 %v2447_v39, %v2463_v13  ;;  %v2468_v47 = vadd.s32 127, %v2467_v34  ;;  %v2554_v17 = vsel %vm2552_vm7, %v2553_v11, %v6506_v3  ;;  %v2611_v63 = vsel %vm2610_vm6, %v2609_v46, 0 }
 0x32f   :  { %v4489_v8 = vpop.eup %4488  ;;  %v2480_v0 = vsel %vm6528_vm9, 0, %v2478_v7  ;;  %v2555_v4 = vadd.s32 %v2554_v17, %v2550_v9  ;;  %vm2382_vm12 = vcmp.lt.s32.totalorder %v2381_v33, 2  ;;  %v2606_v40 = vand.u32 8388607, %v2599_v62 }
 0x330   :  { %v2466_v52 = vor.u32 %v2465_v19, %v2464_v42  ;;  %v2469_v31 = vshll.u32 %v2468_v47, 23  ;;  %v4491_v22 = vpop.eup %4490  ;;  %v2387_v49 = vxor.u32 2147483648, %v4489_v8  ;;  %v2613_v29 = vand.u32 31, %v2611_v63 }
 0x331   :  { %v2384_v23 = vxor.u32 2147483648, %v4491_v22  ;;  %vm2386_vm11 = vcmp.eq.s32.totalorder %v2381_v33, 2  ;;  %v2556_v16 = vadd.s32 536870912, %v2555_v4  ;;  %vm2383_vm10 = vcmp.eq.s32.totalorder %v2381_v33, 0 }
 0x332   :  { %v2470_v37 = vor.u32 4788187, %v2469_v31  ;;  %v2388_v20 = vsel %vm2386_vm11, %v2387_v49, %v4491_v22  ;;  %v6537_v56 = vadd.s32 3, %v2480_v0  ;;  %v2614_v10 = vsub.s32 32, %v2613_v29 }
 0x333   :  { %v2385_v21 = vsel %vm2383_vm10, %v4489_v8, %v2384_v23  ;;  %v2473_v45 = vcvt.s32.f32 %v2466_v52  ;;  %v6539_v2 = vshrl.u32 %v2556_v16, 30  ;;  %v2607_v51 = vor.u32 8388608, %v2606_v40 }
 0x334   :  { %v2471_v14 = vand.u32 2147483647, %v2470_v37  ;;  %v2389_v24 = vsel %vm2382_vm12, %v2385_v21, %v2388_v20  ;;  %v2617_v30 = vshrl.u32 %v7347_v25, %v2614_v10  ;;  %v2703_v38 = vand.u32 2147483647, %v7391_v6 }
 0x335   :  { %v2390_v18 = vsel %vm2379_vm8, nan, %v2389_v24  ;;  %v2558_v5 = vshll.u32 %v6539_v2, 30  ;;  %v2620_v35 = vshrl.u32 %v7348_v32, %v2614_v10  ;;  %v2612_v44 = vshrl.u32 %v2611_v63, 5 }
 0x336   :  { %v2474_v12 = vmul.f32 %v2473_v45, %v2471_v14  ;;  %v2616_v15 = vshll.u32 %v7346_v43, %v2613_v29  ;;  %v2623_v1 = vshrl.u32 %v7349_v61, %v2614_v10  ;;  %v2706_v55 = vand.u32 2139095040, %v7391_v6  ;;  %3967 = vst [vmem:[#allocation2 + $0x80] sm:$0xff] %v2390_v18 }
 0x337   :  { %v6551_v57 = vsub.s32 %v2555_v4, %v2558_v5  ;;  %v2619_v36 = vshll.u32 %v7347_v25, %v2613_v29  ;;  %v2626_v26 = vshrl.u32 %v4574_v58, %v2614_v10  ;;  %v2622_v33 = vshll.u32 %v7348_v32, %v2613_v29 }
 0x338   :  { %v2475_v3 = vxor.u32 2147483648, %v2474_v12  ;;  %v2625_v50 = vshll.u32 %v7349_v61, %v2613_v29  ;;  %v2628_v46 = vshll.u32 %v4574_v58, %v2613_v29  ;;  %v2629_v39 = vshrl.u32 %v7350_v59, %v2614_v10 }
 0x339   :  { %v2561_v34 = vsub.s32 0, %v6551_v57  ;;  %v2618_v7 = vor.u32 %v2617_v30, %v2616_v15  ;;  %v2621_v9 = vor.u32 %v2620_v35, %v2619_v36  ;;  %vm2497_vm13 = vcmp.lt.s32.totalorder %v5090_v28, 0 }
 0x33a   :  { %v2476_v13 = vsel %vm2393_vm5, %v2475_v3, %v2474_v12  ;;  %v2624_v42 = vor.u32 %v2623_v1, %v2622_v33  ;;  %v2627_v19 = vor.u32 %v2626_v26, %v2625_v50  ;;  %v2630_v47 = vor.u32 %v2629_v39, %v2628_v46 }
 0x33b   :  { %v2479_v11 = vsel %vm6528_vm9, %v5087_v27, %v2476_v13  ;;  %v4106_v17 = vmin.u32 %v2561_v34, %v6551_v57  ;;  %v2647_v63 = vshll.u32 %v2607_v51, 8  ;;  %v2707_v8 = vshrl.u32 %v2706_v55, 23 }
 0x33c   :  { %4492 = vcosq.f32 %v2479_v11  ;;  %v2581_v52 = vsub.s32 4, %v6539_v2  ;;  %v2615_v31 = vshrl.u32 %v7346_v43, %v2614_v10  ;;  %vm2631_vm14 = vcmp.lt.s32.totalorder %v2612_v44, 1 }
 0x33d   :  { %4494 = vsinq.f32 %v2479_v11  ;;  %v2563_v0 = vclz %v4106_v17  ;;  %vm2633_vm15 = vcmp.lt.s32.totalorder %v2612_v44, 3  ;;  %vm2634_vm0 = vcmp.lt.s32.totalorder %v2612_v44, 4 }
 0x33e   :  { %v2639_v41 = vsel %vm2631_vm14, %v2618_v7, %v2621_v9  ;;  %v2636_v4 = vsel %vm2634_vm0, %v2624_v42, 2102212464  ;;  %v2640_v22 = vsel %vm2634_vm0, %v2627_v19, 920167782  ;;  %v2643_v49 = vsel %vm2631_vm14, %v2621_v9, %v2624_v42 }
 0x33f   :  { %v2644_v40 = vsel %vm2634_vm0, %v2630_v47, 1326507024  ;;  %v4107_v29 = vadd.s32 4294967294, %v2563_v0  ;;  %vm2632_vm1 = vcmp.lt.s32.totalorder %v2612_v44, 2  ;;  %v2641_v23 = vsel %vm2633_vm15, %v2624_v42, %v2640_v22 }
 0x340   :  { %v2645_v37 = vsel %vm2633_vm15, %v2627_v19, %v2644_v40  ;;  %v2635_v16 = vsel %vm2631_vm14, %v2615_v31, %v2618_v7  ;;  %v2642_v20 = vsel %vm2632_vm1, %v2639_v41, %v2641_v23  ;;  %v4113_v21 = vadd.s32 4294967169, %v2707_v8 }
 0x341   :  { %v2646_v10 = vsel %vm2632_vm1, %v2643_v49, %v2645_v37  ;;  %vm4108_vm2 = vcmp.lt.s32.totalorder %v4107_v29, 0  ;;  %v2637_v14 = vsel %vm2633_vm15, %v2621_v9, %v2636_v4  ;;  %v2551_v5 = vadd.s32 %v6505_v60, %v6511_v53 }
 0x342   :  { %v6574_v45 = vmul.u32.u64.low %v2647_v63, %v2646_v10  ;;  %v6575_v24 = vmul.u32.u64.high %v2647_v63, %v2646_v10, %v6574_v45  ;;  %v2566_v51 = vsel %vm4108_vm2, 0, %v4107_v29  ;;  %v2713_v12 = vadd.s32 1, %v4113_v21  ;;  %v7394_v10 = vld [vmem:[#allocation6_spill] sm:$0xff] }
 0x343   :  { %v6577_v30 = vmul.u32.u64.low %v2647_v63, %v2642_v20  ;;  %v6578_v18 = vmul.u32.u64.high %v2647_v63, %v2642_v20, %v6577_v30  ;;  %v2567_v35 = vsub.s32 32, %v2566_v51  ;;  %v2571_v15 = vsub.s32 4294967266, %v2566_v51 }
 0x344   :  { %v2582_v1 = vsel %vm2497_vm13, %v2581_v52, %v6539_v2  ;;  %v2485_v55 = vand.u32 3, %v6537_v56  ;;  %vm6589_vm3 = vcmp.le.f32.partialorder %v2495_v54, 0.7853982  ;;  %v2638_v36 = vsel %vm2632_vm1, %v2635_v16, %v2637_v14 }
 0x345   :  { %vm2714_vm4 = vcmp.gt.s32.totalorder %v2713_v12, 0  ;;  %v2568_v26 = vshll.u32 %v6551_v57, %v2566_v51  ;;  %v2569_v60 = vshrl.u32 %v2551_v5, %v2567_v35  ;;  %v2572_v53 = vadd.s32 127, %v2571_v15 }
 0x346   :  { %vm2656_vm5 = vc.u32 %v6575_v24, %v6577_v30  ;;  %v2584_v2 = vsel %vm6589_vm3, 0, %v2582_v1  ;;  %v2657_v56 = vadd.s32 1, %v6578_v18  ;;  %v2710_v54 = vand.u32 8388607, %v2703_v38 }
 0x347   :  { %v2715_v33 = vsel %vm2714_vm4, %v2713_v12, 0  ;;  %v2570_v50 = vor.u32 %v2569_v60, %v2568_v26  ;;  %v2573_v44 = vshll.u32 %v2572_v53, 23  ;;  %v2654_v46 = vmul.u32 %v2647_v63, %v2638_v36 }
 0x348   :  { %v2717_v39 = vand.u32 31, %v2715_v33  ;;  %vm2483_vm6 = vweird.f32 %v5087_v27  ;;  %vm2486_vm7 = vcmp.lt.s32.totalorder %v2485_v55, 2  ;;  %vm2487_vm8 = vcmp.eq.s32.totalorder %v2485_v55, 0 }
 0x349   :  { %v4493_v13 = vpop.eup %4492  ;;  %v2658_v57 = vsel %vm2656_vm5, %v2657_v56, %v6578_v18  ;;  %vm2490_vm9 = vcmp.eq.s32.totalorder %v2485_v55, 2  ;;  %v2574_v9 = vor.u32 4788187, %v2573_v44  ;;  %v6604_v19 = vadd.s32 3, %v2584_v2 }
 0x34a   :  { %v4495_v34 = vpop.eup %4494  ;;  %v2491_v7 = vxor.u32 2147483648, %v4493_v13  ;;  %v2659_v11 = vadd.s32 %v2658_v57, %v2654_v46  ;;  %v2711_v47 = vor.u32 8388608, %v2710_v54  ;;  %v2718_v17 = vsub.s32 32, %v2717_v39 }
 0x34b   :  { %v2488_v42 = vxor.u32 2147483648, %v4495_v34  ;;  %v2575_v63 = vand.u32 2147483647, %v2574_v9  ;;  %v2577_v52 = vcvt.s32.f32 %v2570_v50  ;;  %v2720_v41 = vshll.u32 %v7346_v43, %v2717_v39 }
 0x34c   :  { %v2492_v8 = vsel %vm2490_vm9, %v2491_v7, %v4495_v34  ;;  %v2660_v31 = vadd.s32 536870912, %v2659_v11  ;;  %v2721_v4 = vshrl.u32 %v7347_v25, %v2718_v17  ;;  %v2724_v22 = vshrl.u32 %v7348_v32, %v2718_v17 }
 0x34d   :  { %v2489_v0 = vsel %vm2487_vm8, %v4493_v13, %v2488_v42  ;;  %v2578_v40 = vmul.f32 %v2577_v52, %v2575_v63  ;;  %v2727_v23 = vshrl.u32 %v7349_v61, %v2718_v17  ;;  %v2716_v16 = vshrl.u32 %v2715_v33, 5 }
 0x34e   :  { %v2493_v49 = vsel %vm2486_vm7, %v2489_v0, %v2492_v8  ;;  %v6610_v29 = vshrl.u32 %v2660_v31, 30  ;;  %v2723_v20 = vshll.u32 %v7347_v25, %v2717_v39  ;;  %v2810_v21 = vand.u32 2139095040, %v7394_v10 }
 0x34f   :  { %v2494_v37 = vsel %vm2483_vm6, nan, %v2493_v49  ;;  %v2579_v14 = vxor.u32 2147483648, %v2578_v40  ;;  %v2722_v51 = vor.u32 %v2721_v4, %v2720_v41  ;;  %v2726_v18 = vshll.u32 %v7348_v32, %v2717_v39 }
 0x350   :  { %v2662_v45 = vshll.u32 %v6610_v29, 30  ;;  %3968 = vst [vmem:[#allocation2 + $0x88] sm:$0xff] %v2494_v37  ;;  %v2729_v12 = vshll.u32 %v7349_v61, %v2717_v39  ;;  %v2730_v5 = vshrl.u32 %v4574_v58, %v2718_v17  ;;  %v2732_v35 = vshll.u32 %v4574_v58, %v2717_v39 }
 0x351   :  { %v2733_v27 = vshrl.u32 %v7350_v59, %v2718_v17  ;;  %v2580_v15 = vsel %vm2497_vm13, %v2579_v14, %v2578_v40  ;;  %v2725_v55 = vor.u32 %v2724_v22, %v2723_v20  ;;  %v2728_v36 = vor.u32 %v2727_v23, %v2726_v18 }
 0x352   :  { %v6625_v1 = vsub.s32 %v2659_v11, %v2662_v45  ;;  %v2583_v26 = vsel %vm6589_vm3, %v5090_v28, %v2580_v15  ;;  %v2731_v60 = vor.u32 %v2730_v5, %v2729_v12  ;;  %v2751_v2 = vshll.u32 %v2711_v47, 8 }
 0x353   :  { %v2734_v53 = vor.u32 %v2733_v27, %v2732_v35  ;;  %4496 = vcosq.f32 %v2583_v26  ;;  %v2719_v54 = vshrl.u32 %v7346_v43, %v2718_v17  ;;  %v2811_v33 = vshrl.u32 %v2810_v21, 23 }
 0x354   :  { %v2665_v56 = vsub.s32 0, %v6625_v1  ;;  %4498 = vsinq.f32 %v2583_v26  ;;  %vm2735_vm12 = vcmp.lt.s32.totalorder %v2716_v16, 1  ;;  %vm2737_vm11 = vcmp.lt.s32.totalorder %v2716_v16, 3 }
 0x355   :  { %vm2738_vm10 = vcmp.lt.s32.totalorder %v2716_v16, 4  ;;  %v2743_v46 = vsel %vm2735_vm12, %v2722_v51, %v2725_v55  ;;  %v2747_v13 = vsel %vm2735_vm12, %v2725_v55, %v2728_v36  ;;  %v2807_v34 = vand.u32 2147483647, %v7394_v10 }
 0x356   :  { %v4110_v50 = vmin.u32 %v2665_v56, %v6625_v1  ;;  %v2740_v44 = vsel %vm2738_vm10, %v2728_v36, 2102212464  ;;  %v2744_v39 = vsel %vm2738_vm10, %v2731_v60, 920167782  ;;  %v2748_v57 = vsel %vm2738_vm10, %v2734_v53, 1326507024 }
 0x357   :  { %v2745_v3 = vsel %vm2737_vm11, %v2728_v36, %v2744_v39  ;;  %v2685_v9 = vsub.s32 4, %v6610_v29  ;;  %vm2736_vm13 = vcmp.lt.s32.totalorder %v2716_v16, 2  ;;  %v2739_v11 = vsel %vm2735_vm12, %v2719_v54, %v2722_v51  ;;  %v7397_v39 = vld [vmem:[#allocation7_spill] sm:$0xff] }
 0x358   :  { %v2667_v7 = vclz %v4110_v50  ;;  %v2741_v42 = vsel %vm2737_vm11, %v2725_v55, %v2740_v44  ;;  %v2746_v47 = vsel %vm2736_vm13, %v2743_v46, %v2745_v3  ;;  %v2749_v17 = vsel %vm2737_vm11, %v2731_v60, %v2748_v57 }
 0x359   :  { %v4117_v8 = vadd.s32 4294967169, %v2811_v33  ;;  %v2750_v52 = vsel %vm2736_vm13, %v2747_v13, %v2749_v17  ;;  %v6638_v31 = vmul.u32.u64.low %v2751_v2, %v2746_v47  ;;  %v6639_v0 = vmul.u32.u64.high %v2751_v2, %v2746_v47, %v6638_v31 }
 0x35a   :  { %v4111_v63 = vadd.s32 4294967294, %v2667_v7  ;;  %vm2601_vm14 = vcmp.lt.s32.totalorder %v5093_v48, 0  ;;  %v6643_v41 = vmul.u32.u64.low %v2751_v2, %v2750_v52  ;;  %v6644_v4 = vmul.u32.u64.high %v2751_v2, %v2750_v52, %v6643_v41 }
 0x35b   :  { %vm6648_vm15 = vcmp.le.f32.partialorder %v2599_v62, 0.7853982  ;;  %v2742_v49 = vsel %vm2736_vm13, %v2739_v11, %v2741_v42  ;;  %v2817_v40 = vadd.s32 1, %v4117_v8  ;;  %v2589_v23 = vand.u32 3, %v6604_v19 }
 0x35c   :  { %vm4112_vm0 = vcmp.lt.s32.totalorder %v4111_v63, 0  ;;  %v2655_v37 = vadd.s32 %v6577_v30, %v6575_v24  ;;  %v2814_v20 = vand.u32 8388607, %v2807_v34  ;;  %vm2587_vm1 = vweird.f32 %v5090_v28 }
 0x35d   :  { %v2670_v16 = vsel %vm4112_vm0, 0, %v4111_v63  ;;  %v2686_v62 = vsel %vm2601_vm14, %v2685_v9, %v6610_v29  ;;  %v2761_v45 = vadd.s32 1, %v6639_v0  ;;  %v2758_v19 = vmul.u32 %v2751_v2, %v2742_v49 }
 0x35e   :  { %v2671_v21 = vsub.s32 32, %v2670_v16  ;;  %v2675_v14 = vsub.s32 4294967266, %v2670_v16  ;;  %v2672_v51 = vshll.u32 %v6625_v1, %v2670_v16  ;;  %vm2760_vm2 = vc.u32 %v6644_v4, %v6638_v31 }
 0x35f   :  { %vm2818_vm3 = vcmp.gt.s32.totalorder %v2817_v40, 0  ;;  %v2762_v18 = vsel %vm2760_vm2, %v2761_v45, %v6639_v0  ;;  %v2688_v35 = vsel %vm6648_vm15, 0, %v2686_v62  ;;  %v2815_v29 = vor.u32 8388608, %v2814_v20 }
 0x360   :  { %v2673_v24 = vshrl.u32 %v2655_v37, %v2671_v21  ;;  %v2676_v30 = vadd.s32 127, %v2675_v14  ;;  %v2819_v12 = vsel %vm2818_vm3, %v2817_v40, 0  ;;  %v4497_v5 = vpop.eup %4496  ;;  %v2763_v27 = vadd.s32 %v2762_v18, %v2758_v19 }
 0x361   :  { %v2821_v15 = vand.u32 31, %v2819_v12  ;;  %v4499_v55 = vpop.eup %4498  ;;  %vm2590_vm4 = vcmp.lt.s32.totalorder %v2589_v23, 2  ;;  %v2595_v1 = vxor.u32 2147483648, %v4497_v5  ;;  %vm2594_vm5 = vcmp.eq.s32.totalorder %v2589_v23, 2 }
 0x362   :  { %v2674_v36 = vor.u32 %v2673_v24, %v2672_v51  ;;  %v2677_v26 = vshll.u32 %v2676_v30, 23  ;;  %v2592_v60 = vxor.u32 2147483648, %v4499_v55  ;;  %v2764_v53 = vadd.s32 536870912, %v2763_v27 }
 0x363   :  { %v2822_v2 = vsub.s32 32, %v2821_v15  ;;  %vm2591_vm6 = vcmp.eq.s32.totalorder %v2589_v23, 0  ;;  %v2596_v56 = vsel %vm2594_vm5, %v2595_v1, %v4499_v55  ;;  %v6668_v33 = vadd.s32 3, %v2688_v35 }
 0x364   :  { %v2678_v54 = vor.u32 4788187, %v2677_v26  ;;  %v2593_v50 = vsel %vm2591_vm6, %v4497_v5, %v2592_v60  ;;  %v2765_v44 = vshrl.u32 %v2764_v53, 30  ;;  %v6670_v46 = vshll.u32 %v2815_v29, 8 }
 0x365   :  { %v2911_v3 = vand.u32 2147483647, %v7397_v39  ;;  %v2597_v13 = vsel %vm2590_vm4, %v2593_v50, %v2596_v56  ;;  %v2681_v7 = vcvt.s32.f32 %v2674_v36  ;;  %v2825_v9 = vshrl.u32 %v7347_v25, %v2822_v2 }
 0x366   :  { %v2679_v57 = vand.u32 2147483647, %v2678_v54  ;;  %v2598_v11 = vsel %vm2587_vm1, nan, %v2597_v13  ;;  %v2766_v42 = vshll.u32 %v2765_v44, 30  ;;  %v2828_v47 = vshrl.u32 %v7348_v32, %v2822_v2 }
 0x367   :  { %v2914_v17 = vand.u32 2139095040, %v7397_v39  ;;  %v2820_v63 = vshrl.u32 %v2819_v12, 5  ;;  %v2824_v52 = vshll.u32 %v7346_v43, %v2821_v15  ;;  %v2831_v0 = vshrl.u32 %v7349_v61, %v2822_v2  ;;  %3969 = vst [vmem:[#allocation2 + $0x90] sm:$0xff] %v2598_v11 }
 0x368   :  { %v2682_v8 = vmul.f32 %v2681_v7, %v2679_v57  ;;  %v6681_v41 = vsub.s32 %v2763_v27, %v2766_v42  ;;  %v2827_v49 = vshll.u32 %v7347_v25, %v2821_v15  ;;  %v2830_v40 = vshll.u32 %v7348_v32, %v2821_v15 }
 0x369   :  { %v2834_v28 = vshrl.u32 %v4574_v58, %v2822_v2  ;;  %v2826_v37 = vor.u32 %v2825_v9, %v2824_v52  ;;  %v2833_v16 = vshll.u32 %v7349_v61, %v2821_v15  ;;  %v2837_v20 = vshrl.u32 %v7350_v59, %v2822_v2 }
 0x36a   :  { %v2683_v23 = vxor.u32 2147483648, %v2682_v8  ;;  %vm2705_vm7 = vcmp.lt.s32.totalorder %v7391_v6, 0  ;;  %v2769_v21 = vsub.s32 0, %v6681_v41  ;;  %v2829_v14 = vor.u32 %v2828_v47, %v2827_v49 }
 0x36b   :  { %v2832_v62 = vor.u32 %v2831_v0, %v2830_v40  ;;  %v2836_v45 = vshll.u32 %v4574_v58, %v2821_v15  ;;  %v2759_v19 = vadd.s32 %v6638_v31, %v6644_v4  ;;  %v2835_v24 = vor.u32 %v2834_v28, %v2833_v16 }
 0x36c   :  { %v2684_v51 = vsel %vm2601_vm14, %v2683_v23, %v2682_v8  ;;  %v2915_v30 = vshrl.u32 %v2914_v17, 23  ;;  %v4114_v12 = vmin.u32 %v2769_v21, %v6681_v41  ;;  %v2823_v5 = vshrl.u32 %v7346_v43, %v2822_v2 }
 0x36d   :  { %v2687_v18 = vsel %vm6648_vm15, %v5093_v48, %v2684_v51  ;;  %v2838_v35 = vor.u32 %v2837_v20, %v2836_v45  ;;  %v2789_v27 = vsub.s32 4, %v2765_v44  ;;  %vm2839_vm8 = vcmp.lt.s32.totalorder %v2820_v63, 1 }
 0x36e   :  { %4500 = vcosq.f32 %v2687_v18  ;;  %vm2842_vm9 = vcmp.lt.s32.totalorder %v2820_v63, 4  ;;  %v2771_v29 = vclz %v4114_v12  ;;  %v2847_v55 = vsel %vm2839_vm8, %v2826_v37, %v2829_v14 }
 0x36f   :  { %4502 = vsinq.f32 %v2687_v18  ;;  %v2844_v15 = vsel %vm2842_vm9, %v2832_v62, 2102212464  ;;  %vm2840_vm12 = vcmp.lt.s32.totalorder %v2820_v63, 2  ;;  %vm2841_vm11 = vcmp.lt.s32.totalorder %v2820_v63, 3 }
 0x370   :  { %v2848_v31 = vsel %vm2842_vm9, %v2835_v24, 920167782  ;;  %v2851_v4 = vsel %vm2839_vm8, %v2829_v14, %v2832_v62  ;;  %v4115_v1 = vadd.s32 4294967294, %v2771_v29  ;;  %v2843_v22 = vsel %vm2839_vm8, %v2823_v5, %v2826_v37 }
 0x371   :  { %v2849_v36 = vsel %vm2841_vm11, %v2832_v62, %v2848_v31  ;;  %v2852_v26 = vsel %vm2842_vm9, %v2838_v35, 1326507024  ;;  %v2845_v60 = vsel %vm2841_vm11, %v2829_v14, %v2844_v15  ;;  %v4121_v56 = vadd.s32 4294967169, %v2915_v30  ;;  %v7400_v35 = vld [vmem:[#allocation8_spill] sm:$0xff] }
 0x372   :  { %v2850_v53 = vsel %vm2840_vm12, %v2847_v55, %v2849_v36  ;;  %v2853_v2 = vsel %vm2841_vm11, %v2835_v24, %v2852_v26  ;;  %vm4116_vm10 = vcmp.lt.s32.totalorder %v4115_v1, 0  ;;  %v2790_v7 = vsel %vm2705_vm7, %v2789_v27, %v2765_v44 }
 0x373   :  { %v2854_v54 = vsel %vm2840_vm12, %v2851_v4, %v2853_v2  ;;  %v6703_v50 = vmul.u32.u64.low %v6670_v46, %v2850_v53  ;;  %v6704_v13 = vmul.u32.u64.high %v6670_v46, %v2850_v53, %v6703_v50  ;;  %v2774_v57 = vsel %vm4116_vm10, 0, %v4115_v1 }
 0x374   :  { %v6710_v9 = vmul.u32.u64.low %v6670_v46, %v2854_v54  ;;  %v6711_v11 = vmul.u32.u64.high %v6670_v46, %v2854_v54, %v6710_v9  ;;  %v2775_v42 = vsub.s32 32, %v2774_v57  ;;  %v2779_v47 = vsub.s32 4294967266, %v2774_v57 }
 0x375   :  { %v2846_v17 = vsel %vm2840_vm12, %v2843_v22, %v2845_v60  ;;  %v2921_v8 = vadd.s32 1, %v4121_v56  ;;  %v2693_v52 = vand.u32 3, %v6668_v33  ;;  %vm6717_vm13 = vcmp.le.f32.partialorder %v2703_v38, 0.7853982 }
 0x376   :  { %v2776_v49 = vshll.u32 %v6681_v41, %v2774_v57  ;;  %v2918_v44 = vand.u32 8388607, %v2911_v3  ;;  %v2777_v40 = vshrl.u32 %v2759_v19, %v2775_v42  ;;  %v2780_v28 = vadd.s32 127, %v2779_v47 }
 0x377   :  { %v2865_v23 = vadd.s32 1, %v6704_v13  ;;  %vm2922_vm14 = vcmp.gt.s32.totalorder %v2921_v8, 0  ;;  %v2792_v63 = vsel %vm6717_vm13, 0, %v2790_v7  ;;  %v2862_v33 = vmul.u32 %v6670_v46, %v2846_v17 }
 0x378   :  { %vm2864_vm15 = vc.u32 %v6711_v11, %v6703_v50  ;;  %v2923_v38 = vsel %vm2922_vm14, %v2921_v8, 0  ;;  %v2778_v37 = vor.u32 %v2777_v40, %v2776_v49  ;;  %v2781_v16 = vshll.u32 %v2780_v28, 23 }
 0x379   :  { %v2866_v41 = vsel %vm2864_vm15, %v2865_v23, %v6704_v13  ;;  %vm2691_vm0 = vweird.f32 %v5093_v48  ;;  %vm2694_vm1 = vcmp.lt.s32.totalorder %v2693_v52, 2  ;;  %v2925_v21 = vand.u32 31, %v2923_v38 }
 0x37a   :  { %v2867_v20 = vadd.s32 %v2866_v41, %v2862_v33  ;;  %vm2695_vm2 = vcmp.eq.s32.totalorder %v2693_v52, 0  ;;  %vm2698_vm3 = vcmp.eq.s32.totalorder %v2693_v52, 2  ;;  %v2782_v62 = vor.u32 4788187, %v2781_v16 }
 0x37b   :  { %v4501_v14 = vpop.eup %4500  ;;  %v6732_v45 = vadd.s32 3, %v2792_v63  ;;  %v2919_v24 = vor.u32 8388608, %v2918_v44  ;;  %v2926_v30 = vsub.s32 32, %v2925_v21  ;;  %v2785_v5 = vcvt.s32.f32 %v2778_v37 }
 0x37c   :  { %v4503_v46 = vpop.eup %4502  ;;  %v2699_v51 = vxor.u32 2147483648, %v4501_v14  ;;  %v2868_v19 = vadd.s32 536870912, %v2867_v20  ;;  %v2783_v12 = vand.u32 2147483647, %v2782_v62  ;;  %v3018_v27 = vand.u32 2139095040, %v7400_v35 }
 0x37d   :  { %v2696_v18 = vxor.u32 2147483648, %v4503_v46  ;;  %v2928_v55 = vshll.u32 %v7346_v43, %v2925_v21  ;;  %v2929_v31 = vshrl.u32 %v7347_v25, %v2926_v30  ;;  %v2932_v22 = vshrl.u32 %v7348_v32, %v2926_v30 }
 0x37e   :  { %v2700_v29 = vsel %vm2698_vm3, %v2699_v51, %v4503_v46  ;;  %v6735_v15 = vshrl.u32 %v2868_v19, 30  ;;  %v2786_v1 = vmul.f32 %v2785_v5, %v2783_v12  ;;  %v2935_v36 = vshrl.u32 %v7349_v61, %v2926_v30 }
 0x37f   :  { %v2697_v4 = vsel %vm2695_vm2, %v4501_v14, %v2696_v18  ;;  %v2924_v53 = vshrl.u32 %v2923_v38, 5  ;;  %v2931_v2 = vshll.u32 %v7347_v25, %v2925_v21  ;;  %v2930_v13 = vor.u32 %v2929_v31, %v2928_v55 }
 0x380   :  { %v2701_v26 = vsel %vm2694_vm1, %v2697_v4, %v2700_v29  ;;  %v2870_v60 = vshll.u32 %v6735_v15, 30  ;;  %v2787_v54 = vxor.u32 2147483648, %v2786_v1  ;;  %v2934_v57 = vshll.u32 %v7348_v32, %v2925_v21 }
 0x381   :  { %v2702_v56 = vsel %vm2691_vm0, nan, %v2701_v26  ;;  %v2933_v9 = vor.u32 %v2932_v22, %v2931_v2  ;;  %v2937_v42 = vshll.u32 %v7349_v61, %v2925_v21  ;;  %v2938_v47 = vshrl.u32 %v4574_v58, %v2926_v30 }
 0x382   :  { %v6748_v7 = vsub.s32 %v2867_v20, %v2870_v60  ;;  %3970 = vst [vmem:[#allocation2 + $0x98] sm:$0xff] %v2702_v56  ;;  %v2788_v17 = vsel %vm2705_vm7, %v2787_v54, %v2786_v1  ;;  %v2936_v8 = vor.u32 %v2935_v36, %v2934_v57  ;;  %v2940_v52 = vshll.u32 %v4574_v58, %v2925_v21 }
 0x383   :  { %v2941_v48 = vshrl.u32 %v7350_v59, %v2926_v30  ;;  %v2791_v49 = vsel %vm6717_vm13, %v7391_v6, %v2788_v17  ;;  %v2939_v40 = vor.u32 %v2938_v47, %v2937_v42  ;;  %v2959_v28 = vshll.u32 %v2919_v24, 8 }
 0x384   :  { %v2873_v44 = vsub.s32 0, %v6748_v7  ;;  %4504 = vcosq.f32 %v2791_v49  ;;  %vm2943_vm4 = vcmp.lt.s32.totalorder %v2924_v53, 1  ;;  %v3019_v63 = vshrl.u32 %v3018_v27, 23 }
 0x385   :  { %v2942_v23 = vor.u32 %v2941_v48, %v2940_v52  ;;  %4506 = vsinq.f32 %v2791_v49  ;;  %v2927_v38 = vshrl.u32 %v7346_v43, %v2926_v30  ;;  %vm2946_vm5 = vcmp.lt.s32.totalorder %v2924_v53, 4 }
 0x386   :  { %v4118_v33 = vmin.u32 %v2873_v44, %v6748_v7  ;;  %vm2944_vm6 = vcmp.lt.s32.totalorder %v2924_v53, 2  ;;  %v2948_v37 = vsel %vm2946_vm5, %v2936_v8, 2102212464  ;;  %v2951_v16 = vsel %vm2943_vm4, %v2930_v13, %v2933_v9 }
 0x387   :  { %v2952_v41 = vsel %vm2946_vm5, %v2939_v40, 920167782  ;;  %vm2945_vm7 = vcmp.lt.s32.totalorder %v2924_v53, 3  ;;  %v2947_v20 = vsel %vm2943_vm4, %v2927_v38, %v2930_v13  ;;  %v2955_v21 = vsel %vm2943_vm4, %v2933_v9, %v2936_v8 }
 0x388   :  { %v2875_v0 = vclz %v4118_v33  ;;  %v2949_v14 = vsel %vm2945_vm7, %v2933_v9, %v2948_v37  ;;  %v2953_v62 = vsel %vm2945_vm7, %v2936_v8, %v2952_v41  ;;  %v2956_v46 = vsel %vm2946_vm5, %v2942_v23, 1326507024 }
 0x389   :  { %v4125_v51 = vadd.s32 4294967169, %v3019_v63  ;;  %v2954_v24 = vsel %vm2944_vm6, %v2951_v16, %v2953_v62  ;;  %v2957_v18 = vsel %vm2945_vm7, %v2939_v40, %v2956_v46  ;;  %v2893_v12 = vsub.s32 4, %v6735_v15 }
 0x38a   :  { %v4119_v19 = vadd.s32 4294967294, %v2875_v0  ;;  %v2958_v30 = vsel %vm2944_vm6, %v2955_v21, %v2957_v18  ;;  %v6765_v5 = vmul.u32.u64.low %v2959_v28, %v2954_v24  ;;  %v6766_v27 = vmul.u32.u64.high %v2959_v28, %v2954_v24, %v6765_v5  ;;  %v7403_v21 = vld [vmem:[#allocation9_spill] sm:$0xff] }
 0x38b   :  { %v2950_v29 = vsel %vm2944_vm6, %v2947_v20, %v2949_v14  ;;  %v6770_v55 = vmul.u32.u64.low %v2959_v28, %v2958_v30  ;;  %v6771_v31 = vmul.u32.u64.high %v2959_v28, %v2958_v30, %v6770_v55  ;;  %v2797_v4 = vand.u32 3, %v6732_v45 }
 0x38c   :  { %vm4120_vm8 = vcmp.lt.s32.totalorder %v4119_v19, 0  ;;  %vm2809_vm9 = vcmp.lt.s32.totalorder %v7394_v10, 0  ;;  %v3025_v22 = vadd.s32 1, %v4125_v51  ;;  %v2863_v36 = vadd.s32 %v6703_v50, %v6711_v11 }
 0x38d   :  { %v2878_v1 = vsel %vm4120_vm8, 0, %v4119_v19  ;;  %v3015_v2 = vand.u32 2147483647, %v7400_v35  ;;  %v2894_v53 = vsel %vm2809_vm9, %v2893_v12, %v6735_v15  ;;  %v2966_v56 = vmul.u32 %v2959_v28, %v2950_v29 }
 0x38e   :  { %v2879_v26 = vsub.s32 32, %v2878_v1  ;;  %v2883_v60 = vsub.s32 4294967266, %v2878_v1  ;;  %v2969_v54 = vadd.s32 1, %v6766_v27  ;;  %vm3026_vm12 = vcmp.gt.s32.totalorder %v3025_v22, 0 }
 0x38f   :  { %v2880_v45 = vshll.u32 %v6748_v7, %v2878_v1  ;;  %vm2968_vm11 = vc.u32 %v6771_v31, %v6765_v5  ;;  %vm2795_vm10 = vweird.f32 %v7391_v6  ;;  %vm6788_vm13 = vcmp.le.f32.partialorder %v2807_v34, 0.7853982 }
 0x390   :  { %v2881_v13 = vshrl.u32 %v2863_v36, %v2879_v26  ;;  %v2884_v57 = vadd.s32 127, %v2883_v60  ;;  %v2970_v11 = vsel %vm2968_vm11, %v2969_v54, %v6766_v27  ;;  %v3027_v15 = vsel %vm3026_vm12, %v3025_v22, 0 }
 0x391   :  { %v4505_v9 = vpop.eup %4504  ;;  %v2896_v7 = vsel %vm6788_vm13, 0, %v2894_v53  ;;  %v2971_v17 = vadd.s32 %v2970_v11, %v2966_v56  ;;  %vm2798_vm14 = vcmp.lt.s32.totalorder %v2797_v4, 2  ;;  %v3022_v48 = vand.u32 8388607, %v3015_v2 }
 0x392   :  { %v2882_v42 = vor.u32 %v2881_v13, %v2880_v45  ;;  %v2885_v47 = vshll.u32 %v2884_v57, 23  ;;  %v4507_v8 = vpop.eup %4506  ;;  %v2803_v52 = vxor.u32 2147483648, %v4505_v9  ;;  %v3029_v34 = vand.u32 31, %v3027_v15 }
 0x393   :  { %v2800_v49 = vxor.u32 2147483648, %v4507_v8  ;;  %vm2802_vm15 = vcmp.eq.s32.totalorder %v2797_v4, 2  ;;  %v2972_v40 = vadd.s32 536870912, %v2971_v17  ;;  %vm2799_vm0 = vcmp.eq.s32.totalorder %v2797_v4, 0 }
 0x394   :  { %v2886_v44 = vor.u32 4788187, %v2885_v47  ;;  %v2804_v28 = vsel %vm2802_vm15, %v2803_v52, %v4507_v8  ;;  %v6797_v23 = vadd.s32 3, %v2896_v7  ;;  %v3030_v63 = vsub.s32 32, %v3029_v34 }
 0x395   :  { %v2801_v33 = vsel %vm2799_vm0, %v4505_v9, %v2800_v49  ;;  %v2889_v37 = vcvt.s32.f32 %v2882_v42  ;;  %v6799_v16 = vshrl.u32 %v2972_v40, 30  ;;  %v3023_v0 = vor.u32 8388608, %v3022_v48 }
 0x396   :  { %v2887_v38 = vand.u32 2147483647, %v2886_v44  ;;  %v2805_v41 = vsel %vm2798_vm14, %v2801_v33, %v2804_v28  ;;  %v3033_v20 = vshrl.u32 %v7347_v25, %v3030_v63  ;;  %v3119_v14 = vand.u32 2147483647, %v7403_v21 }
 0x397   :  { %v2806_v62 = vsel %vm2795_vm10, nan, %v2805_v41  ;;  %v2974_v51 = vshll.u32 %v6799_v16, 30  ;;  %v3036_v19 = vshrl.u32 %v7348_v32, %v3030_v63  ;;  %v3028_v24 = vshrl.u32 %v3027_v15, 5 }
 0x398   :  { %v2890_v46 = vmul.f32 %v2889_v37, %v2887_v38  ;;  %v3032_v18 = vshll.u32 %v7346_v43, %v3029_v34  ;;  %v3039_v12 = vshrl.u32 %v7349_v61, %v3030_v63  ;;  %v3122_v30 = vand.u32 2139095040, %v7403_v21  ;;  %3971 = vst [vmem:[#allocation2 + $0xa0] sm:$0xff] %v2806_v62 }
 0x399   :  { %v6811_v29 = vsub.s32 %v2971_v17, %v2974_v51  ;;  %v3035_v55 = vshll.u32 %v7347_v25, %v3029_v34  ;;  %v3042_v6 = vshrl.u32 %v4574_v58, %v3030_v63  ;;  %v3038_v4 = vshll.u32 %v7348_v32, %v3029_v34 }
 0x39a   :  { %v2891_v27 = vxor.u32 2147483648, %v2890_v46  ;;  %v3041_v1 = vshll.u32 %v7349_v61, %v3029_v34  ;;  %v3044_v22 = vshll.u32 %v4574_v58, %v3029_v34  ;;  %v3045_v36 = vshrl.u32 %v7350_v59, %v3030_v63 }
 0x39b   :  { %v2977_v60 = vsub.s32 0, %v6811_v29  ;;  %v3034_v53 = vor.u32 %v3033_v20, %v3032_v18  ;;  %v3037_v56 = vor.u32 %v3036_v19, %v3035_v55  ;;  %vm2913_vm1 = vcmp.lt.s32.totalorder %v7397_v39, 0 }
 0x39c   :  { %v2892_v26 = vsel %vm2809_vm9, %v2891_v27, %v2890_v46  ;;  %v3040_v45 = vor.u32 %v3039_v12, %v3038_v4  ;;  %v3043_v13 = vor.u32 %v3042_v6, %v3041_v1  ;;  %v3046_v57 = vor.u32 %v3045_v36, %v3044_v22 }
 0x39d   :  { %v2895_v54 = vsel %vm6788_vm13, %v7394_v10, %v2892_v26  ;;  %v4122_v11 = vmin.u32 %v2977_v60, %v6811_v29  ;;  %v3063_v15 = vshll.u32 %v3023_v0, 8  ;;  %v3123_v9 = vshrl.u32 %v3122_v30, 23 }
 0x39e   :  { %4508 = vcosq.f32 %v2895_v54  ;;  %v2997_v42 = vsub.s32 4, %v6799_v16  ;;  %v3031_v47 = vshrl.u32 %v7346_v43, %v3030_v63  ;;  %vm3047_vm2 = vcmp.lt.s32.totalorder %v3028_v24, 1 }
 0x39f   :  { %4510 = vsinq.f32 %v2895_v54  ;;  %v2979_v7 = vclz %v4122_v11  ;;  %vm3049_vm3 = vcmp.lt.s32.totalorder %v3028_v24, 3  ;;  %vm3050_vm4 = vcmp.lt.s32.totalorder %v3028_v24, 4 }
 0x3a0   :  { %v3055_v50 = vsel %vm3047_vm2, %v3034_v53, %v3037_v56  ;;  %v3052_v17 = vsel %vm3050_vm4, %v3040_v45, 2102212464  ;;  %v3056_v8 = vsel %vm3050_vm4, %v3043_v13, 920167782  ;;  %v3059_v52 = vsel %vm3047_vm2, %v3037_v56, %v3040_v45 }
 0x3a1   :  { %v3060_v48 = vsel %vm3050_vm4, %v3046_v57, 1326507024  ;;  %v4123_v34 = vadd.s32 4294967294, %v2979_v7  ;;  %vm3048_vm5 = vcmp.lt.s32.totalorder %v3028_v24, 2  ;;  %v3057_v49 = vsel %vm3049_vm3, %v3040_v45, %v3056_v8 }
 0x3a2   :  { %v3061_v44 = vsel %vm3049_vm3, %v3043_v13, %v3060_v48  ;;  %v3051_v40 = vsel %vm3047_vm2, %v3031_v47, %v3034_v53  ;;  %v3058_v28 = vsel %vm3048_vm5, %v3055_v50, %v3057_v49  ;;  %v4129_v33 = vadd.s32 4294967169, %v3123_v9 }
 0x3a3   :  { %v3062_v63 = vsel %vm3048_vm5, %v3059_v52, %v3061_v44  ;;  %vm4124_vm6 = vcmp.lt.s32.totalorder %v4123_v34, 0  ;;  %v3053_v38 = vsel %vm3049_vm3, %v3037_v56, %v3052_v17  ;;  %v2967_v51 = vadd.s32 %v6765_v5, %v6771_v31 }
 0x3a4   :  { %v6834_v37 = vmul.u32.u64.low %v3063_v15, %v3062_v63  ;;  %v6835_v41 = vmul.u32.u64.high %v3063_v15, %v3062_v63, %v6834_v37  ;;  %v2982_v0 = vsel %vm4124_vm6, 0, %v4123_v34  ;;  %v3129_v46 = vadd.s32 1, %v4129_v33  ;;  %v7406_v63 = vld [vmem:[#allocation10_spill] sm:$0xff] }
 0x3a5   :  { %v6837_v20 = vmul.u32.u64.low %v3063_v15, %v3058_v28  ;;  %v6838_v62 = vmul.u32.u64.high %v3063_v15, %v3058_v28, %v6837_v20  ;;  %v2983_v19 = vsub.s32 32, %v2982_v0  ;;  %v2987_v18 = vsub.s32 4294967266, %v2982_v0 }
 0x3a6   :  { %v2998_v12 = vsel %vm2913_vm1, %v2997_v42, %v6799_v16  ;;  %v2901_v30 = vand.u32 3, %v6797_v23  ;;  %vm6849_vm7 = vcmp.le.f32.partialorder %v2911_v3, 0.7853982  ;;  %v3054_v55 = vsel %vm3048_vm5, %v3051_v40, %v3053_v38 }
 0x3a7   :  { %vm3130_vm8 = vcmp.gt.s32.totalorder %v3129_v46, 0  ;;  %v2984_v6 = vshll.u32 %v6811_v29, %v2982_v0  ;;  %v2985_v5 = vshrl.u32 %v2967_v51, %v2983_v19  ;;  %v2988_v31 = vadd.s32 127, %v2987_v18 }
 0x3a8   :  { %vm3072_vm9 = vc.u32 %v6835_v41, %v6837_v20  ;;  %v3000_v16 = vsel %vm6849_vm7, 0, %v2998_v12  ;;  %v3073_v23 = vadd.s32 1, %v6838_v62  ;;  %v3126_v3 = vand.u32 8388607, %v3119_v14 }
 0x3a9   :  { %v3131_v4 = vsel %vm3130_vm8, %v3129_v46, 0  ;;  %v2986_v1 = vor.u32 %v2985_v5, %v2984_v6  ;;  %v2989_v24 = vshll.u32 %v2988_v31, 23  ;;  %v3070_v22 = vmul.u32 %v3063_v15, %v3054_v55 }
 0x3aa   :  { %v3133_v36 = vand.u32 31, %v3131_v4  ;;  %vm2899_vm12 = vweird.f32 %v7394_v10  ;;  %vm2902_vm11 = vcmp.lt.s32.totalorder %v2901_v30, 2  ;;  %vm2903_vm10 = vcmp.eq.s32.totalorder %v2901_v30, 0 }
 0x3ab   :  { %v4509_v26 = vpop.eup %4508  ;;  %v3074_v29 = vsel %vm3072_vm9, %v3073_v23, %v6838_v62  ;;  %vm2906_vm13 = vcmp.eq.s32.totalorder %v2901_v30, 2  ;;  %v2990_v56 = vor.u32 4788187, %v2989_v24  ;;  %v6864_v13 = vadd.s32 3, %v3000_v16 }
 0x3ac   :  { %v4511_v60 = vpop.eup %4510  ;;  %v2907_v53 = vxor.u32 2147483648, %v4509_v26  ;;  %v3075_v54 = vadd.s32 %v3074_v29, %v3070_v22  ;;  %v3127_v57 = vor.u32 8388608, %v3126_v3  ;;  %v3134_v11 = vsub.s32 32, %v3133_v36 }
 0x3ad   :  { %v2904_v45 = vxor.u32 2147483648, %v4511_v60  ;;  %v2991_v15 = vand.u32 2147483647, %v2990_v56  ;;  %v2993_v42 = vcvt.s32.f32 %v2986_v1  ;;  %v3136_v50 = vshll.u32 %v7346_v43, %v3133_v36 }
 0x3ae   :  { %v2908_v9 = vsel %vm2906_vm13, %v2907_v53, %v4511_v60  ;;  %v3076_v47 = vadd.s32 536870912, %v3075_v54  ;;  %v3137_v17 = vshrl.u32 %v7347_v25, %v3134_v11  ;;  %v3140_v8 = vshrl.u32 %v7348_v32, %v3134_v11 }
 0x3af   :  { %v2905_v7 = vsel %vm2903_vm10, %v4509_v26, %v2904_v45  ;;  %v2994_v48 = vmul.f32 %v2993_v42, %v2991_v15  ;;  %v3143_v49 = vshrl.u32 %v7349_v61, %v3134_v11  ;;  %v3132_v40 = vshrl.u32 %v3131_v4, 5 }
 0x3b0   :  { %v2909_v52 = vsel %vm2902_vm11, %v2905_v7, %v2908_v9  ;;  %v6870_v34 = vshrl.u32 %v3076_v47, 30  ;;  %v3139_v28 = vshll.u32 %v7347_v25, %v3133_v36  ;;  %v3226_v33 = vand.u32 2139095040, %v7406_v63 }
 0x3b1   :  { %v2910_v44 = vsel %vm2899_vm12, nan, %v2909_v52  ;;  %v2995_v38 = vxor.u32 2147483648, %v2994_v48  ;;  %v3138_v0 = vor.u32 %v3137_v17, %v3136_v50  ;;  %v3142_v62 = vshll.u32 %v7348_v32, %v3133_v36 }
 0x3b2   :  { %v3078_v37 = vshll.u32 %v6870_v34, 30  ;;  %3972 = vst [vmem:[#allocation2 + $0xa8] sm:$0xff] %v2910_v44  ;;  %v3145_v46 = vshll.u32 %v7349_v61, %v3133_v36  ;;  %v3146_v51 = vshrl.u32 %v4574_v58, %v3134_v11  ;;  %v3148_v19 = vshll.u32 %v4574_v58, %v3133_v36 }
 0x3b3   :  { %v3149_v10 = vshrl.u32 %v7350_v59, %v3134_v11  ;;  %v2996_v18 = vsel %vm2913_vm1, %v2995_v38, %v2994_v48  ;;  %v3141_v30 = vor.u32 %v3140_v8, %v3139_v28  ;;  %v3144_v55 = vor.u32 %v3143_v49, %v3142_v62 }
 0x3b4   :  { %v6885_v12 = vsub.s32 %v3075_v54, %v3078_v37  ;;  %v2999_v6 = vsel %vm6849_vm7, %v7397_v39, %v2996_v18  ;;  %v3147_v5 = vor.u32 %v3146_v51, %v3145_v46  ;;  %v3167_v16 = vshll.u32 %v3127_v57, 8 }
 0x3b5   :  { %v3150_v31 = vor.u32 %v3149_v10, %v3148_v19  ;;  %4512 = vcosq.f32 %v2999_v6  ;;  %v3135_v3 = vshrl.u32 %v7346_v43, %v3134_v11  ;;  %v3227_v4 = vshrl.u32 %v3226_v33, 23 }
 0x3b6   :  { %v3081_v23 = vsub.s32 0, %v6885_v12  ;;  %4514 = vsinq.f32 %v2999_v6  ;;  %vm3151_vm14 = vcmp.lt.s32.totalorder %v3132_v40, 1  ;;  %vm3153_vm15 = vcmp.lt.s32.totalorder %v3132_v40, 3 }
 0x3b7   :  { %vm3154_vm0 = vcmp.lt.s32.totalorder %v3132_v40, 4  ;;  %v3159_v22 = vsel %vm3151_vm14, %v3138_v0, %v3141_v30  ;;  %v3163_v26 = vsel %vm3151_vm14, %v3141_v30, %v3144_v55  ;;  %v3223_v60 = vand.u32 2147483647, %v7406_v63 }
 0x3b8   :  { %v4126_v1 = vmin.u32 %v3081_v23, %v6885_v12  ;;  %v3156_v24 = vsel %vm3154_vm0, %v3144_v55, 2102212464  ;;  %v3160_v36 = vsel %vm3154_vm0, %v3147_v5, 920167782  ;;  %v3164_v29 = vsel %vm3154_vm0, %v3150_v31, 1326507024 }
 0x3b9   :  { %v3161_v27 = vsel %vm3153_vm15, %v3144_v55, %v3160_v36  ;;  %v3101_v56 = vsub.s32 4, %v6870_v34  ;;  %vm3152_vm1 = vcmp.lt.s32.totalorder %v3132_v40, 2  ;;  %v3155_v54 = vsel %vm3151_vm14, %v3135_v3, %v3138_v0  ;;  %v7409_v36 = vld [vmem:[#allocation11_spill] sm:$0xff] }
 0x3ba   :  { %v3083_v53 = vclz %v4126_v1  ;;  %v3157_v45 = vsel %vm3153_vm15, %v3141_v30, %v3156_v24  ;;  %v3162_v57 = vsel %vm3152_vm1, %v3159_v22, %v3161_v27  ;;  %v3165_v11 = vsel %vm3153_vm15, %v3147_v5, %v3164_v29 }
 0x3bb   :  { %v4133_v9 = vadd.s32 4294967169, %v3227_v4  ;;  %v3166_v42 = vsel %vm3152_vm1, %v3163_v26, %v3165_v11  ;;  %v6898_v47 = vmul.u32.u64.low %v3167_v16, %v3162_v57  ;;  %v6899_v7 = vmul.u32.u64.high %v3167_v16, %v3162_v57, %v6898_v47 }
 0x3bc   :  { %v4127_v15 = vadd.s32 4294967294, %v3083_v53  ;;  %vm3017_vm2 = vcmp.lt.s32.totalorder %v7400_v35, 0  ;;  %v6903_v50 = vmul.u32.u64.low %v3167_v16, %v3166_v42  ;;  %v6904_v17 = vmul.u32.u64.high %v3167_v16, %v3166_v42, %v6903_v50 }
 0x3bd   :  { %vm6908_vm3 = vcmp.le.f32.partialorder %v3015_v2, 0.7853982  ;;  %v3158_v52 = vsel %vm3152_vm1, %v3155_v54, %v3157_v45  ;;  %v3233_v48 = vadd.s32 1, %v4133_v9  ;;  %v3005_v49 = vand.u32 3, %v6864_v13 }
 0x3be   :  { %vm4128_vm4 = vcmp.lt.s32.totalorder %v4127_v15, 0  ;;  %v3071_v44 = vadd.s32 %v6837_v20, %v6835_v41  ;;  %v3230_v28 = vand.u32 8388607, %v3223_v60  ;;  %vm3003_vm5 = vweird.f32 %v7397_v39 }
 0x3bf   :  { %v3086_v40 = vsel %vm4128_vm4, 0, %v4127_v15  ;;  %v3102_v2 = vsel %vm3017_vm2, %v3101_v56, %v6870_v34  ;;  %v3177_v37 = vadd.s32 1, %v6899_v7  ;;  %v3174_v13 = vmul.u32 %v3167_v16, %v3158_v52 }
 0x3c0   :  { %v3087_v33 = vsub.s32 32, %v3086_v40  ;;  %v3091_v38 = vsub.s32 4294967266, %v3086_v40  ;;  %v3088_v0 = vshll.u32 %v6885_v12, %v3086_v40  ;;  %vm3176_vm6 = vc.u32 %v6904_v17, %v6898_v47 }
 0x3c1   :  { %vm3234_vm7 = vcmp.gt.s32.totalorder %v3233_v48, 0  ;;  %v3178_v62 = vsel %vm3176_vm6, %v3177_v37, %v6899_v7  ;;  %v3104_v19 = vsel %vm6908_vm3, 0, %v3102_v2  ;;  %v3231_v34 = vor.u32 8388608, %v3230_v28 }
 0x3c2   :  { %v3089_v41 = vshrl.u32 %v3071_v44, %v3087_v33  ;;  %v3092_v20 = vadd.s32 127, %v3091_v38  ;;  %v3235_v46 = vsel %vm3234_vm7, %v3233_v48, 0  ;;  %v4513_v51 = vpop.eup %4512  ;;  %v3179_v10 = vadd.s32 %v3178_v62, %v3174_v13 }
 0x3c3   :  { %v3237_v18 = vand.u32 31, %v3235_v46  ;;  %v4515_v30 = vpop.eup %4514  ;;  %vm3006_vm8 = vcmp.lt.s32.totalorder %v3005_v49, 2  ;;  %v3011_v12 = vxor.u32 2147483648, %v4513_v51  ;;  %vm3010_vm9 = vcmp.eq.s32.totalorder %v3005_v49, 2 }
 0x3c4   :  { %v3090_v55 = vor.u32 %v3089_v41, %v3088_v0  ;;  %v3093_v6 = vshll.u32 %v3092_v20, 23  ;;  %v3008_v5 = vxor.u32 2147483648, %v4515_v30  ;;  %v3180_v31 = vadd.s32 536870912, %v3179_v10 }
 0x3c5   :  { %v3238_v16 = vsub.s32 32, %v3237_v18  ;;  %vm3007_vm12 = vcmp.eq.s32.totalorder %v3005_v49, 0  ;;  %v3012_v23 = vsel %vm3010_vm9, %v3011_v12, %v4515_v30  ;;  %v6928_v4 = vadd.s32 3, %v3104_v19 }
 0x3c6   :  { %v3094_v3 = vor.u32 4788187, %v3093_v6  ;;  %v3009_v1 = vsel %vm3007_vm12, %v4513_v51, %v3008_v5  ;;  %v3181_v24 = vshrl.u32 %v3180_v31, 30  ;;  %v6930_v22 = vshll.u32 %v3231_v34, 8 }
 0x3c7   :  { %v3327_v27 = vand.u32 2147483647, %v7409_v36  ;;  %v3013_v26 = vsel %vm3006_vm8, %v3009_v1, %v3012_v23  ;;  %v3097_v53 = vcvt.s32.f32 %v3090_v55  ;;  %v3241_v56 = vshrl.u32 %v7347_v25, %v3238_v16 }
 0x3c8   :  { %v3095_v29 = vand.u32 2147483647, %v3094_v3  ;;  %v3014_v54 = vsel %vm3003_vm5, nan, %v3013_v26  ;;  %v3182_v45 = vshll.u32 %v3181_v24, 30  ;;  %v3244_v57 = vshrl.u32 %v7348_v32, %v3238_v16 }
 0x3c9   :  { %v3330_v11 = vand.u32 2139095040, %v7409_v36  ;;  %v3236_v15 = vshrl.u32 %v3235_v46, 5  ;;  %v3240_v42 = vshll.u32 %v7346_v43, %v3237_v18  ;;  %v3247_v7 = vshrl.u32 %v7349_v61, %v3238_v16  ;;  %3973 = vst [vmem:[#allocation2 + $0xb0] sm:$0xff] %v3014_v54 }
 0x3ca   :  { %v3098_v9 = vmul.f32 %v3097_v53, %v3095_v29  ;;  %v6941_v50 = vsub.s32 %v3179_v10, %v3182_v45  ;;  %v3243_v52 = vshll.u32 %v7347_v25, %v3237_v18  ;;  %v3246_v48 = vshll.u32 %v7348_v32, %v3237_v18 }
 0x3cb   :  { %v3250_v39 = vshrl.u32 %v4574_v58, %v3238_v16  ;;  %v3242_v44 = vor.u32 %v3241_v56, %v3240_v42  ;;  %v3249_v40 = vshll.u32 %v7349_v61, %v3237_v18  ;;  %v3253_v28 = vshrl.u32 %v7350_v59, %v3238_v16 }
 0x3cc   :  { %v3099_v49 = vxor.u32 2147483648, %v3098_v9  ;;  %vm3121_vm11 = vcmp.lt.s32.totalorder %v7403_v21, 0  ;;  %v3185_v33 = vsub.s32 0, %v6941_v50  ;;  %v3245_v38 = vor.u32 %v3244_v57, %v3243_v52 }
 0x3cd   :  { %v3248_v2 = vor.u32 %v3247_v7, %v3246_v48  ;;  %v3252_v37 = vshll.u32 %v4574_v58, %v3237_v18  ;;  %v3175_v13 = vadd.s32 %v6898_v47, %v6904_v17  ;;  %v3251_v41 = vor.u32 %v3250_v39, %v3249_v40 }
 0x3ce   :  { %v3100_v0 = vsel %vm3017_vm2, %v3099_v49, %v3098_v9  ;;  %v3331_v20 = vshrl.u32 %v3330_v11, 23  ;;  %v4130_v46 = vmin.u32 %v3185_v33, %v6941_v50  ;;  %v3239_v51 = vshrl.u32 %v7346_v43, %v3238_v16 }
 0x3cf   :  { %v3103_v62 = vsel %vm6908_vm3, %v7400_v35, %v3100_v0  ;;  %v3254_v19 = vor.u32 %v3253_v28, %v3252_v37  ;;  %v3205_v10 = vsub.s32 4, %v3181_v24  ;;  %vm3255_vm10 = vcmp.lt.s32.totalorder %v3236_v15, 1 }
 0x3d0   :  { %4516 = vcosq.f32 %v3103_v62  ;;  %vm3258_vm13 = vcmp.lt.s32.totalorder %v3236_v15, 4  ;;  %v3187_v34 = vclz %v4130_v46  ;;  %v3263_v30 = vsel %vm3255_vm10, %v3242_v44, %v3245_v38 }
 0x3d1   :  { %4518 = vsinq.f32 %v3103_v62  ;;  %v3260_v18 = vsel %vm3258_vm13, %v3248_v2, 2102212464  ;;  %vm3256_vm14 = vcmp.lt.s32.totalorder %v3236_v15, 2  ;;  %vm3257_vm15 = vcmp.lt.s32.totalorder %v3236_v15, 3 }
 0x3d2   :  { %v3264_v47 = vsel %vm3258_vm13, %v3251_v41, 920167782  ;;  %v3267_v17 = vsel %vm3255_vm10, %v3245_v38, %v3248_v2  ;;  %v4131_v12 = vadd.s32 4294967294, %v3187_v34  ;;  %v3259_v8 = vsel %vm3255_vm10, %v3239_v51, %v3242_v44 }
 0x3d3   :  { %v3265_v55 = vsel %vm3257_vm15, %v3248_v2, %v3264_v47  ;;  %v3268_v6 = vsel %vm3258_vm13, %v3254_v19, 1326507024  ;;  %v3261_v5 = vsel %vm3257_vm15, %v3245_v38, %v3260_v18  ;;  %v4137_v23 = vadd.s32 4294967169, %v3331_v20  ;;  %v7412_v19 = vld [vmem:[#allocation12_spill] sm:$0xff] }
 0x3d4   :  { %v3266_v31 = vsel %vm3256_vm14, %v3263_v30, %v3265_v55  ;;  %v3269_v16 = vsel %vm3257_vm15, %v3251_v41, %v3268_v6  ;;  %vm4132_vm0 = vcmp.lt.s32.totalorder %v4131_v12, 0  ;;  %v3206_v53 = vsel %vm3121_vm11, %v3205_v10, %v3181_v24 }
 0x3d5   :  { %v3270_v3 = vsel %vm3256_vm14, %v3267_v17, %v3269_v16  ;;  %v6963_v1 = vmul.u32.u64.low %v6930_v22, %v3266_v31  ;;  %v6964_v26 = vmul.u32.u64.high %v6930_v22, %v3266_v31, %v6963_v1  ;;  %v3190_v29 = vsel %vm4132_vm0, 0, %v4131_v12 }
 0x3d6   :  { %v6970_v56 = vmul.u32.u64.low %v6930_v22, %v3270_v3  ;;  %v6971_v54 = vmul.u32.u64.high %v6930_v22, %v3270_v3, %v6970_v56  ;;  %v3191_v45 = vsub.s32 32, %v3190_v29  ;;  %v3195_v57 = vsub.s32 4294967266, %v3190_v29 }
 0x3d7   :  { %v3262_v11 = vsel %vm3256_vm14, %v3259_v8, %v3261_v5  ;;  %v3337_v9 = vadd.s32 1, %v4137_v23  ;;  %v3109_v42 = vand.u32 3, %v6928_v4  ;;  %vm6977_vm1 = vcmp.le.f32.partialorder %v3119_v14, 0.7853982 }
 0x3d8   :  { %v3192_v52 = vshll.u32 %v6941_v50, %v3190_v29  ;;  %v3334_v24 = vand.u32 8388607, %v3327_v27  ;;  %v3193_v48 = vshrl.u32 %v3175_v13, %v3191_v45  ;;  %v3196_v39 = vadd.s32 127, %v3195_v57 }
 0x3d9   :  { %v3281_v49 = vadd.s32 1, %v6964_v26  ;;  %vm3338_vm2 = vcmp.gt.s32.totalorder %v3337_v9, 0  ;;  %v3208_v15 = vsel %vm6977_vm1, 0, %v3206_v53  ;;  %v3278_v4 = vmul.u32 %v6930_v22, %v3262_v11 }
 0x3da   :  { %vm3280_vm3 = vc.u32 %v6971_v54, %v6963_v1  ;;  %v3339_v14 = vsel %vm3338_vm2, %v3337_v9, 0  ;;  %v3194_v44 = vor.u32 %v3193_v48, %v3192_v52  ;;  %v3197_v40 = vshll.u32 %v3196_v39, 23 }
 0x3db   :  { %v3282_v50 = vsel %vm3280_vm3, %v3281_v49, %v6964_v26  ;;  %vm3107_vm4 = vweird.f32 %v7400_v35  ;;  %vm3110_vm5 = vcmp.lt.s32.totalorder %v3109_v42, 2  ;;  %v3341_v33 = vand.u32 31, %v3339_v14 }
 0x3dc   :  { %v3283_v28 = vadd.s32 %v3282_v50, %v3278_v4  ;;  %vm3111_vm6 = vcmp.eq.s32.totalorder %v3109_v42, 0  ;;  %vm3114_vm7 = vcmp.eq.s32.totalorder %v3109_v42, 2  ;;  %v3198_v2 = vor.u32 4788187, %v3197_v40 }
 0x3dd   :  { %v4517_v38 = vpop.eup %4516  ;;  %v6992_v37 = vadd.s32 3, %v3208_v15  ;;  %v3335_v41 = vor.u32 8388608, %v3334_v24  ;;  %v3342_v20 = vsub.s32 32, %v3341_v33  ;;  %v3201_v51 = vcvt.s32.f32 %v3194_v44 }
 0x3de   :  { %v4519_v22 = vpop.eup %4518  ;;  %v3115_v0 = vxor.u32 2147483648, %v4517_v38  ;;  %v3284_v13 = vadd.s32 536870912, %v3283_v28  ;;  %v3199_v46 = vand.u32 2147483647, %v3198_v2  ;;  %v3434_v10 = vand.u32 2139095040, %v7412_v19 }
 0x3df   :  { %v3112_v62 = vxor.u32 2147483648, %v4519_v22  ;;  %v3344_v30 = vshll.u32 %v7346_v43, %v3341_v33  ;;  %v3345_v47 = vshrl.u32 %v7347_v25, %v3342_v20  ;;  %v3348_v8 = vshrl.u32 %v7348_v32, %v3342_v20 }
 0x3e0   :  { %v3116_v34 = vsel %vm3114_vm7, %v3115_v0, %v4519_v22  ;;  %v6995_v18 = vshrl.u32 %v3284_v13, 30  ;;  %v3202_v12 = vmul.f32 %v3201_v51, %v3199_v46  ;;  %v3351_v55 = vshrl.u32 %v7349_v61, %v3342_v20 }
 0x3e1   :  { %v3113_v17 = vsel %vm3111_vm6, %v4517_v38, %v3112_v62  ;;  %v3340_v31 = vshrl.u32 %v3339_v14, 5  ;;  %v3347_v16 = vshll.u32 %v7347_v25, %v3341_v33  ;;  %v3346_v26 = vor.u32 %v3345_v47, %v3344_v30 }
 0x3e2   :  { %v3117_v6 = vsel %vm3110_vm5, %v3113_v17, %v3116_v34  ;;  %v3286_v5 = vshll.u32 %v6995_v18, 30  ;;  %v3203_v3 = vxor.u32 2147483648, %v3202_v12  ;;  %v3350_v29 = vshll.u32 %v7348_v32, %v3341_v33 }
 0x3e3   :  { %v3118_v23 = vsel %vm3107_vm4, nan, %v3117_v6  ;;  %v3349_v56 = vor.u32 %v3348_v8, %v3347_v16  ;;  %v3353_v45 = vshll.u32 %v7349_v61, %v3341_v33  ;;  %v3354_v57 = vshrl.u32 %v4574_v58, %v3342_v20 }
 0x3e4   :  { %v7008_v53 = vsub.s32 %v3283_v28, %v3286_v5  ;;  %3974 = vst [vmem:[#allocation2 + $0xb8] sm:$0xff] %v3118_v23  ;;  %v3204_v11 = vsel %vm3121_vm11, %v3203_v3, %v3202_v12  ;;  %v3352_v9 = vor.u32 %v3351_v55, %v3350_v29  ;;  %v3356_v42 = vshll.u32 %v4574_v58, %v3341_v33 }
 0x3e5   :  { %v3357_v35 = vshrl.u32 %v7350_v59, %v3342_v20  ;;  %v3207_v52 = vsel %vm6977_vm1, %v7403_v21, %v3204_v11  ;;  %v3355_v48 = vor.u32 %v3354_v57, %v3353_v45  ;;  %v3375_v39 = vshll.u32 %v3335_v41, 8 }
 0x3e6   :  { %v3289_v24 = vsub.s32 0, %v7008_v53  ;;  %4520 = vcosq.f32 %v3207_v52  ;;  %vm3359_vm8 = vcmp.lt.s32.totalorder %v3340_v31, 1  ;;  %v3435_v15 = vshrl.u32 %v3434_v10, 23 }
 0x3e7   :  { %v3358_v49 = vor.u32 %v3357_v35, %v3356_v42  ;;  %4522 = vsinq.f32 %v3207_v52  ;;  %v3343_v14 = vshrl.u32 %v7346_v43, %v3342_v20  ;;  %vm3362_vm9 = vcmp.lt.s32.totalorder %v3340_v31, 4 }
 0x3e8   :  { %v4134_v4 = vmin.u32 %v3289_v24, %v7008_v53  ;;  %vm3360_vm12 = vcmp.lt.s32.totalorder %v3340_v31, 2  ;;  %v3364_v44 = vsel %vm3362_vm9, %v3352_v9, 2102212464  ;;  %v3367_v40 = vsel %vm3359_vm8, %v3346_v26, %v3349_v56 }
 0x3e9   :  { %v3368_v50 = vsel %vm3362_vm9, %v3355_v48, 920167782  ;;  %vm3361_vm11 = vcmp.lt.s32.totalorder %v3340_v31, 3  ;;  %v3363_v28 = vsel %vm3359_vm8, %v3343_v14, %v3346_v26  ;;  %v3371_v33 = vsel %vm3359_vm8, %v3349_v56, %v3352_v9 }
 0x3ea   :  { %v3291_v7 = vclz %v4134_v4  ;;  %v3365_v38 = vsel %vm3361_vm11, %v3349_v56, %v3364_v44  ;;  %v3369_v2 = vsel %vm3361_vm11, %v3352_v9, %v3368_v50  ;;  %v3372_v22 = vsel %vm3362_vm9, %v3358_v49, 1326507024 }
 0x3eb   :  { %v4141_v0 = vadd.s32 4294967169, %v3435_v15  ;;  %v3370_v41 = vsel %vm3360_vm12, %v3367_v40, %v3369_v2  ;;  %v3373_v62 = vsel %vm3361_vm11, %v3355_v48, %v3372_v22  ;;  %v3309_v46 = vsub.s32 4, %v6995_v18 }
 0x3ec   :  { %v4135_v13 = vadd.s32 4294967294, %v3291_v7  ;;  %v3374_v20 = vsel %vm3360_vm12, %v3371_v33, %v3373_v62  ;;  %v7025_v51 = vmul.u32.u64.low %v3375_v39, %v3370_v41  ;;  %v7026_v10 = vmul.u32.u64.high %v3375_v39, %v3370_v41, %v7025_v51  ;;  %v7415_v33 = vld [vmem:[#allocation13_spill] sm:$0xff] }
 0x3ed   :  { %v3366_v34 = vsel %vm3360_vm12, %v3363_v28, %v3365_v38  ;;  %v7030_v30 = vmul.u32.u64.low %v3375_v39, %v3374_v20  ;;  %v7031_v47 = vmul.u32.u64.high %v3375_v39, %v3374_v20, %v7030_v30  ;;  %v3213_v17 = vand.u32 3, %v6992_v37 }
 0x3ee   :  { %vm4136_vm10 = vcmp.lt.s32.totalorder %v4135_v13, 0  ;;  %vm3225_vm13 = vcmp.lt.s32.totalorder %v7406_v63, 0  ;;  %v3441_v8 = vadd.s32 1, %v4141_v0  ;;  %v3279_v55 = vadd.s32 %v6963_v1, %v6971_v54 }
 0x3ef   :  { %v3294_v12 = vsel %vm4136_vm10, 0, %v4135_v13  ;;  %v3431_v16 = vand.u32 2147483647, %v7412_v19  ;;  %v3310_v31 = vsel %vm3225_vm13, %v3309_v46, %v6995_v18  ;;  %v3382_v23 = vmul.u32 %v3375_v39, %v3366_v34 }
 0x3f0   :  { %v3295_v6 = vsub.s32 32, %v3294_v12  ;;  %v3299_v5 = vsub.s32 4294967266, %v3294_v12  ;;  %v3385_v3 = vadd.s32 1, %v7026_v10  ;;  %vm3442_vm14 = vcmp.gt.s32.totalorder %v3441_v8, 0 }
 0x3f1   :  { %v3296_v37 = vshll.u32 %v7008_v53, %v3294_v12  ;;  %vm3384_vm15 = vc.u32 %v7031_v47, %v7025_v51  ;;  %vm3211_vm0 = vweird.f32 %v7403_v21  ;;  %vm7048_vm1 = vcmp.le.f32.partialorder %v3223_v60, 0.7853982 }
 0x3f2   :  { %v3297_v26 = vshrl.u32 %v3279_v55, %v3295_v6  ;;  %v3300_v29 = vadd.s32 127, %v3299_v5  ;;  %v3386_v54 = vsel %vm3384_vm15, %v3385_v3, %v7026_v10  ;;  %v3443_v18 = vsel %vm3442_vm14, %v3441_v8, 0 }
 0x3f3   :  { %v4521_v56 = vpop.eup %4520  ;;  %v3312_v53 = vsel %vm7048_vm1, 0, %v3310_v31  ;;  %v3387_v11 = vadd.s32 %v3386_v54, %v3382_v23  ;;  %vm3214_vm2 = vcmp.lt.s32.totalorder %v3213_v17, 2  ;;  %v3438_v35 = vand.u32 8388607, %v3431_v16 }
 0x3f4   :  { %v3298_v45 = vor.u32 %v3297_v26, %v3296_v37  ;;  %v3301_v57 = vshll.u32 %v3300_v29, 23  ;;  %v4523_v9 = vpop.eup %4522  ;;  %v3219_v42 = vxor.u32 2147483648, %v4521_v56  ;;  %v3445_v60 = vand.u32 31, %v3443_v18 }
 0x3f5   :  { %v3216_v52 = vxor.u32 2147483648, %v4523_v9  ;;  %vm3218_vm3 = vcmp.eq.s32.totalorder %v3213_v17, 2  ;;  %v3388_v48 = vadd.s32 536870912, %v3387_v11  ;;  %vm3215_vm4 = vcmp.eq.s32.totalorder %v3213_v17, 0 }
 0x3f6   :  { %v3302_v24 = vor.u32 4788187, %v3301_v57  ;;  %v3220_v39 = vsel %vm3218_vm3, %v3219_v42, %v4523_v9  ;;  %v7057_v49 = vadd.s32 3, %v3312_v53  ;;  %v3446_v15 = vsub.s32 32, %v3445_v60 }
 0x3f7   :  { %v3217_v4 = vsel %vm3215_vm4, %v4521_v56, %v3216_v52  ;;  %v3305_v44 = vcvt.s32.f32 %v3298_v45  ;;  %v7059_v40 = vshrl.u32 %v3388_v48, 30  ;;  %v3439_v7 = vor.u32 8388608, %v3438_v35 }
 0x3f8   :  { %v3303_v14 = vand.u32 2147483647, %v3302_v24  ;;  %v3221_v50 = vsel %vm3214_vm2, %v3217_v4, %v3220_v39  ;;  %v3449_v28 = vshrl.u32 %v7347_v25, %v3446_v15  ;;  %v3535_v38 = vand.u32 2147483647, %v7415_v33 }
 0x3f9   :  { %v3222_v2 = vsel %vm3211_vm0, nan, %v3221_v50  ;;  %v3390_v0 = vshll.u32 %v7059_v40, 30  ;;  %v3452_v13 = vshrl.u32 %v7348_v32, %v3446_v15  ;;  %v3444_v41 = vshrl.u32 %v3443_v18, 5 }
 0x3fa   :  { %v3306_v22 = vmul.f32 %v3305_v44, %v3303_v14  ;;  %v3448_v62 = vshll.u32 %v7346_v43, %v3445_v60  ;;  %v3455_v46 = vshrl.u32 %v7349_v61, %v3446_v15  ;;  %v3538_v20 = vand.u32 2139095040, %v7415_v33  ;;  %3975 = vst [vmem:[#allocation2 + $0xc0] sm:$0xff] %v3222_v2 }
 0x3fb   :  { %v7071_v34 = vsub.s32 %v3387_v11, %v3390_v0  ;;  %v3451_v30 = vshll.u32 %v7347_v25, %v3445_v60  ;;  %v3458_v21 = vshrl.u32 %v4574_v58, %v3446_v15  ;;  %v3454_v17 = vshll.u32 %v7348_v32, %v3445_v60 }
 0x3fc   :  { %v3307_v10 = vxor.u32 2147483648, %v3306_v22  ;;  %v3457_v12 = vshll.u32 %v7349_v61, %v3445_v60  ;;  %v3460_v8 = vshll.u32 %v4574_v58, %v3445_v60  ;;  %v3461_v55 = vshrl.u32 %v7350_v59, %v3446_v15 }
 0x3fd   :  { %v3393_v5 = vsub.s32 0, %v7071_v34  ;;  %v3450_v31 = vor.u32 %v3449_v28, %v3448_v62  ;;  %v3453_v23 = vor.u32 %v3452_v13, %v3451_v30  ;;  %v3456_v37 = vor.u32 %v3455_v46, %v3454_v17 }
 0x3fe   :  { %v3308_v6 = vsel %vm3225_vm13, %v3307_v10, %v3306_v22  ;;  %v3459_v26 = vor.u32 %v3458_v21, %v3457_v12  ;;  %v3462_v29 = vor.u32 %v3461_v55, %v3460_v8  ;;  %v3479_v18 = vshll.u32 %v3439_v7, 8 }
 0x3ff   :  { %v3311_v3 = vsel %vm7048_vm1, %v7406_v63, %v3308_v6  ;;  %v4138_v54 = vmin.u32 %v3393_v5, %v7071_v34  ;;  %v3539_v56 = vshrl.u32 %v3538_v20, 23  ;;  %v3413_v45 = vsub.s32 4, %v7059_v40 }
 0x400   :  { %4524 = vcosq.f32 %v3311_v3  ;;  %v3447_v57 = vshrl.u32 %v7346_v43, %v3446_v15  ;;  %vm3463_vm5 = vcmp.lt.s32.totalorder %v3444_v41, 1  ;;  %vm3465_vm6 = vcmp.lt.s32.totalorder %v3444_v41, 3 }
 0x401   :  { %4526 = vsinq.f32 %v3311_v3  ;;  %v3395_v53 = vclz %v4138_v54  ;;  %vm3466_vm7 = vcmp.lt.s32.totalorder %v3444_v41, 4  ;;  %v3471_v11 = vsel %vm3463_vm5, %v3450_v31, %v3453_v23 }
 0x402   :  { %v3468_v1 = vsel %vm3466_vm7, %v3456_v37, 2102212464  ;;  %v3472_v9 = vsel %vm3466_vm7, %v3459_v26, 920167782  ;;  %v3475_v42 = vsel %vm3463_vm5, %v3453_v23, %v3456_v37  ;;  %v3476_v35 = vsel %vm3466_vm7, %v3462_v29, 1326507024 }
 0x403   :  { %v4139_v60 = vadd.s32 4294967294, %v3395_v53  ;;  %vm3464_vm8 = vcmp.lt.s32.totalorder %v3444_v41, 2  ;;  %v3473_v52 = vsel %vm3465_vm6, %v3456_v37, %v3472_v9  ;;  %v3477_v24 = vsel %vm3465_vm6, %v3459_v26, %v3476_v35 }
 0x404   :  { %v3467_v48 = vsel %vm3463_vm5, %v3447_v57, %v3450_v31  ;;  %v3474_v39 = vsel %vm3464_vm8, %v3471_v11, %v3473_v52  ;;  %v3478_v15 = vsel %vm3464_vm8, %v3475_v42, %v3477_v24  ;;  %v4145_v4 = vadd.s32 4294967169, %v3539_v56 }
 0x405   :  { %vm4140_vm9 = vcmp.lt.s32.totalorder %v4139_v60, 0  ;;  %v3469_v14 = vsel %vm3465_vm6, %v3453_v23, %v3468_v1  ;;  %v7093_v44 = vmul.u32.u64.low %v3479_v18, %v3478_v15  ;;  %v7094_v50 = vmul.u32.u64.high %v3479_v18, %v3478_v15, %v7093_v44 }
 0x406   :  { %v3398_v7 = vsel %vm4140_vm9, 0, %v4139_v60  ;;  %v7096_v28 = vmul.u32.u64.low %v3479_v18, %v3474_v39  ;;  %v7097_v2 = vmul.u32.u64.high %v3479_v18, %v3474_v39, %v7096_v28  ;;  %v3545_v22 = vadd.s32 1, %v4145_v4  ;;  %v7418_v39 = vld [vmem:[#allocation14_spill] sm:$0xff] }
 0x407   :  { %v3383_v0 = vadd.s32 %v7025_v51, %v7031_v47  ;;  %v3399_v13 = vsub.s32 32, %v3398_v7  ;;  %v3403_v62 = vsub.s32 4294967266, %v3398_v7  ;;  %v3317_v46 = vand.u32 3, %v7057_v49 }
 0x408   :  { %vm3329_vm12 = vcmp.lt.s32.totalorder %v7409_v36, 0  ;;  %v3470_v20 = vsel %vm3464_vm8, %v3467_v48, %v3469_v14  ;;  %vm3546_vm11 = vcmp.gt.s32.totalorder %v3545_v22, 0  ;;  %vm3315_vm10 = vweird.f32 %v7406_v63 }
 0x409   :  { %v3400_v10 = vshll.u32 %v7071_v34, %v3398_v7  ;;  %v3401_v30 = vshrl.u32 %v3383_v0, %v3399_v13  ;;  %v3404_v21 = vadd.s32 127, %v3403_v62  ;;  %vm3488_vm13 = vc.u32 %v7094_v50, %v7096_v28 }
 0x40a   :  { %v3414_v51 = vsel %vm3329_vm12, %v3413_v45, %v7059_v40  ;;  %v3489_v47 = vadd.s32 1, %v7097_v2  ;;  %v7115_v49 = vand.u32 8388607, %v3535_v38  ;;  %v3547_v41 = vsel %vm3546_vm11, %v3545_v22, 0 }
 0x40b   :  { %v3402_v17 = vor.u32 %v3401_v30, %v3400_v10  ;;  %v3405_v12 = vshll.u32 %v3404_v21, 23  ;;  %v3486_v8 = vmul.u32 %v3479_v18, %v3470_v20  ;;  %v3549_v34 = vand.u32 31, %v3547_v41 }
 0x40c   :  { %vm3318_vm14 = vcmp.lt.s32.totalorder %v3317_v46, 2  ;;  %vm3319_vm15 = vcmp.eq.s32.totalorder %v3317_v46, 0  ;;  %vm7119_vm0 = vcmp.le.f32.partialorder %v3327_v27, 0.7853982  ;;  %v3490_v40 = vsel %vm3488_vm13, %v3489_v47, %v7097_v2 }
 0x40d   :  { %v4525_v55 = vpop.eup %4524  ;;  %vm3322_vm1 = vcmp.eq.s32.totalorder %v3317_v46, 2  ;;  %v3406_v23 = vor.u32 4788187, %v3405_v12  ;;  %v3491_v3 = vadd.s32 %v3490_v40, %v3486_v8  ;;  %v3416_v26 = vsel %vm7119_vm0, 0, %v3414_v51 }
 0x40e   :  { %v4527_v5 = vpop.eup %4526  ;;  %v3323_v31 = vxor.u32 2147483648, %v4525_v55  ;;  %v3543_v29 = vor.u32 8388608, %v7115_v49  ;;  %v3550_v54 = vsub.s32 32, %v3549_v34  ;;  %v3409_v27 = vcvt.s32.f32 %v3402_v17 }
 0x40f   :  { %v3320_v37 = vxor.u32 2147483648, %v4527_v5  ;;  %v3407_v56 = vand.u32 2147483647, %v3406_v23  ;;  %v3492_v45 = vadd.s32 536870912, %v3491_v3  ;;  %v3552_v53 = vshll.u32 %v7346_v43, %v3549_v34 }
 0x410   :  { %v3324_v18 = vsel %vm3322_vm1, %v3323_v31, %v4527_v5  ;;  %v3553_v11 = vshrl.u32 %v7347_v25, %v3550_v54  ;;  %v3556_v1 = vshrl.u32 %v7348_v32, %v3550_v54  ;;  %v3559_v60 = vshrl.u32 %v7349_v61, %v3550_v54 }
 0x411   :  { %v3321_v57 = vsel %vm3319_vm15, %v4525_v55, %v3320_v37  ;;  %v3410_v42 = vmul.f32 %v3409_v27, %v3407_v56  ;;  %v7132_v35 = vshrl.u32 %v3492_v45, 30  ;;  %v3548_v24 = vshrl.u32 %v3547_v41, 5 }
 0x412   :  { %v3325_v9 = vsel %vm3318_vm14, %v3321_v57, %v3324_v18  ;;  %v3555_v48 = vshll.u32 %v7347_v25, %v3549_v34  ;;  %v3642_v15 = vand.u32 2139095040, %v7418_v39  ;;  %v3554_v44 = vor.u32 %v3553_v11, %v3552_v53 }
 0x413   :  { %v3326_v52 = vsel %vm3315_vm10, nan, %v3325_v9  ;;  %v3411_v4 = vxor.u32 2147483648, %v3410_v42  ;;  %v3494_v14 = vshll.u32 %v7132_v35, 30  ;;  %v3558_v7 = vshll.u32 %v7348_v32, %v3549_v34 }
 0x414   :  { %3976 = vst [vmem:[#allocation2 + $0xc8] sm:$0xff] %v3326_v52  ;;  %v3561_v2 = vshll.u32 %v7349_v61, %v3549_v34  ;;  %v3562_v22 = vshrl.u32 %v4574_v58, %v3550_v54  ;;  %v3564_v0 = vshll.u32 %v4574_v58, %v3549_v34  ;;  %v3565_v63 = vshrl.u32 %v7350_v59, %v3550_v54 }
 0x415   :  { %v3412_v13 = vsel %vm3329_vm12, %v3411_v4, %v3410_v42  ;;  %v7147_v62 = vsub.s32 %v3491_v3, %v3494_v14  ;;  %v3557_v46 = vor.u32 %v3556_v1, %v3555_v48  ;;  %v3560_v20 = vor.u32 %v3559_v60, %v3558_v7 }
 0x416   :  { %v3415_v10 = vsel %vm7119_vm0, %v7409_v36, %v3412_v13  ;;  %v3420_v30 = vadd.s32 3, %v3416_v26  ;;  %v3563_v21 = vor.u32 %v3562_v22, %v3561_v2  ;;  %v3566_v51 = vor.u32 %v3565_v63, %v3564_v0 }
 0x417   :  { %4528 = vcosq.f32 %v3415_v10  ;;  %v3497_v47 = vsub.s32 0, %v7147_v62  ;;  %v3551_v49 = vshrl.u32 %v7346_v43, %v3550_v54  ;;  %v3643_v41 = vshrl.u32 %v3642_v15, 23 }
 0x418   :  { %4530 = vsinq.f32 %v3415_v10  ;;  %vm3567_vm2 = vcmp.lt.s32.totalorder %v3548_v24, 1  ;;  %vm3569_vm3 = vcmp.lt.s32.totalorder %v3548_v24, 3  ;;  %vm3570_vm4 = vcmp.lt.s32.totalorder %v3548_v24, 4 }
 0x419   :  { %v4142_v17 = vmin.u32 %v3497_v47, %v7147_v62  ;;  %v3572_v12 = vsel %vm3570_vm4, %v3560_v20, 2102212464  ;;  %v3575_v8 = vsel %vm3567_vm2, %v3554_v44, %v3557_v46  ;;  %v3576_v34 = vsel %vm3570_vm4, %v3563_v21, 920167782 }
 0x41a   :  { %v3577_v55 = vsel %vm3569_vm3, %v3560_v20, %v3576_v34  ;;  %v3579_v6 = vsel %vm3567_vm2, %v3557_v46, %v3560_v20  ;;  %v3580_v40 = vsel %vm3570_vm4, %v3566_v51, 1326507024  ;;  %v3583_v5 = vshll.u32 %v3543_v29, 8 }
 0x41b   :  { %v3499_v31 = vclz %v4142_v17  ;;  %v3517_v23 = vsub.s32 4, %v7132_v35  ;;  %vm3568_vm5 = vcmp.lt.s32.totalorder %v3548_v24, 2  ;;  %v3571_v3 = vsel %vm3567_vm2, %v3551_v49, %v3554_v44 }
 0x41c   :  { %v3573_v37 = vsel %vm3569_vm3, %v3557_v46, %v3572_v12  ;;  %v3578_v26 = vsel %vm3568_vm5, %v3575_v8, %v3577_v55  ;;  %v3581_v54 = vsel %vm3569_vm3, %v3563_v21, %v3580_v40  ;;  %v4149_v18 = vadd.s32 4294967169, %v3643_v41 }
 0x41d   :  { %v4143_v56 = vadd.s32 4294967294, %v3499_v31  ;;  %v3582_v27 = vsel %vm3568_vm5, %v3579_v6, %v3581_v54  ;;  %v7159_v45 = vmul.u32.u64.low %v3583_v5, %v3578_v26  ;;  %v7160_v57 = vmul.u32.u64.high %v3583_v5, %v3578_v26, %v7159_v45 }
 0x41e   :  { %v7163_v53 = vmul.u32.u64.low %v3583_v5, %v3582_v27  ;;  %v7164_v11 = vmul.u32.u64.high %v3583_v5, %v3582_v27, %v7163_v53  ;;  %vm3433_vm6 = vcmp.lt.s32.totalorder %v7412_v19, 0  ;;  %v3574_v29 = vsel %vm3568_vm5, %v3571_v3, %v3573_v37  ;;  %v7421_v3 = vld [vmem:[#allocation15_spill] sm:$0xff] }
 0x41f   :  { %vm4144_vm7 = vcmp.lt.s32.totalorder %v4143_v56, 0  ;;  %v3649_v1 = vadd.s32 1, %v4149_v18  ;;  %v3421_v9 = vand.u32 3, %v3420_v30  ;;  %v3487_v42 = vadd.s32 %v7096_v28, %v7094_v50 }
 0x420   :  { %v3502_v60 = vsel %vm4144_vm7, 0, %v4143_v56  ;;  %v3639_v52 = vand.u32 2147483647, %v7418_v39  ;;  %vm3419_vm8 = vweird.f32 %v7409_v36  ;;  %v3518_v15 = vsel %vm3433_vm6, %v3517_v23, %v7132_v35 }
 0x421   :  { %v3503_v24 = vsub.s32 32, %v3502_v60  ;;  %v3507_v48 = vsub.s32 4294967266, %v3502_v60  ;;  %v3593_v4 = vadd.s32 1, %v7160_v57  ;;  %v3504_v14 = vshll.u32 %v7147_v62, %v3502_v60 }
 0x422   :  { %v3590_v44 = vmul.u32 %v3583_v5, %v3574_v29  ;;  %vm3592_vm9 = vc.u32 %v7164_v11, %v7159_v45  ;;  %vm3650_vm12 = vcmp.gt.s32.totalorder %v3649_v1, 0  ;;  %vm7181_vm11 = vcmp.le.f32.partialorder %v3431_v16, 0.7853982 }
 0x423   :  { %v3505_v50 = vshrl.u32 %v3487_v42, %v3503_v24  ;;  %v3508_v28 = vadd.s32 127, %v3507_v48  ;;  %v3594_v7 = vsel %vm3592_vm9, %v3593_v4, %v7160_v57  ;;  %v3651_v2 = vsel %vm3650_vm12, %v3649_v1, 0 }
 0x424   :  { %v4529_v22 = vpop.eup %4528  ;;  %v3595_v35 = vadd.s32 %v3594_v7, %v3590_v44  ;;  %v3646_v63 = vand.u32 8388607, %v3639_v52  ;;  %v3653_v13 = vand.u32 31, %v3651_v2  ;;  %v3520_v30 = vsel %vm7181_vm11, 0, %v3518_v15 }
 0x425   :  { %v4531_v62 = vpop.eup %4530  ;;  %v3427_v46 = vxor.u32 2147483648, %v4529_v22  ;;  %v3506_v20 = vor.u32 %v3505_v50, %v3504_v14  ;;  %v3509_v10 = vshll.u32 %v3508_v28, 23  ;;  %vm3426_vm10 = vcmp.eq.s32.totalorder %v3421_v9, 2 }
 0x426   :  { %v3424_v21 = vxor.u32 2147483648, %v4531_v62  ;;  %v3596_v51 = vadd.s32 536870912, %v3595_v35  ;;  %v3654_v47 = vsub.s32 32, %v3653_v13  ;;  %vm3422_vm13 = vcmp.lt.s32.totalorder %v3421_v9, 2 }
 0x427   :  { %vm3423_vm14 = vcmp.eq.s32.totalorder %v3421_v9, 0  ;;  %v3428_v16 = vsel %vm3426_vm10, %v3427_v46, %v4531_v62  ;;  %v3510_v49 = vor.u32 4788187, %v3509_v10  ;;  %v7189_v17 = vadd.s32 3, %v3520_v30 }
 0x428   :  { %v3425_v41 = vsel %vm3423_vm14, %v4529_v22, %v3424_v21  ;;  %v7191_v12 = vshrl.u32 %v3596_v51, 30  ;;  %v3647_v8 = vor.u32 8388608, %v3646_v63  ;;  %v3513_v6 = vcvt.s32.f32 %v3506_v20 }
 0x429   :  { %v3429_v34 = vsel %vm3422_vm13, %v3425_v41, %v3428_v16  ;;  %v3511_v55 = vand.u32 2147483647, %v3510_v49  ;;  %v3657_v40 = vshrl.u32 %v7347_v25, %v3654_v47  ;;  %v3660_v23 = vshrl.u32 %v7348_v32, %v3654_v47 }
 0x42a   :  { %v3430_v5 = vsel %vm3419_vm8, nan, %v3429_v34  ;;  %v3598_v31 = vshll.u32 %v7191_v12, 30  ;;  %v3850_v37 = vand.u32 2139095040, %v7421_v3  ;;  %v3652_v54 = vshrl.u32 %v3651_v2, 5 }
 0x42b   :  { %v3514_v26 = vmul.f32 %v3513_v6, %v3511_v55  ;;  %v3656_v18 = vshll.u32 %v7346_v43, %v3653_v13  ;;  %v3663_v56 = vshrl.u32 %v7349_v61, %v3654_v47  ;;  %3977 = vst [vmem:[#allocation2 + $0xd0] sm:$0xff] %v3430_v5  ;;  %v3659_v57 = vshll.u32 %v7347_v25, %v3653_v13 }
 0x42c   :  { %v7201_v27 = vsub.s32 %v3595_v35, %v3598_v31  ;;  %v3662_v36 = vshll.u32 %v7348_v32, %v3653_v13  ;;  %v3666_v53 = vshrl.u32 %v4574_v58, %v3654_v47  ;;  %v3665_v9 = vshll.u32 %v7349_v61, %v3653_v13 }
 0x42d   :  { %v3515_v29 = vxor.u32 2147483648, %v3514_v26  ;;  %v3658_v1 = vor.u32 %v3657_v40, %v3656_v18  ;;  %v3669_v42 = vshrl.u32 %v7350_v59, %v3654_v47  ;;  %v3661_v24 = vor.u32 %v3660_v23, %v3659_v57 }
 0x42e   :  { %v3601_v60 = vsub.s32 0, %v7201_v27  ;;  %v3664_v48 = vor.u32 %v3663_v56, %v3662_v36  ;;  %v3668_v15 = vshll.u32 %v4574_v58, %v3653_v13  ;;  %v3667_v14 = vor.u32 %v3666_v53, %v3665_v9 }
 0x42f   :  { %v3516_v4 = vsel %vm3433_vm6, %v3515_v29, %v3514_v26  ;;  %v3687_v44 = vshll.u32 %v3647_v8, 8  ;;  %v3847_v50 = vand.u32 2147483647, %v7421_v3  ;;  %v3851_v22 = vshrl.u32 %v3850_v37, 23 }
 0x430   :  { %v3519_v28 = vsel %vm7181_vm11, %v7412_v19, %v3516_v4  ;;  %v4146_v7 = vmin.u32 %v3601_v60, %v7201_v27  ;;  %v3670_v2 = vor.u32 %v3669_v42, %v3668_v15  ;;  %v3655_v35 = vshrl.u32 %v7346_v43, %v3654_v47 }
 0x431   :  { %4532 = vcosq.f32 %v3519_v28  ;;  %vm3671_vm15 = vcmp.lt.s32.totalorder %v3652_v54, 1  ;;  %vm3674_vm0 = vcmp.lt.s32.totalorder %v3652_v54, 4  ;;  %vm3672_vm1 = vcmp.lt.s32.totalorder %v3652_v54, 2 }
 0x432   :  { %4534 = vsinq.f32 %v3519_v28  ;;  %v3603_v63 = vclz %v4146_v7  ;;  %v3676_v13 = vsel %vm3674_vm0, %v3664_v48, 2102212464  ;;  %v3679_v62 = vsel %vm3671_vm15, %v3658_v1, %v3661_v24 }
 0x433   :  { %vm3673_vm2 = vcmp.lt.s32.totalorder %v3652_v54, 3  ;;  %v3680_v46 = vsel %vm3674_vm0, %v3667_v14, 920167782  ;;  %v3683_v20 = vsel %vm3671_vm15, %v3661_v24, %v3664_v48  ;;  %v3675_v0 = vsel %vm3671_vm15, %v3655_v35, %v3658_v1 }
 0x434   :  { %v4147_v10 = vadd.s32 4294967294, %v3603_v63  ;;  %v3681_v30 = vsel %vm3673_vm2, %v3664_v48, %v3680_v46  ;;  %v3684_v21 = vsel %vm3674_vm0, %v3670_v2, 1326507024  ;;  %v3677_v51 = vsel %vm3673_vm2, %v3661_v24, %v3676_v13 }
 0x435   :  { %v3682_v16 = vsel %vm3672_vm1, %v3679_v62, %v3681_v30  ;;  %v3685_v49 = vsel %vm3673_vm2, %v3667_v14, %v3684_v21  ;;  %v4157_v41 = vadd.s32 4294967169, %v3851_v22  ;;  %v3591_v55 = vadd.s32 %v7159_v45, %v7164_v11 }
 0x436   :  { %vm4148_vm3 = vcmp.lt.s32.totalorder %v4147_v10, 0  ;;  %v3686_v47 = vsel %vm3672_vm1, %v3683_v20, %v3685_v49  ;;  %v7220_v8 = vmul.u32.u64.low %v3687_v44, %v3682_v16  ;;  %v7221_v34 = vmul.u32.u64.high %v3687_v44, %v3682_v16, %v7220_v8 }
 0x437   :  { %v3606_v6 = vsel %vm4148_vm3, 0, %v4147_v10  ;;  %v7226_v40 = vmul.u32.u64.low %v3687_v44, %v3686_v47  ;;  %v7227_v5 = vmul.u32.u64.high %v3687_v44, %v3686_v47, %v7226_v40  ;;  %v3678_v37 = vsel %vm3672_vm1, %v3675_v0, %v3677_v51 }
 0x438   :  { %v3607_v31 = vsub.s32 32, %v3606_v6  ;;  %v3611_v23 = vsub.s32 4294967266, %v3606_v6  ;;  %v3857_v26 = vadd.s32 1, %v4157_v41  ;;  %v3525_v18 = vand.u32 3, %v7189_v17 }
 0x439   :  { %v3608_v56 = vshll.u32 %v7201_v27, %v3606_v6  ;;  %v3697_v53 = vadd.s32 1, %v7221_v34  ;;  %v3621_v45 = vsub.s32 4, %v7191_v12  ;;  %v3694_v11 = vmul.u32 %v3687_v44, %v3678_v37 }
 0x43a   :  { %v3609_v57 = vshrl.u32 %v3591_v55, %v3607_v31  ;;  %v3612_v36 = vadd.s32 127, %v3611_v23  ;;  %vm3858_vm4 = vcmp.gt.s32.totalorder %v3857_v26, 0  ;;  %vm3696_vm5 = vc.u32 %v7227_v5, %v7220_v8 }
 0x43b   :  { %v3859_v29 = vsel %vm3858_vm4, %v3857_v26, 0  ;;  %v3698_v9 = vsel %vm3696_vm5, %v3697_v53, %v7221_v34  ;;  %v3854_v17 = vand.u32 8388607, %v3847_v50  ;;  %vm3523_vm6 = vweird.f32 %v7412_v19 }
 0x43c   :  { %v3610_v1 = vor.u32 %v3609_v57, %v3608_v56  ;;  %v3613_v54 = vshll.u32 %v3612_v36, 23  ;;  %vm3537_vm7 = vcmp.lt.s32.totalorder %v7415_v33, 0  ;;  %v3699_v27 = vadd.s32 %v3698_v9, %v3694_v11 }
 0x43d   :  { %v3861_v42 = vand.u32 31, %v3859_v29  ;;  %vm3526_vm8 = vcmp.lt.s32.totalorder %v3525_v18, 2  ;;  %vm3527_vm9 = vcmp.eq.s32.totalorder %v3525_v18, 0  ;;  %vm3530_vm12 = vcmp.eq.s32.totalorder %v3525_v18, 2 }
 0x43e   :  { %v4533_v60 = vpop.eup %4532  ;;  %vm7243_vm11 = vcmp.le.f32.partialorder %v3535_v38, 0.7853982  ;;  %v3614_v48 = vor.u32 4788187, %v3613_v54  ;;  %v3622_v14 = vsel %vm3537_vm7, %v3621_v45, %v7191_v12  ;;  %v3700_v44 = vadd.s32 536870912, %v3699_v27 }
 0x43f   :  { %v4535_v15 = vpop.eup %4534  ;;  %v3531_v4 = vxor.u32 2147483648, %v4533_v60  ;;  %v3862_v28 = vsub.s32 32, %v3861_v42  ;;  %v3617_v22 = vcvt.s32.f32 %v3610_v1  ;;  %v3855_v35 = vor.u32 8388608, %v3854_v17 }
 0x440   :  { %v3528_v7 = vxor.u32 2147483648, %v4535_v15  ;;  %v3615_v2 = vand.u32 2147483647, %v3614_v48  ;;  %v7250_v13 = vshrl.u32 %v3700_v44, 30  ;;  %v3864_v38 = vshll.u32 %v7346_v43, %v3861_v42 }
 0x441   :  { %v3532_v63 = vsel %vm3530_vm12, %v3531_v4, %v4535_v15  ;;  %v3865_v62 = vshrl.u32 %v7347_v25, %v3862_v28  ;;  %v3868_v10 = vshrl.u32 %v7348_v32, %v3862_v28  ;;  %v3871_v12 = vshrl.u32 %v7349_v61, %v3862_v28 }
 0x442   :  { %v3529_v46 = vsel %vm3527_vm9, %v4533_v60, %v3528_v7  ;;  %v3618_v20 = vmul.f32 %v3617_v22, %v3615_v2  ;;  %v3702_v30 = vshll.u32 %v7250_v13, 30  ;;  %v3860_v21 = vshrl.u32 %v3859_v29, 5 }
 0x443   :  { %v3533_v0 = vsel %vm3526_vm8, %v3529_v46, %v3532_v63  ;;  %v3867_v51 = vshll.u32 %v7347_v25, %v3861_v42  ;;  %v3866_v41 = vor.u32 %v3865_v62, %v3864_v38  ;;  %v3870_v47 = vshll.u32 %v7348_v32, %v3861_v42 }
 0x444   :  { %v3534_v16 = vsel %vm3523_vm6, nan, %v3533_v0  ;;  %v3619_v49 = vxor.u32 2147483648, %v3618_v20  ;;  %v3703_v34 = vsub.s32 %v3699_v27, %v3702_v30  ;;  %v3873_v6 = vshll.u32 %v7349_v61, %v3861_v42 }
 0x445   :  { %v3869_v55 = vor.u32 %v3868_v10, %v3867_v51  ;;  %v3874_v40 = vshrl.u32 %v4574_v58, %v3862_v28  ;;  %3978 = vst [vmem:[#allocation2 + $0xd8] sm:$0xff] %v3534_v16  ;;  %v3872_v23 = vor.u32 %v3871_v12, %v3870_v47  ;;  %v3876_v25 = vshll.u32 %v4574_v58, %v3861_v42 }
 0x446   :  { %v3620_v31 = vsel %vm3537_vm7, %v3619_v49, %v3618_v20  ;;  %v3877_v19 = vshrl.u32 %v7350_v59, %v3862_v28  ;;  %v3705_v32 = vsub.s32 0, %v3703_v34  ;;  %v3624_v61 = vsel %vm7243_vm11, 0, %v3622_v14 }
 0x447   :  { %v3623_v37 = vsel %vm7243_vm11, %v7415_v33, %v3620_v31  ;;  %v3875_v26 = vor.u32 %v3874_v40, %v3873_v6  ;;  %v3895_v56 = vshll.u32 %v3855_v35, 8  ;;  %vm3879_vm10 = vcmp.lt.s32.totalorder %v3860_v21, 1 }
 0x448   :  { %4536 = vcosq.f32 %v3623_v37  ;;  %v3878_v18 = vor.u32 %v3877_v19, %v3876_v25  ;;  %v4150_v57 = vmin.u32 %v3705_v32, %v3703_v34  ;;  %vm3882_vm13 = vcmp.lt.s32.totalorder %v3860_v21, 4 }
 0x449   :  { %4538 = vsinq.f32 %v3623_v37  ;;  %v3863_v58 = vshrl.u32 %v7346_v43, %v3862_v28  ;;  %v3884_v36 = vsel %vm3882_vm13, %v3872_v23, 2102212464  ;;  %v3887_v59 = vsel %vm3879_vm10, %v3866_v41, %v3869_v55 }
 0x44a   :  { %v3888_v53 = vsel %vm3882_vm13, %v3875_v26, 920167782  ;;  %v3707_v45 = vclz %v4150_v57  ;;  %vm3880_vm14 = vcmp.lt.s32.totalorder %v3860_v21, 2  ;;  %vm3881_vm15 = vcmp.lt.s32.totalorder %v3860_v21, 3 }
 0x44b   :  { %v3891_v11 = vsel %vm3879_vm10, %v3869_v55, %v3872_v23  ;;  %v3883_v29 = vsel %vm3879_vm10, %v3863_v58, %v3866_v41  ;;  %v3885_v1 = vsel %vm3881_vm15, %v3869_v55, %v3884_v36  ;;  %v3889_v54 = vsel %vm3881_vm15, %v3872_v23, %v3888_v53 }
 0x44c   :  { %v3892_v9 = vsel %vm3882_vm13, %v3878_v18, 1326507024  ;;  %v4151_v17 = vadd.s32 4294967294, %v3707_v45  ;;  %v3890_v27 = vsel %vm3880_vm14, %v3887_v59, %v3889_v54  ;;  %v3628_v60 = vadd.s32 3, %v3624_v61 }
 0x44d   :  { %v3893_v42 = vsel %vm3881_vm15, %v3875_v26, %v3892_v9  ;;  %v7275_v48 = vmul.u32.u64.low %v3895_v56, %v3890_v27  ;;  %v7276_v15 = vmul.u32.u64.high %v3895_v56, %v3890_v27, %v7275_v48  ;;  %v3886_v43 = vsel %vm3880_vm14, %v3883_v29, %v3885_v1 }
 0x44e   :  { %v3894_v24 = vsel %vm3880_vm14, %v3891_v11, %v3893_v42  ;;  %vm4152_vm0 = vcmp.lt.s32.totalorder %v4151_v17, 0  ;;  %v3695_v28 = vadd.s32 %v7220_v8, %v7227_v5  ;;  %v3629_v22 = vand.u32 3, %v3628_v60 }
 0x44f   :  { %v7278_v4 = vmul.u32.u64.low %v3895_v56, %v3894_v24  ;;  %v7279_v14 = vmul.u32.u64.high %v3895_v56, %v3894_v24, %v7278_v4  ;;  %v3710_v44 = vsel %vm4152_vm0, 0, %v4151_v17  ;;  %v3902_v35 = vmul.u32 %v3895_v56, %v3886_v43 }
 0x450   :  { %v3711_v7 = vsub.s32 32, %v3710_v44  ;;  %v3715_v2 = vsub.s32 4294967266, %v3710_v44  ;;  %v3905_v63 = vadd.s32 1, %v7276_v15  ;;  %v3712_v38 = vshll.u32 %v3703_v34, %v3710_v44 }
 0x451   :  { %vm3904_vm1 = vc.u32 %v7279_v14, %v7275_v48  ;;  %vm3634_vm2 = vcmp.eq.s32.totalorder %v3629_v22, 2  ;;  %vm3630_vm3 = vcmp.lt.s32.totalorder %v3629_v22, 2  ;;  %vm3631_vm4 = vcmp.eq.s32.totalorder %v3629_v22, 0 }
 0x452   :  { %v3713_v62 = vshrl.u32 %v3695_v28, %v3711_v7  ;;  %v3716_v46 = vadd.s32 127, %v3715_v2  ;;  %v3906_v20 = vsel %vm3904_vm1, %v3905_v63, %v7276_v15  ;;  %vm3627_vm5 = vweird.f32 %v7415_v33 }
 0x453   :  { %v3907_v30 = vadd.s32 %v3906_v20, %v3902_v35  ;;  %vm3641_vm6 = vcmp.lt.s32.totalorder %v7418_v39, 0  ;;  %v3725_v37 = vsub.s32 4, %v7250_v13  ;;  %vm3640_vm7 = vcmp.le.f32.partialorder %v3639_v52, 0.7853982 }
 0x454   :  { %v3714_v12 = vor.u32 %v3713_v62, %v3712_v38  ;;  %v3717_v0 = vshll.u32 %v3716_v46, 23  ;;  %v3903_v53 = vadd.s32 %v7275_v48, %v7279_v14  ;;  %vm3731_vm10 = vweird.f32 %v7418_v39 }
 0x455   :  { %v4537_v10 = vpop.eup %4536  ;;  %v3908_v16 = vadd.s32 536870912, %v3907_v30  ;;  %v3726_v18 = vsel %vm3641_vm6, %v3725_v37, %v7250_v13  ;;  %vm3849_vm13 = vcmp.lt.s32.totalorder %v7421_v3, 0  ;;  %vm3848_vm14 = vcmp.le.f32.partialorder %v3847_v50, 0.7853982 }
 0x456   :  { %v4539_v21 = vpop.eup %4538  ;;  %v3635_v51 = vxor.u32 2147483648, %v4537_v10  ;;  %v3718_v5 = vor.u32 4788187, %v3717_v0  ;;  %v3721_v34 = vcvt.s32.f32 %v3714_v12  ;;  %v3728_v57 = vsel %vm3640_vm7, 0, %v3726_v18 }
 0x457   :  { %v3632_v8 = vxor.u32 2147483648, %v4539_v21  ;;  %v3909_v55 = vshrl.u32 %v3908_v16, 30  ;;  %v3732_v36 = vadd.s32 3, %v3728_v57 }
 0x458   :  { %v3636_v49 = vsel %vm3634_vm2, %v3635_v51, %v4539_v21  ;;  %v3719_v47 = vand.u32 2147483647, %v3718_v5  ;;  %vm3939_vm2 = vweird.f32 %v7421_v3 }
 0x459   :  { %v3633_v41 = vsel %vm3631_vm4, %v4537_v10, %v3632_v8  ;;  %v3910_v23 = vshll.u32 %v3909_v55, 30  ;;  %v3733_v54 = vand.u32 3, %v3732_v36  ;;  %v3933_v2 = vsub.s32 4, %v3909_v55 }
 0x45a   :  { %v3637_v6 = vsel %vm3630_vm3, %v3633_v41, %v3636_v49  ;;  %v3722_v31 = vmul.f32 %v3721_v34, %v3719_v47 }
 0x45b   :  { %v3638_v40 = vsel %vm3627_vm5, nan, %v3637_v6  ;;  %v3911_v19 = vsub.s32 %v3907_v30, %v3910_v23  ;;  %vm3738_vm9 = vcmp.eq.s32.totalorder %v3733_v54, 2  ;;  %vm3735_vm12 = vcmp.eq.s32.totalorder %v3733_v54, 0 }
 0x45c   :  { %3979 = vst [vmem:[#allocation2 + $0xe0] sm:$0xff] %v3638_v40  ;;  %v3723_v25 = vxor.u32 2147483648, %v3722_v31  ;;  %vm3734_vm11 = vcmp.lt.s32.totalorder %v3733_v54, 2  ;;  %v3934_v63 = vsel %vm3849_vm13, %v3933_v2, %v3909_v55 }
 0x45d   :  { %v3913_v26 = vsub.s32 0, %v3911_v19  ;;  %v3936_v38 = vsel %vm3848_vm14, 0, %v3934_v63 }
 0x45e   :  { %v3724_v32 = vsel %vm3641_vm6, %v3723_v25, %v3722_v31  ;;  %v3940_v62 = vadd.s32 3, %v3936_v38 }
 0x45f   :  { %v3727_v61 = vsel %vm3640_vm7, %v7418_v39, %v3724_v32  ;;  %v4158_v33 = vmin.u32 %v3913_v26, %v3911_v19 }
 0x460   :  { %4540 = vcosq.f32 %v3727_v61  ;;  %v3941_v39 = vand.u32 3, %v3940_v62 }
 0x461   :  { %4542 = vsinq.f32 %v3727_v61  ;;  %v3915_v56 = vclz %v4158_v33 }
 0x462   :  { %vm3946_vm15 = vcmp.eq.s32.totalorder %v3941_v39, 2  ;;  %vm3943_vm0 = vcmp.eq.s32.totalorder %v3941_v39, 0  ;;  %vm3942_vm1 = vcmp.lt.s32.totalorder %v3941_v39, 2 }
 0x463   :  { %v4159_v58 = vadd.s32 4294967294, %v3915_v56 }
 0x465   :  { %vm4160_vm8 = vcmp.lt.s32.totalorder %v4159_v58, 0 }
 0x466   :  { %v3918_v59 = vsel %vm4160_vm8, 0, %v4159_v58 }
 0x467   :  { %v3919_v45 = vsub.s32 32, %v3918_v59  ;;  %v3923_v11 = vsub.s32 4294967266, %v3918_v59  ;;  %v3920_v52 = vshll.u32 %v3911_v19, %v3918_v59 }
 0x469   :  { %v3921_v29 = vshrl.u32 %v3903_v53, %v3919_v45  ;;  %v3924_v1 = vadd.s32 127, %v3923_v11 }
 0x46b   :  { %v3922_v9 = vor.u32 %v3921_v29, %v3920_v52  ;;  %v3925_v17 = vshll.u32 %v3924_v1, 23 }
 0x46d   :  { %v4541_v27 = vpop.eup %4540  ;;  %v3926_v60 = vor.u32 4788187, %v3925_v17  ;;  %v3929_v4 = vcvt.s32.f32 %v3922_v9 }
 0x46e   :  { %v4543_v42 = vpop.eup %4542  ;;  %v3739_v13 = vxor.u32 2147483648, %v4541_v27 }
 0x46f   :  { %v3736_v24 = vxor.u32 2147483648, %v4543_v42  ;;  %v3927_v43 = vand.u32 2147483647, %v3926_v60 }
 0x470   :  { %v3740_v15 = vsel %vm3738_vm9, %v3739_v13, %v4543_v42 }
 0x471   :  { %v3737_v48 = vsel %vm3735_vm12, %v4541_v27, %v3736_v24  ;;  %v3930_v44 = vmul.f32 %v3929_v4, %v3927_v43 }
 0x472   :  { %v3741_v14 = vsel %vm3734_vm11, %v3737_v48, %v3740_v15 }
 0x473   :  { %v3742_v28 = vsel %vm3731_vm10, nan, %v3741_v14  ;;  %v3931_v7 = vxor.u32 2147483648, %v3930_v44 }
 0x474   :  { %3980 = vst [vmem:[#allocation2 + $0xe8] sm:$0xff] %v3742_v28 }
 0x475   :  { %v3932_v22 = vsel %vm3849_vm13, %v3931_v7, %v3930_v44 }
 0x476   :  { %v3935_v35 = vsel %vm3848_vm14, %v7421_v3, %v3932_v22 }
 0x477   :  { %4544 = vcosq.f32 %v3935_v35 }
 0x478   :  { %4546 = vsinq.f32 %v3935_v35 }
 0x484   :  { %v4545_v46 = vpop.eup %4544 }
 0x485   :  { %v4547_v20 = vpop.eup %4546  ;;  %v3947_v10 = vxor.u32 2147483648, %v4545_v46 }
 0x486   :  { %v3944_v12 = vxor.u32 2147483648, %v4547_v20 }
 0x487   :  { %v3948_v0 = vsel %vm3946_vm15, %v3947_v10, %v4547_v20 }
 0x488   :  { %v3945_v50 = vsel %vm3943_vm0, %v4545_v46, %v3944_v12 }
 0x489   :  { %v3949_v30 = vsel %vm3942_vm1, %v3945_v50, %v3948_v0 }
 0x48a   :  { %v3950_v21 = vsel %vm3939_vm2, nan, %v3949_v30 }
 0x48b   :  { %3982 = vst [vmem:[#allocation2 + $0xf8] sm:$0x3] %v3950_v21 }
 0x48c   :  { %4559 = shalt.err (!%p4556_p4)
}
 0x48d   :  { %s4577_s25 = smov 128   ;;  %s4578_s26 = smov 8  }
 0x48e   :  { %3994 = dma.vmem_to_hbm [thread:$0]  %s3989_s4, 4096, %s7308_s5, [#allocation3], %s4577_s25, %s4577_s25, %s4578_s26  }
 0x48f   :  { %4568 = dma.done.wait [#allocation3], 4096  }
 0x490   :  { %4569 = vsyncadd [#allocation3], 4294963200 }
 0x491   :  { %3998 = vsyncpa [#allocation3], 1 }

</bundles_post_ra>
